<compile_context>
chip_gen: v5e
topology: v5e:2x2
jax: 0.10.0
libtpu: 0.0.40
codegen_flags: <defaults>
</compile_context>

<pallas_src>
import jax
import jax.numpy as jnp
import numpy as np
from jax.experimental import pallas as pl
from jax.experimental.pallas import tpu as pltpu

# ---- model hyper-parameters (small, consistent with the module) ------------
VOCAB = 128
EMBED = 32
HIDDEN = 32
NUM_HEADS = 4
HEAD_DIM = HIDDEN // NUM_HEADS
FF_DIM = 512
BATCH = 2
SEQ = 8
LN_EPS = 1e-5  # PyTorch nn.LayerNorm default


# ============================ fused forward kernel ===========================
def dil_kernel(tok_ref, emb_ref, wih_ref, whh_ref, bl_ref,
               ln1g_ref, ln1b_ref,
               wq_ref, wk_ref, wv_ref, wo_ref,
               bq_ref, bk_ref, bv_ref, bo_ref,
               w1_ref, b1_ref, ln2g_ref, ln2b_ref, w2_ref, b2_ref,
               out_ref, rnn_scr, ctx_scr):
    f32 = jnp.float32
    B, T, H = BATCH, SEQ, HIDDEN
    BT = B * T

    # ---- embedding lookup as a one-hot matmul on the MXU --------------------
    # tok rows are TIME-major (r = t*B + b) so the LSTM can slice contiguously.
    tok = tok_ref[...]                                              # (BT, 1) int32
    lane = jax.lax.broadcasted_iota(jnp.int32, (BT, VOCAB), 1)
    onehot = (lane == tok).astype(f32)                              # (BT, VOCAB)
    emb = jnp.dot(onehot, emb_ref[...], preferred_element_type=f32)  # (BT, E) time-major

    # ---- LSTM: x@Wih hoisted into one matmul; recurrence batched over B -----
    # (PyTorch b_ih and b_hh are pre-fused into bl; weights pre-transposed.)
    gx = jnp.dot(emb, wih_ref[...], preferred_element_type=f32) + bl_ref[...]  # (BT, 4H)
    whh = whh_ref[...]
    h = jnp.zeros((B, H), f32)
    c = jnp.zeros((B, H), f32)
    for t in range(T):                                              # static unroll
        gates = gx[t * B:(t + 1) * B, :] + jnp.dot(h, whh, preferred_element_type=f32)
        i_g = jax.nn.sigmoid(gates[:, 0 * H:1 * H])
        f_g = jax.nn.sigmoid(gates[:, 1 * H:2 * H])
        g_g = jnp.tanh(gates[:, 2 * H:3 * H])
        o_g = jax.nn.sigmoid(gates[:, 3 * H:4 * H])
        c = f_g * c + i_g * g_g
        h = o_g * jnp.tanh(c)
        for b in range(B):                                          # batch-major rows
            rnn_scr[pl.ds(b * T + t, 1), :] = h[b:b + 1, :]
    rnn = rnn_scr[...]                                              # (BT, H) batch-major

    # ---- RMSNorm (eps outside sqrt, as in the module) + LayerNorm -----------
    rms = jnp.sqrt(jnp.mean(rnn * rnn, axis=-1, keepdims=True))
    xn = rnn / (rms + 1e-5)
    mu = jnp.mean(xn, axis=-1, keepdims=True)
    var = jnp.mean((xn - mu) ** 2, axis=-1, keepdims=True)
    rnn_n = (xn - mu) * jax.lax.rsqrt(var + LN_EPS) * ln1g_ref[...] + ln1b_ref[...]

    # ---- multi-head self-attention (query == key == value == rnn_n) ---------
    scale = 1.0 / jnp.sqrt(jnp.float32(HEAD_DIM))
    wq = wq_ref[...] * scale                  # fold the 1/sqrt(hd) score scale
    bq = bq_ref[...] * scale
    Q = jnp.dot(rnn_n, wq, preferred_element_type=f32) + bq         # (BT, H)
    K = jnp.dot(rnn_n, wk_ref[...], preferred_element_type=f32) + bk_ref[...]
    V = jnp.dot(rnn_n, wv_ref[...], preferred_element_type=f32) + bv_ref[...]
    for b in range(B):                                              # static loops
        r0 = b * T
        for hd in range(NUM_HEADS):
            c0 = hd * HEAD_DIM
            Qh = Q[r0:r0 + T, c0:c0 + HEAD_DIM]
            Kh = K[r0:r0 + T, c0:c0 + HEAD_DIM]
            Vh = V[r0:r0 + T, c0:c0 + HEAD_DIM]
            s = jnp.dot(Qh, Kh.T, preferred_element_type=f32)       # (T, T)
            s = s - jnp.max(s, axis=-1, keepdims=True)
            p = jnp.exp(s)
            p = p * pl.reciprocal(jnp.sum(p, axis=-1, keepdims=True), approx=True)
            ctx_scr[pl.ds(r0, T), pl.ds(c0, HEAD_DIM)] = jnp.dot(
                p, Vh, preferred_element_type=f32)
    ctx = ctx_scr[...]                                              # (BT, H)
    attn = jnp.dot(ctx, wo_ref[...], preferred_element_type=f32) + bo_ref[...]

    # ---- feed-forward on [context ; rnn_n] without materializing the concat -
    w1 = w1_ref[...]                                                # (2H, FF)
    h1 = (jnp.dot(attn, w1[:H, :], preferred_element_type=f32)
          + jnp.dot(rnn_n, w1[H:, :], preferred_element_type=f32)
          + b1_ref[...])
    h1 = jnp.maximum(h1, 0.0)                                       # ReLU
    # TODO(synk): Dropout(p=0.5) left as identity (eval mode).
    mu2 = jnp.mean(h1, axis=-1, keepdims=True)
    var2 = jnp.mean((h1 - mu2) ** 2, axis=-1, keepdims=True)
    h1 = (h1 - mu2) * jax.lax.rsqrt(var2 + LN_EPS) * ln2g_ref[...] + ln2b_ref[...]
    out_ref[...] = (jnp.dot(h1, w2_ref[...], preferred_element_type=f32)
                    + b2_ref[...]).astype(out_ref.dtype)


def dil_modeli_forward(params, tokens):
    B, T = tokens.shape
    # time-major token rows (r = t*B + b) so the LSTM recurrence can be batched
    # over B with contiguous per-step slices of gx.
    tok_tm = tokens.T.reshape(T * B, 1).astype(jnp.int32)
    return pl.pallas_call(
        dil_kernel,
        out_shape=jax.ShapeDtypeStruct((B * T, VOCAB), jnp.float32),
        scratch_shapes=[pltpu.VMEM((B * T, HIDDEN), jnp.float32),   # rnn rows (batch-major)
                        pltpu.VMEM((B * T, HIDDEN), jnp.float32)],  # attention ctx
    )(tok_tm, params["emb"], params["wih"], params["whh"], params["b_lstm"],
      params["ln1_g"], params["ln1_b"],
      params["wq"], params["wk"], params["wv"], params["wo"],
      params["bq"], params["bk"], params["bv"], params["bo"],
      params["w1"], params["b1"], params["ln2_g"], params["ln2_b"],
      params["w2"], params["b2"])


# ============================ pure-JAX reference =============================
def reference_forward(params, tokens):
    B, T = tokens.shape
    emb = params["emb"][tokens]

    def step(carry, x_t):
        h, c = carry
        gates = x_t @ params["wih"] + h @ params["whh"] + params["b_lstm"][0]
        i, f, g, o = jnp.split(gates, 4, axis=-1)
        c = jax.nn.sigmoid(f) * c + jax.nn.sigmoid(i) * jnp.tanh(g)
        h = jax.nn.sigmoid(o) * jnp.tanh(c)
        return (h, c), h

    h0 = jnp.zeros((B, HIDDEN), jnp.float32)
    c0 = jnp.zeros((B, HIDDEN), jnp.float32)
    _, hs = jax.lax.scan(step, (h0, c0), jnp.transpose(emb, (1, 0, 2)))
    rnn = jnp.transpose(hs, (1, 0, 2))

    rms = jnp.sqrt(jnp.mean(rnn ** 2, axis=-1, keepdims=True))
    xn = rnn / (rms + 1e-5)
    mu = jnp.mean(xn, -1, keepdims=True)
    var = jnp.mean((xn - mu) ** 2, -1, keepdims=True)
    rnn_n = (xn - mu) / jnp.sqrt(var + LN_EPS) * params["ln1_g"][0] + params["ln1_b"][0]

    Q = rnn_n @ params["wq"] + params["bq"][0]
    K = rnn_n @ params["wk"] + params["bk"][0]
    V = rnn_n @ params["wv"] + params["bv"][0]

    def heads(x):
        return x.reshape(B, T, NUM_HEADS, HEAD_DIM).transpose(0, 2, 1, 3)

    Qh, Kh, Vh = heads(Q), heads(K), heads(V)
    s = jnp.einsum("bhqd,bhkd->bhqk", Qh, Kh) / jnp.sqrt(jnp.float32(HEAD_DIM))
    p = jax.nn.softmax(s, axis=-1)
    ctx = jnp.einsum("bhqk,bhkd->bhqd", p, Vh).transpose(0, 2, 1, 3).reshape(B, T, HIDDEN)
    ctx = ctx @ params["wo"] + params["bo"][0]

    combined = jnp.concatenate([ctx, rnn_n], axis=-1).reshape(B * T, 2 * HIDDEN)
    h1 = jnp.maximum(combined @ params["w1"] + params["b1"][0], 0.0)
    mu = jnp.mean(h1, -1, keepdims=True)
    var = jnp.mean((h1 - mu) ** 2, -1, keepdims=True)
    h1 = (h1 - mu) / jnp.sqrt(var + LN_EPS) * params["ln2_g"][0] + params["ln2_b"][0]
    return h1 @ params["w2"] + params["b2"][0]


# =================================== main ====================================
def make_params(key):
    ks = jax.random.split(key, 20)

    def w(k, shape, scale=0.08):
        return jax.random.normal(k, shape, dtype=jnp.float32) * scale

    return {
        "emb": w(ks[0], (VOCAB, EMBED), 0.1),
        "wih": w(ks[1], (EMBED, 4 * HIDDEN)),
        "whh": w(ks[2], (HIDDEN, 4 * HIDDEN)),
        "b_lstm": w(ks[3], (1, 4 * HIDDEN)),
        "ln1_g": 1.0 + w(ks[4], (1, HIDDEN), 0.02),
        "ln1_b": w(ks[5], (1, HIDDEN), 0.02),
        "wq": w(ks[6], (HIDDEN, HIDDEN)),
        "wk": w(ks[7], (HIDDEN, HIDDEN)),
        "wv": w(ks[8], (HIDDEN, HIDDEN)),
        "wo": w(ks[9], (HIDDEN, HIDDEN)),
        "bq": w(ks[10], (1, HIDDEN), 0.02),
        "bk": w(ks[11], (1, HIDDEN), 0.02),
        "bv": w(ks[12], (1, HIDDEN), 0.02),
        "bo": w(ks[13], (1, HIDDEN), 0.02),
        "w1": w(ks[14], (2 * HIDDEN, FF_DIM)),
        "b1": w(ks[15], (1, FF_DIM), 0.02),
        "ln2_g": 1.0 + w(ks[16], (1, FF_DIM), 0.02),
        "ln2_b": w(ks[17], (1, FF_DIM), 0.02),
        "w2": w(ks[18], (FF_DIM, VOCAB)),
        "b2": w(ks[19], (1, VOCAB), 0.02),
    }


if __name__ == "__main__":
    key = jax.random.PRNGKey(0)
    pkey, tkey = jax.random.split(key)
    params = make_params(pkey)
    tokens = jax.random.randint(tkey, (BATCH, SEQ), 0, VOCAB, dtype=jnp.int32)

    out = jax.jit(dil_modeli_forward)(params, tokens)
    out = jax.block_until_ready(out)
    assert out.shape == (BATCH * SEQ, VOCAB), out.shape

    ref = jax.block_until_ready(jax.jit(reference_forward)(params, tokens))
    np.testing.assert_allclose(np.asarray(out), np.asarray(ref),
                               rtol=2e-2, atol=2e-3)
    print("KERNEL_OK")
</pallas_src>

<mosaic_0001>
module attributes {stable_mosaic.version = 11 : i64} {
  func.func @dil_kernel(%arg0: memref<16x1xi32, #tpu.memory_space<vmem>>, %arg1: memref<128x32xf32, #tpu.memory_space<vmem>>, %arg2: memref<32x128xf32, #tpu.memory_space<vmem>>, %arg3: memref<32x128xf32, #tpu.memory_space<vmem>>, %arg4: memref<1x128xf32, #tpu.memory_space<vmem>>, %arg5: memref<1x32xf32, #tpu.memory_space<vmem>>, %arg6: memref<1x32xf32, #tpu.memory_space<vmem>>, %arg7: memref<32x32xf32, #tpu.memory_space<vmem>>, %arg8: memref<32x32xf32, #tpu.memory_space<vmem>>, %arg9: memref<32x32xf32, #tpu.memory_space<vmem>>, %arg10: memref<32x32xf32, #tpu.memory_space<vmem>>, %arg11: memref<1x32xf32, #tpu.memory_space<vmem>>, %arg12: memref<1x32xf32, #tpu.memory_space<vmem>>, %arg13: memref<1x32xf32, #tpu.memory_space<vmem>>, %arg14: memref<1x32xf32, #tpu.memory_space<vmem>>, %arg15: memref<64x512xf32, #tpu.memory_space<vmem>>, %arg16: memref<1x512xf32, #tpu.memory_space<vmem>>, %arg17: memref<1x512xf32, #tpu.memory_space<vmem>>, %arg18: memref<1x512xf32, #tpu.memory_space<vmem>>, %arg19: memref<512x128xf32, #tpu.memory_space<vmem>>, %arg20: memref<1x128xf32, #tpu.memory_space<vmem>>, %arg21: memref<16x128xf32, #tpu.memory_space<vmem>>, %arg22: memref<16x32xf32, #tpu.memory_space<vmem>>, %arg23: memref<16x32xf32, #tpu.memory_space<vmem>>) attributes {dimension_semantics = [], scalar_prefetch = 0 : i64, scratch_operands = 2 : i64, tpu.core_type = #tpu.core_type<tc>} {
    %c0 = arith.constant 0 : index
    %c0_0 = arith.constant 0 : index
    %0 = vector.load %arg0[%c0, %c0_0] : memref<16x1xi32, #tpu.memory_space<vmem>>, vector<16x1xi32>
    %1 = tpu.iota {dimensions = array<i32: 1>} : vector<16x128xi32>
    %2 = vector.broadcast %0 : vector<16x1xi32> to vector<16x128xi32>
    %3 = arith.cmpi eq, %1, %2 : vector<16x128xi32>
    %4 = arith.extui %3 : vector<16x128xi1> to vector<16x128xi32>
    %5 = arith.sitofp %4 : vector<16x128xi32> to vector<16x128xf32>
    %c0_1 = arith.constant 0 : index
    %c0_2 = arith.constant 0 : index
    %6 = vector.load %arg1[%c0_1, %c0_2] : memref<128x32xf32, #tpu.memory_space<vmem>>, vector<128x32xf32>
    %cst = arith.constant dense<0.000000e+00> : vector<16x32xf32>
    %7 = tpu.matmul %5, %6, %cst {dimension_numbers = #tpu.dot_dimension_numbers<[1], [0], [0], [1], [0, 0, 1, 1], [], []>} : vector<16x128xf32>, vector<128x32xf32>, vector<16x32xf32> -> vector<16x32xf32>
    %c0_3 = arith.constant 0 : index
    %c0_4 = arith.constant 0 : index
    %8 = vector.load %arg2[%c0_3, %c0_4] : memref<32x128xf32, #tpu.memory_space<vmem>>, vector<32x128xf32>
    %cst_5 = arith.constant dense<0.000000e+00> : vector<16x128xf32>
    %9 = tpu.matmul %7, %8, %cst_5 {dimension_numbers = #tpu.dot_dimension_numbers<[1], [0], [0], [1], [0, 0, 1, 1], [], []>} : vector<16x32xf32>, vector<32x128xf32>, vector<16x128xf32> -> vector<16x128xf32>
    %c0_6 = arith.constant 0 : index
    %c0_7 = arith.constant 0 : index
    %10 = vector.load %arg4[%c0_6, %c0_7] : memref<1x128xf32, #tpu.memory_space<vmem>>, vector<1x128xf32>
    %11 = vector.broadcast %10 : vector<1x128xf32> to vector<16x128xf32>
    %12 = arith.addf %9, %11 : vector<16x128xf32>
    %c0_8 = arith.constant 0 : index
    %c0_9 = arith.constant 0 : index
    %13 = vector.load %arg3[%c0_8, %c0_9] : memref<32x128xf32, #tpu.memory_space<vmem>>, vector<32x128xf32>
    %cst_10 = arith.constant 0.000000e+00 : f32
    %14 = vector.broadcast %cst_10 : f32 to vector<2x32xf32>
    %cst_11 = arith.constant 0.000000e+00 : f32
    %15 = vector.broadcast %cst_11 : f32 to vector<2x32xf32>
    %16 = vector.extract_strided_slice %12 {offsets = [0, 0], sizes = [2, 128], strides = [1, 1]} : vector<16x128xf32> to vector<2x128xf32>
    %cst_12 = arith.constant dense<0.000000e+00> : vector<2x128xf32>
    %17 = tpu.matmul %14, %13, %cst_12 {dimension_numbers = #tpu.dot_dimension_numbers<[1], [0], [0], [1], [0, 0, 1, 1], [], []>} : vector<2x32xf32>, vector<32x128xf32>, vector<2x128xf32> -> vector<2x128xf32>
    %18 = arith.addf %16, %17 : vector<2x128xf32>
    %19 = vector.extract_strided_slice %18 {offsets = [0, 0], sizes = [2, 32], strides = [1, 1]} : vector<2x128xf32> to vector<2x32xf32>
    %20 = arith.negf %19 : vector<2x32xf32>
    %21 = math.exp %20 : vector<2x32xf32>
    %cst_13 = arith.constant 1.000000e+00 : f32
    %22 = vector.broadcast %cst_13 : f32 to vector<2x32xf32>
    %23 = arith.addf %22, %21 : vector<2x32xf32>
    %24 = arith.divf %22, %23 : vector<2x32xf32>
    %25 = vector.extract_strided_slice %18 {offsets = [0, 32], sizes = [2, 32], strides = [1, 1]} : vector<2x128xf32> to vector<2x32xf32>
    %26 = arith.negf %25 : vector<2x32xf32>
    %27 = math.exp %26 : vector<2x32xf32>
    %cst_14 = arith.constant 1.000000e+00 : f32
    %28 = vector.broadcast %cst_14 : f32 to vector<2x32xf32>
    %29 = arith.addf %28, %27 : vector<2x32xf32>
    %30 = arith.divf %28, %29 : vector<2x32xf32>
    %31 = vector.extract_strided_slice %18 {offsets = [0, 64], sizes = [2, 32], strides = [1, 1]} : vector<2x128xf32> to vector<2x32xf32>
    %32 = math.tanh %31 : vector<2x32xf32>
    %33 = vector.extract_strided_slice %18 {offsets = [0, 96], sizes = [2, 32], strides = [1, 1]} : vector<2x128xf32> to vector<2x32xf32>
    %34 = arith.negf %33 : vector<2x32xf32>
    %35 = math.exp %34 : vector<2x32xf32>
    %cst_15 = arith.constant 1.000000e+00 : f32
    %36 = vector.broadcast %cst_15 : f32 to vector<2x32xf32>
    %37 = arith.addf %36, %35 : vector<2x32xf32>
    %38 = arith.divf %36, %37 : vector<2x32xf32>
    %39 = arith.mulf %30, %15 : vector<2x32xf32>
    %40 = arith.mulf %24, %32 : vector<2x32xf32>
    %41 = arith.addf %39, %40 : vector<2x32xf32>
    %42 = math.tanh %41 : vector<2x32xf32>
    %43 = arith.mulf %38, %42 : vector<2x32xf32>
    %44 = vector.extract_strided_slice %43 {offsets = [0, 0], sizes = [1, 32], strides = [1, 1]} : vector<2x32xf32> to vector<1x32xf32>
    %c0_16 = arith.constant 0 : index
    %c0_17 = arith.constant 0 : index
    %45 = vector.load %arg22[%c0_16, %c0_17] : memref<16x32xf32, #tpu.memory_space<vmem>>, vector<1x32xf32>
    tpu.vector_store %arg22[%c0_16, %c0_17], %44 {strides = array<i32>} : memref<16x32xf32, #tpu.memory_space<vmem>>, vector<1x32xf32>,
    %46 = vector.extract_strided_slice %43 {offsets = [1, 0], sizes = [1, 32], strides = [1, 1]} : vector<2x32xf32> to vector<1x32xf32>
    %c8 = arith.constant 8 : index
    %c0_18 = arith.constant 0 : index
    %47 = vector.load %arg22[%c8, %c0_18] : memref<16x32xf32, #tpu.memory_space<vmem>>, vector<1x32xf32>
    tpu.vector_store %arg22[%c8, %c0_18], %46 {strides = array<i32>} : memref<16x32xf32, #tpu.memory_space<vmem>>, vector<1x32xf32>,
    %48 = vector.extract_strided_slice %12 {offsets = [2, 0], sizes = [2, 128], strides = [1, 1]} : vector<16x128xf32> to vector<2x128xf32>
    %cst_19 = arith.constant dense<0.000000e+00> : vector<2x128xf32>
    %49 = tpu.matmul %43, %13, %cst_19 {dimension_numbers = #tpu.dot_dimension_numbers<[1], [0], [0], [1], [0, 0, 1, 1], [], []>} : vector<2x32xf32>, vector<32x128xf32>, vector<2x128xf32> -> vector<2x128xf32>
    %50 = arith.addf %48, %49 : vector<2x128xf32>
    %51 = vector.extract_strided_slice %50 {offsets = [0, 0], sizes = [2, 32], strides = [1, 1]} : vector<2x128xf32> to vector<2x32xf32>
    %52 = arith.negf %51 : vector<2x32xf32>
    %53 = math.exp %52 : vector<2x32xf32>
    %cst_20 = arith.constant 1.000000e+00 : f32
    %54 = vector.broadcast %cst_20 : f32 to vector<2x32xf32>
    %55 = arith.addf %54, %53 : vector<2x32xf32>
    %56 = arith.divf %54, %55 : vector<2x32xf32>
    %57 = vector.extract_strided_slice %50 {offsets = [0, 32], sizes = [2, 32], strides = [1, 1]} : vector<2x128xf32> to vector<2x32xf32>
    %58 = arith.negf %57 : vector<2x32xf32>
    %59 = math.exp %58 : vector<2x32xf32>
    %cst_21 = arith.constant 1.000000e+00 : f32
    %60 = vector.broadcast %cst_21 : f32 to vector<2x32xf32>
    %61 = arith.addf %60, %59 : vector<2x32xf32>
    %62 = arith.divf %60, %61 : vector<2x32xf32>
    %63 = vector.extract_strided_slice %50 {offsets = [0, 64], sizes = [2, 32], strides = [1, 1]} : vector<2x128xf32> to vector<2x32xf32>
    %64 = math.tanh %63 : vector<2x32xf32>
    %65 = vector.extract_strided_slice %50 {offsets = [0, 96], sizes = [2, 32], strides = [1, 1]} : vector<2x128xf32> to vector<2x32xf32>
    %66 = arith.negf %65 : vector<2x32xf32>
    %67 = math.exp %66 : vector<2x32xf32>
    %cst_22 = arith.constant 1.000000e+00 : f32
    %68 = vector.broadcast %cst_22 : f32 to vector<2x32xf32>
    %69 = arith.addf %68, %67 : vector<2x32xf32>
    %70 = arith.divf %68, %69 : vector<2x32xf32>
    %71 = arith.mulf %62, %41 : vector<2x32xf32>
    %72 = arith.mulf %56, %64 : vector<2x32xf32>
    %73 = arith.addf %71, %72 : vector<2x32xf32>
    %74 = math.tanh %73 : vector<2x32xf32>
    %75 = arith.mulf %70, %74 : vector<2x32xf32>
    %76 = vector.extract_strided_slice %75 {offsets = [0, 0], sizes = [1, 32], strides = [1, 1]} : vector<2x32xf32> to vector<1x32xf32>
    %c1 = arith.constant 1 : index
    %c0_23 = arith.constant 0 : index
    %77 = vector.load %arg22[%c1, %c0_23] : memref<16x32xf32, #tpu.memory_space<vmem>>, vector<1x32xf32>
    tpu.vector_store %arg22[%c1, %c0_23], %76 {strides = array<i32>} : memref<16x32xf32, #tpu.memory_space<vmem>>, vector<1x32xf32>,
    %78 = vector.extract_strided_slice %75 {offsets = [1, 0], sizes = [1, 32], strides = [1, 1]} : vector<2x32xf32> to vector<1x32xf32>
    %c9 = arith.constant 9 : index
    %c0_24 = arith.constant 0 : index
    %79 = vector.load %arg22[%c9, %c0_24] : memref<16x32xf32, #tpu.memory_space<vmem>>, vector<1x32xf32>
    tpu.vector_store %arg22[%c9, %c0_24], %78 {strides = array<i32>} : memref<16x32xf32, #tpu.memory_space<vmem>>, vector<1x32xf32>,
    %80 = vector.extract_strided_slice %12 {offsets = [4, 0], sizes = [2, 128], strides = [1, 1]} : vector<16x128xf32> to vector<2x128xf32>
    %cst_25 = arith.constant dense<0.000000e+00> : vector<2x128xf32>
    %81 = tpu.matmul %75, %13, %cst_25 {dimension_numbers = #tpu.dot_dimension_numbers<[1], [0], [0], [1], [0, 0, 1, 1], [], []>} : vector<2x32xf32>, vector<32x128xf32>, vector<2x128xf32> -> vector<2x128xf32>
    %82 = arith.addf %80, %81 : vector<2x128xf32>
    %83 = vector.extract_strided_slice %82 {offsets = [0, 0], sizes = [2, 32], strides = [1, 1]} : vector<2x128xf32> to vector<2x32xf32>
    %84 = arith.negf %83 : vector<2x32xf32>
    %85 = math.exp %84 : vector<2x32xf32>
    %cst_26 = arith.constant 1.000000e+00 : f32
    %86 = vector.broadcast %cst_26 : f32 to vector<2x32xf32>
    %87 = arith.addf %86, %85 : vector<2x32xf32>
    %88 = arith.divf %86, %87 : vector<2x32xf32>
    %89 = vector.extract_strided_slice %82 {offsets = [0, 32], sizes = [2, 32], strides = [1, 1]} : vector<2x128xf32> to vector<2x32xf32>
    %90 = arith.negf %89 : vector<2x32xf32>
    %91 = math.exp %90 : vector<2x32xf32>
    %cst_27 = arith.constant 1.000000e+00 : f32
    %92 = vector.broadcast %cst_27 : f32 to vector<2x32xf32>
    %93 = arith.addf %92, %91 : vector<2x32xf32>
    %94 = arith.divf %92, %93 : vector<2x32xf32>
    %95 = vector.extract_strided_slice %82 {offsets = [0, 64], sizes = [2, 32], strides = [1, 1]} : vector<2x128xf32> to vector<2x32xf32>
    %96 = math.tanh %95 : vector<2x32xf32>
    %97 = vector.extract_strided_slice %82 {offsets = [0, 96], sizes = [2, 32], strides = [1, 1]} : vector<2x128xf32> to vector<2x32xf32>
    %98 = arith.negf %97 : vector<2x32xf32>
    %99 = math.exp %98 : vector<2x32xf32>
    %cst_28 = arith.constant 1.000000e+00 : f32
    %100 = vector.broadcast %cst_28 : f32 to vector<2x32xf32>
    %101 = arith.addf %100, %99 : vector<2x32xf32>
    %102 = arith.divf %100, %101 : vector<2x32xf32>
    %103 = arith.mulf %94, %73 : vector<2x32xf32>
    %104 = arith.mulf %88, %96 : vector<2x32xf32>
    %105 = arith.addf %103, %104 : vector<2x32xf32>
    %106 = math.tanh %105 : vector<2x32xf32>
    %107 = arith.mulf %102, %106 : vector<2x32xf32>
    %108 = vector.extract_strided_slice %107 {offsets = [0, 0], sizes = [1, 32], strides = [1, 1]} : vector<2x32xf32> to vector<1x32xf32>
    %c2 = arith.constant 2 : index
    %c0_29 = arith.constant 0 : index
    %109 = vector.load %arg22[%c2, %c0_29] : memref<16x32xf32, #tpu.memory_space<vmem>>, vector<1x32xf32>
    tpu.vector_store %arg22[%c2, %c0_29], %108 {strides = array<i32>} : memref<16x32xf32, #tpu.memory_space<vmem>>, vector<1x32xf32>,
    %110 = vector.extract_strided_slice %107 {offsets = [1, 0], sizes = [1, 32], strides = [1, 1]} : vector<2x32xf32> to vector<1x32xf32>
    %c10 = arith.constant 10 : index
    %c0_30 = arith.constant 0 : index
    %111 = vector.load %arg22[%c10, %c0_30] : memref<16x32xf32, #tpu.memory_space<vmem>>, vector<1x32xf32>
    tpu.vector_store %arg22[%c10, %c0_30], %110 {strides = array<i32>} : memref<16x32xf32, #tpu.memory_space<vmem>>, vector<1x32xf32>,
    %112 = vector.extract_strided_slice %12 {offsets = [6, 0], sizes = [2, 128], strides = [1, 1]} : vector<16x128xf32> to vector<2x128xf32>
    %cst_31 = arith.constant dense<0.000000e+00> : vector<2x128xf32>
    %113 = tpu.matmul %107, %13, %cst_31 {dimension_numbers = #tpu.dot_dimension_numbers<[1], [0], [0], [1], [0, 0, 1, 1], [], []>} : vector<2x32xf32>, vector<32x128xf32>, vector<2x128xf32> -> vector<2x128xf32>
    %114 = arith.addf %112, %113 : vector<2x128xf32>
    %115 = vector.extract_strided_slice %114 {offsets = [0, 0], sizes = [2, 32], strides = [1, 1]} : vector<2x128xf32> to vector<2x32xf32>
    %116 = arith.negf %115 : vector<2x32xf32>
    %117 = math.exp %116 : vector<2x32xf32>
    %cst_32 = arith.constant 1.000000e+00 : f32
    %118 = vector.broadcast %cst_32 : f32 to vector<2x32xf32>
    %119 = arith.addf %118, %117 : vector<2x32xf32>
    %120 = arith.divf %118, %119 : vector<2x32xf32>
    %121 = vector.extract_strided_slice %114 {offsets = [0, 32], sizes = [2, 32], strides = [1, 1]} : vector<2x128xf32> to vector<2x32xf32>
    %122 = arith.negf %121 : vector<2x32xf32>
    %123 = math.exp %122 : vector<2x32xf32>
    %cst_33 = arith.constant 1.000000e+00 : f32
    %124 = vector.broadcast %cst_33 : f32 to vector<2x32xf32>
    %125 = arith.addf %124, %123 : vector<2x32xf32>
    %126 = arith.divf %124, %125 : vector<2x32xf32>
    %127 = vector.extract_strided_slice %114 {offsets = [0, 64], sizes = [2, 32], strides = [1, 1]} : vector<2x128xf32> to vector<2x32xf32>
    %128 = math.tanh %127 : vector<2x32xf32>
    %129 = vector.extract_strided_slice %114 {offsets = [0, 96], sizes = [2, 32], strides = [1, 1]} : vector<2x128xf32> to vector<2x32xf32>
    %130 = arith.negf %129 : vector<2x32xf32>
    %131 = math.exp %130 : vector<2x32xf32>
    %cst_34 = arith.constant 1.000000e+00 : f32
    %132 = vector.broadcast %cst_34 : f32 to vector<2x32xf32>
    %133 = arith.addf %132, %131 : vector<2x32xf32>
    %134 = arith.divf %132, %133 : vector<2x32xf32>
    %135 = arith.mulf %126, %105 : vector<2x32xf32>
    %136 = arith.mulf %120, %128 : vector<2x32xf32>
    %137 = arith.addf %135, %136 : vector<2x32xf32>
    %138 = math.tanh %137 : vector<2x32xf32>
    %139 = arith.mulf %134, %138 : vector<2x32xf32>
    %140 = vector.extract_strided_slice %139 {offsets = [0, 0], sizes = [1, 32], strides = [1, 1]} : vector<2x32xf32> to vector<1x32xf32>
    %c3 = arith.constant 3 : index
    %c0_35 = arith.constant 0 : index
    %141 = vector.load %arg22[%c3, %c0_35] : memref<16x32xf32, #tpu.memory_space<vmem>>, vector<1x32xf32>
    tpu.vector_store %arg22[%c3, %c0_35], %140 {strides = array<i32>} : memref<16x32xf32, #tpu.memory_space<vmem>>, vector<1x32xf32>,
    %142 = vector.extract_strided_slice %139 {offsets = [1, 0], sizes = [1, 32], strides = [1, 1]} : vector<2x32xf32> to vector<1x32xf32>
    %c11 = arith.constant 11 : index
    %c0_36 = arith.constant 0 : index
    %143 = vector.load %arg22[%c11, %c0_36] : memref<16x32xf32, #tpu.memory_space<vmem>>, vector<1x32xf32>
    tpu.vector_store %arg22[%c11, %c0_36], %142 {strides = array<i32>} : memref<16x32xf32, #tpu.memory_space<vmem>>, vector<1x32xf32>,
    %144 = vector.extract_strided_slice %12 {offsets = [8, 0], sizes = [2, 128], strides = [1, 1]} : vector<16x128xf32> to vector<2x128xf32>
    %cst_37 = arith.constant dense<0.000000e+00> : vector<2x128xf32>
    %145 = tpu.matmul %139, %13, %cst_37 {dimension_numbers = #tpu.dot_dimension_numbers<[1], [0], [0], [1], [0, 0, 1, 1], [], []>} : vector<2x32xf32>, vector<32x128xf32>, vector<2x128xf32> -> vector<2x128xf32>
    %146 = arith.addf %144, %145 : vector<2x128xf32>
    %147 = vector.extract_strided_slice %146 {offsets = [0, 0], sizes = [2, 32], strides = [1, 1]} : vector<2x128xf32> to vector<2x32xf32>
    %148 = arith.negf %147 : vector<2x32xf32>
    %149 = math.exp %148 : vector<2x32xf32>
    %cst_38 = arith.constant 1.000000e+00 : f32
    %150 = vector.broadcast %cst_38 : f32 to vector<2x32xf32>
    %151 = arith.addf %150, %149 : vector<2x32xf32>
    %152 = arith.divf %150, %151 : vector<2x32xf32>
    %153 = vector.extract_strided_slice %146 {offsets = [0, 32], sizes = [2, 32], strides = [1, 1]} : vector<2x128xf32> to vector<2x32xf32>
    %154 = arith.negf %153 : vector<2x32xf32>
    %155 = math.exp %154 : vector<2x32xf32>
    %cst_39 = arith.constant 1.000000e+00 : f32
    %156 = vector.broadcast %cst_39 : f32 to vector<2x32xf32>
    %157 = arith.addf %156, %155 : vector<2x32xf32>
    %158 = arith.divf %156, %157 : vector<2x32xf32>
    %159 = vector.extract_strided_slice %146 {offsets = [0, 64], sizes = [2, 32], strides = [1, 1]} : vector<2x128xf32> to vector<2x32xf32>
    %160 = math.tanh %159 : vector<2x32xf32>
    %161 = vector.extract_strided_slice %146 {offsets = [0, 96], sizes = [2, 32], strides = [1, 1]} : vector<2x128xf32> to vector<2x32xf32>
    %162 = arith.negf %161 : vector<2x32xf32>
    %163 = math.exp %162 : vector<2x32xf32>
    %cst_40 = arith.constant 1.000000e+00 : f32
    %164 = vector.broadcast %cst_40 : f32 to vector<2x32xf32>
    %165 = arith.addf %164, %163 : vector<2x32xf32>
    %166 = arith.divf %164, %165 : vector<2x32xf32>
    %167 = arith.mulf %158, %137 : vector<2x32xf32>
    %168 = arith.mulf %152, %160 : vector<2x32xf32>
    %169 = arith.addf %167, %168 : vector<2x32xf32>
    %170 = math.tanh %169 : vector<2x32xf32>
    %171 = arith.mulf %166, %170 : vector<2x32xf32>
    %172 = vector.extract_strided_slice %171 {offsets = [0, 0], sizes = [1, 32], strides = [1, 1]} : vector<2x32xf32> to vector<1x32xf32>
    %c4 = arith.constant 4 : index
    %c0_41 = arith.constant 0 : index
    %173 = vector.load %arg22[%c4, %c0_41] : memref<16x32xf32, #tpu.memory_space<vmem>>, vector<1x32xf32>
    tpu.vector_store %arg22[%c4, %c0_41], %172 {strides = array<i32>} : memref<16x32xf32, #tpu.memory_space<vmem>>, vector<1x32xf32>,
    %174 = vector.extract_strided_slice %171 {offsets = [1, 0], sizes = [1, 32], strides = [1, 1]} : vector<2x32xf32> to vector<1x32xf32>
    %c12 = arith.constant 12 : index
    %c0_42 = arith.constant 0 : index
    %175 = vector.load %arg22[%c12, %c0_42] : memref<16x32xf32, #tpu.memory_space<vmem>>, vector<1x32xf32>
    tpu.vector_store %arg22[%c12, %c0_42], %174 {strides = array<i32>} : memref<16x32xf32, #tpu.memory_space<vmem>>, vector<1x32xf32>,
    %176 = vector.extract_strided_slice %12 {offsets = [10, 0], sizes = [2, 128], strides = [1, 1]} : vector<16x128xf32> to vector<2x128xf32>
    %cst_43 = arith.constant dense<0.000000e+00> : vector<2x128xf32>
    %177 = tpu.matmul %171, %13, %cst_43 {dimension_numbers = #tpu.dot_dimension_numbers<[1], [0], [0], [1], [0, 0, 1, 1], [], []>} : vector<2x32xf32>, vector<32x128xf32>, vector<2x128xf32> -> vector<2x128xf32>
    %178 = arith.addf %176, %177 : vector<2x128xf32>
    %179 = vector.extract_strided_slice %178 {offsets = [0, 0], sizes = [2, 32], strides = [1, 1]} : vector<2x128xf32> to vector<2x32xf32>
    %180 = arith.negf %179 : vector<2x32xf32>
    %181 = math.exp %180 : vector<2x32xf32>
    %cst_44 = arith.constant 1.000000e+00 : f32
    %182 = vector.broadcast %cst_44 : f32 to vector<2x32xf32>
    %183 = arith.addf %182, %181 : vector<2x32xf32>
    %184 = arith.divf %182, %183 : vector<2x32xf32>
    %185 = vector.extract_strided_slice %178 {offsets = [0, 32], sizes = [2, 32], strides = [1, 1]} : vector<2x128xf32> to vector<2x32xf32>
    %186 = arith.negf %185 : vector<2x32xf32>
    %187 = math.exp %186 : vector<2x32xf32>
    %cst_45 = arith.constant 1.000000e+00 : f32
    %188 = vector.broadcast %cst_45 : f32 to vector<2x32xf32>
    %189 = arith.addf %188, %187 : vector<2x32xf32>
    %190 = arith.divf %188, %189 : vector<2x32xf32>
    %191 = vector.extract_strided_slice %178 {offsets = [0, 64], sizes = [2, 32], strides = [1, 1]} : vector<2x128xf32> to vector<2x32xf32>
    %192 = math.tanh %191 : vector<2x32xf32>
    %193 = vector.extract_strided_slice %178 {offsets = [0, 96], sizes = [2, 32], strides = [1, 1]} : vector<2x128xf32> to vector<2x32xf32>
    %194 = arith.negf %193 : vector<2x32xf32>
    %195 = math.exp %194 : vector<2x32xf32>
    %cst_46 = arith.constant 1.000000e+00 : f32
    %196 = vector.broadcast %cst_46 : f32 to vector<2x32xf32>
    %197 = arith.addf %196, %195 : vector<2x32xf32>
    %198 = arith.divf %196, %197 : vector<2x32xf32>
    %199 = arith.mulf %190, %169 : vector<2x32xf32>
    %200 = arith.mulf %184, %192 : vector<2x32xf32>
    %201 = arith.addf %199, %200 : vector<2x32xf32>
    %202 = math.tanh %201 : vector<2x32xf32>
    %203 = arith.mulf %198, %202 : vector<2x32xf32>
    %204 = vector.extract_strided_slice %203 {offsets = [0, 0], sizes = [1, 32], strides = [1, 1]} : vector<2x32xf32> to vector<1x32xf32>
    %c5 = arith.constant 5 : index
    %c0_47 = arith.constant 0 : index
    %205 = vector.load %arg22[%c5, %c0_47] : memref<16x32xf32, #tpu.memory_space<vmem>>, vector<1x32xf32>
    tpu.vector_store %arg22[%c5, %c0_47], %204 {strides = array<i32>} : memref<16x32xf32, #tpu.memory_space<vmem>>, vector<1x32xf32>,
    %206 = vector.extract_strided_slice %203 {offsets = [1, 0], sizes = [1, 32], strides = [1, 1]} : vector<2x32xf32> to vector<1x32xf32>
    %c13 = arith.constant 13 : index
    %c0_48 = arith.constant 0 : index
    %207 = vector.load %arg22[%c13, %c0_48] : memref<16x32xf32, #tpu.memory_space<vmem>>, vector<1x32xf32>
    tpu.vector_store %arg22[%c13, %c0_48], %206 {strides = array<i32>} : memref<16x32xf32, #tpu.memory_space<vmem>>, vector<1x32xf32>,
    %208 = vector.extract_strided_slice %12 {offsets = [12, 0], sizes = [2, 128], strides = [1, 1]} : vector<16x128xf32> to vector<2x128xf32>
    %cst_49 = arith.constant dense<0.000000e+00> : vector<2x128xf32>
    %209 = tpu.matmul %203, %13, %cst_49 {dimension_numbers = #tpu.dot_dimension_numbers<[1], [0], [0], [1], [0, 0, 1, 1], [], []>} : vector<2x32xf32>, vector<32x128xf32>, vector<2x128xf32> -> vector<2x128xf32>
    %210 = arith.addf %208, %209 : vector<2x128xf32>
    %211 = vector.extract_strided_slice %210 {offsets = [0, 0], sizes = [2, 32], strides = [1, 1]} : vector<2x128xf32> to vector<2x32xf32>
    %212 = arith.negf %211 : vector<2x32xf32>
    %213 = math.exp %212 : vector<2x32xf32>
    %cst_50 = arith.constant 1.000000e+00 : f32
    %214 = vector.broadcast %cst_50 : f32 to vector<2x32xf32>
    %215 = arith.addf %214, %213 : vector<2x32xf32>
    %216 = arith.divf %214, %215 : vector<2x32xf32>
    %217 = vector.extract_strided_slice %210 {offsets = [0, 32], sizes = [2, 32], strides = [1, 1]} : vector<2x128xf32> to vector<2x32xf32>
    %218 = arith.negf %217 : vector<2x32xf32>
    %219 = math.exp %218 : vector<2x32xf32>
    %cst_51 = arith.constant 1.000000e+00 : f32
    %220 = vector.broadcast %cst_51 : f32 to vector<2x32xf32>
    %221 = arith.addf %220, %219 : vector<2x32xf32>
    %222 = arith.divf %220, %221 : vector<2x32xf32>
    %223 = vector.extract_strided_slice %210 {offsets = [0, 64], sizes = [2, 32], strides = [1, 1]} : vector<2x128xf32> to vector<2x32xf32>
    %224 = math.tanh %223 : vector<2x32xf32>
    %225 = vector.extract_strided_slice %210 {offsets = [0, 96], sizes = [2, 32], strides = [1, 1]} : vector<2x128xf32> to vector<2x32xf32>
    %226 = arith.negf %225 : vector<2x32xf32>
    %227 = math.exp %226 : vector<2x32xf32>
    %cst_52 = arith.constant 1.000000e+00 : f32
    %228 = vector.broadcast %cst_52 : f32 to vector<2x32xf32>
    %229 = arith.addf %228, %227 : vector<2x32xf32>
    %230 = arith.divf %228, %229 : vector<2x32xf32>
    %231 = arith.mulf %222, %201 : vector<2x32xf32>
    %232 = arith.mulf %216, %224 : vector<2x32xf32>
    %233 = arith.addf %231, %232 : vector<2x32xf32>
    %234 = math.tanh %233 : vector<2x32xf32>
    %235 = arith.mulf %230, %234 : vector<2x32xf32>
    %236 = vector.extract_strided_slice %235 {offsets = [0, 0], sizes = [1, 32], strides = [1, 1]} : vector<2x32xf32> to vector<1x32xf32>
    %c6 = arith.constant 6 : index
    %c0_53 = arith.constant 0 : index
    %237 = vector.load %arg22[%c6, %c0_53] : memref<16x32xf32, #tpu.memory_space<vmem>>, vector<1x32xf32>
    tpu.vector_store %arg22[%c6, %c0_53], %236 {strides = array<i32>} : memref<16x32xf32, #tpu.memory_space<vmem>>, vector<1x32xf32>,
    %238 = vector.extract_strided_slice %235 {offsets = [1, 0], sizes = [1, 32], strides = [1, 1]} : vector<2x32xf32> to vector<1x32xf32>
    %c14 = arith.constant 14 : index
    %c0_54 = arith.constant 0 : index
    %239 = vector.load %arg22[%c14, %c0_54] : memref<16x32xf32, #tpu.memory_space<vmem>>, vector<1x32xf32>
    tpu.vector_store %arg22[%c14, %c0_54], %238 {strides = array<i32>} : memref<16x32xf32, #tpu.memory_space<vmem>>, vector<1x32xf32>,
    %240 = vector.extract_strided_slice %12 {offsets = [14, 0], sizes = [2, 128], strides = [1, 1]} : vector<16x128xf32> to vector<2x128xf32>
    %cst_55 = arith.constant dense<0.000000e+00> : vector<2x128xf32>
    %241 = tpu.matmul %235, %13, %cst_55 {dimension_numbers = #tpu.dot_dimension_numbers<[1], [0], [0], [1], [0, 0, 1, 1], [], []>} : vector<2x32xf32>, vector<32x128xf32>, vector<2x128xf32> -> vector<2x128xf32>
    %242 = arith.addf %240, %241 : vector<2x128xf32>
    %243 = vector.extract_strided_slice %242 {offsets = [0, 0], sizes = [2, 32], strides = [1, 1]} : vector<2x128xf32> to vector<2x32xf32>
    %244 = arith.negf %243 : vector<2x32xf32>
    %245 = math.exp %244 : vector<2x32xf32>
    %cst_56 = arith.constant 1.000000e+00 : f32
    %246 = vector.broadcast %cst_56 : f32 to vector<2x32xf32>
    %247 = arith.addf %246, %245 : vector<2x32xf32>
    %248 = arith.divf %246, %247 : vector<2x32xf32>
    %249 = vector.extract_strided_slice %242 {offsets = [0, 32], sizes = [2, 32], strides = [1, 1]} : vector<2x128xf32> to vector<2x32xf32>
    %250 = arith.negf %249 : vector<2x32xf32>
    %251 = math.exp %250 : vector<2x32xf32>
    %cst_57 = arith.constant 1.000000e+00 : f32
    %252 = vector.broadcast %cst_57 : f32 to vector<2x32xf32>
    %253 = arith.addf %252, %251 : vector<2x32xf32>
    %254 = arith.divf %252, %253 : vector<2x32xf32>
    %255 = vector.extract_strided_slice %242 {offsets = [0, 64], sizes = [2, 32], strides = [1, 1]} : vector<2x128xf32> to vector<2x32xf32>
    %256 = math.tanh %255 : vector<2x32xf32>
    %257 = vector.extract_strided_slice %242 {offsets = [0, 96], sizes = [2, 32], strides = [1, 1]} : vector<2x128xf32> to vector<2x32xf32>
    %258 = arith.negf %257 : vector<2x32xf32>
    %259 = math.exp %258 : vector<2x32xf32>
    %cst_58 = arith.constant 1.000000e+00 : f32
    %260 = vector.broadcast %cst_58 : f32 to vector<2x32xf32>
    %261 = arith.addf %260, %259 : vector<2x32xf32>
    %262 = arith.divf %260, %261 : vector<2x32xf32>
    %263 = arith.mulf %254, %233 : vector<2x32xf32>
    %264 = arith.mulf %248, %256 : vector<2x32xf32>
    %265 = arith.addf %263, %264 : vector<2x32xf32>
    %266 = math.tanh %265 : vector<2x32xf32>
    %267 = arith.mulf %262, %266 : vector<2x32xf32>
    %268 = vector.extract_strided_slice %267 {offsets = [0, 0], sizes = [1, 32], strides = [1, 1]} : vector<2x32xf32> to vector<1x32xf32>
    %c7 = arith.constant 7 : index
    %c0_59 = arith.constant 0 : index
    %269 = vector.load %arg22[%c7, %c0_59] : memref<16x32xf32, #tpu.memory_space<vmem>>, vector<1x32xf32>
    tpu.vector_store %arg22[%c7, %c0_59], %268 {strides = array<i32>} : memref<16x32xf32, #tpu.memory_space<vmem>>, vector<1x32xf32>,
    %270 = vector.extract_strided_slice %267 {offsets = [1, 0], sizes = [1, 32], strides = [1, 1]} : vector<2x32xf32> to vector<1x32xf32>
    %c15 = arith.constant 15 : index
    %c0_60 = arith.constant 0 : index
    %271 = vector.load %arg22[%c15, %c0_60] : memref<16x32xf32, #tpu.memory_space<vmem>>, vector<1x32xf32>
    tpu.vector_store %arg22[%c15, %c0_60], %270 {strides = array<i32>} : memref<16x32xf32, #tpu.memory_space<vmem>>, vector<1x32xf32>,
    %c0_61 = arith.constant 0 : index
    %c0_62 = arith.constant 0 : index
    %272 = vector.load %arg22[%c0_61, %c0_62] : memref<16x32xf32, #tpu.memory_space<vmem>>, vector<16x32xf32>
    %273 = arith.mulf %272, %272 : vector<16x32xf32>
    %cst_63 = arith.constant dense<0.000000e+00> : vector<16xf32>
    %274 = vector.multi_reduction <add>, %273, %cst_63 [1] : vector<16x32xf32> to vector<16xf32>
    %275 = vector.shape_cast %274 : vector<16xf32> to vector<16x1xf32>
    %cst_64 = arith.constant 3.200000e+01 : f32
    %276 = vector.broadcast %cst_64 : f32 to vector<16x1xf32>
    %277 = arith.divf %275, %276 : vector<16x1xf32>
    %278 = math.sqrt %277 : vector<16x1xf32>
    %cst_65 = arith.constant 9.99999974E-6 : f32
    %279 = vector.broadcast %cst_65 : f32 to vector<16x1xf32>
    %280 = arith.addf %278, %279 : vector<16x1xf32>
    %281 = vector.broadcast %280 : vector<16x1xf32> to vector<16x32xf32>
    %282 = arith.divf %272, %281 : vector<16x32xf32>
    %cst_66 = arith.constant dense<0.000000e+00> : vector<16xf32>
    %283 = vector.multi_reduction <add>, %282, %cst_66 [1] : vector<16x32xf32> to vector<16xf32>
    %284 = vector.shape_cast %283 : vector<16xf32> to vector<16x1xf32>
    %cst_67 = arith.constant 3.200000e+01 : f32
    %285 = vector.broadcast %cst_67 : f32 to vector<16x1xf32>
    %286 = arith.divf %284, %285 : vector<16x1xf32>
    %287 = vector.broadcast %286 : vector<16x1xf32> to vector<16x32xf32>
    %288 = arith.subf %282, %287 : vector<16x32xf32>
    %289 = arith.mulf %288, %288 : vector<16x32xf32>
    %cst_68 = arith.constant dense<0.000000e+00> : vector<16xf32>
    %290 = vector.multi_reduction <add>, %289, %cst_68 [1] : vector<16x32xf32> to vector<16xf32>
    %291 = vector.shape_cast %290 : vector<16xf32> to vector<16x1xf32>
    %cst_69 = arith.constant 3.200000e+01 : f32
    %292 = vector.broadcast %cst_69 : f32 to vector<16x1xf32>
    %293 = arith.divf %291, %292 : vector<16x1xf32>
    %294 = vector.broadcast %286 : vector<16x1xf32> to vector<16x32xf32>
    %295 = arith.subf %282, %294 : vector<16x32xf32>
    %cst_70 = arith.constant 9.99999974E-6 : f32
    %296 = vector.broadcast %cst_70 : f32 to vector<16x1xf32>
    %297 = arith.addf %293, %296 : vector<16x1xf32>
    %298 = math.rsqrt %297 : vector<16x1xf32>
    %299 = vector.broadcast %298 : vector<16x1xf32> to vector<16x32xf32>
    %300 = arith.mulf %295, %299 : vector<16x32xf32>
    %c0_71 = arith.constant 0 : index
    %c0_72 = arith.constant 0 : index
    %301 = vector.load %arg5[%c0_71, %c0_72] : memref<1x32xf32, #tpu.memory_space<vmem>>, vector<1x32xf32>
    %302 = vector.broadcast %301 : vector<1x32xf32> to vector<16x32xf32>
    %303 = arith.mulf %300, %302 : vector<16x32xf32>
    %c0_73 = arith.constant 0 : index
    %c0_74 = arith.constant 0 : index
    %304 = vector.load %arg6[%c0_73, %c0_74] : memref<1x32xf32, #tpu.memory_space<vmem>>, vector<1x32xf32>
    %305 = vector.broadcast %304 : vector<1x32xf32> to vector<16x32xf32>
    %306 = arith.addf %303, %305 : vector<16x32xf32>
    %cst_75 = arith.constant 8.000000e+00 : f32
    %307 = math.sqrt %cst_75 : f32
    %cst_76 = arith.constant 1.000000e+00 : f32
    %308 = arith.divf %cst_76, %307 : f32
    %c0_77 = arith.constant 0 : index
    %c0_78 = arith.constant 0 : index
    %309 = vector.load %arg7[%c0_77, %c0_78] : memref<32x32xf32, #tpu.memory_space<vmem>>, vector<32x32xf32>
    %310 = vector.broadcast %308 : f32 to vector<32x32xf32>
    %311 = arith.mulf %309, %310 : vector<32x32xf32>
    %c0_79 = arith.constant 0 : index
    %c0_80 = arith.constant 0 : index
    %312 = vector.load %arg11[%c0_79, %c0_80] : memref<1x32xf32, #tpu.memory_space<vmem>>, vector<1x32xf32>
    %313 = vector.broadcast %308 : f32 to vector<1x32xf32>
    %314 = arith.mulf %312, %313 : vector<1x32xf32>
    %cst_81 = arith.constant dense<0.000000e+00> : vector<16x32xf32>
    %315 = tpu.matmul %306, %311, %cst_81 {dimension_numbers = #tpu.dot_dimension_numbers<[1], [0], [0], [1], [0, 0, 1, 1], [], []>} : vector<16x32xf32>, vector<32x32xf32>, vector<16x32xf32> -> vector<16x32xf32>
    %316 = vector.broadcast %314 : vector<1x32xf32> to vector<16x32xf32>
    %317 = arith.addf %315, %316 : vector<16x32xf32>
    %c0_82 = arith.constant 0 : index
    %c0_83 = arith.constant 0 : index
    %318 = vector.load %arg8[%c0_82, %c0_83] : memref<32x32xf32, #tpu.memory_space<vmem>>, vector<32x32xf32>
    %cst_84 = arith.constant dense<0.000000e+00> : vector<16x32xf32>
    %319 = tpu.matmul %306, %318, %cst_84 {dimension_numbers = #tpu.dot_dimension_numbers<[1], [0], [0], [1], [0, 0, 1, 1], [], []>} : vector<16x32xf32>, vector<32x32xf32>, vector<16x32xf32> -> vector<16x32xf32>
    %c0_85 = arith.constant 0 : index
    %c0_86 = arith.constant 0 : index
    %320 = vector.load %arg12[%c0_85, %c0_86] : memref<1x32xf32, #tpu.memory_space<vmem>>, vector<1x32xf32>
    %321 = vector.broadcast %320 : vector<1x32xf32> to vector<16x32xf32>
    %322 = arith.addf %319, %321 : vector<16x32xf32>
    %c0_87 = arith.constant 0 : index
    %c0_88 = arith.constant 0 : index
    %323 = vector.load %arg9[%c0_87, %c0_88] : memref<32x32xf32, #tpu.memory_space<vmem>>, vector<32x32xf32>
    %cst_89 = arith.constant dense<0.000000e+00> : vector<16x32xf32>
    %324 = tpu.matmul %306, %323, %cst_89 {dimension_numbers = #tpu.dot_dimension_numbers<[1], [0], [0], [1], [0, 0, 1, 1], [], []>} : vector<16x32xf32>, vector<32x32xf32>, vector<16x32xf32> -> vector<16x32xf32>
    %c0_90 = arith.constant 0 : index
    %c0_91 = arith.constant 0 : index
    %325 = vector.load %arg13[%c0_90, %c0_91] : memref<1x32xf32, #tpu.memory_space<vmem>>, vector<1x32xf32>
    %326 = vector.broadcast %325 : vector<1x32xf32> to vector<16x32xf32>
    %327 = arith.addf %324, %326 : vector<16x32xf32>
    %328 = vector.extract_strided_slice %317 {offsets = [0, 0], sizes = [8, 8], strides = [1, 1]} : vector<16x32xf32> to vector<8x8xf32>
    %329 = vector.extract_strided_slice %322 {offsets = [0, 0], sizes = [8, 8], strides = [1, 1]} : vector<16x32xf32> to vector<8x8xf32>
    %330 = vector.extract_strided_slice %327 {offsets = [0, 0], sizes = [8, 8], strides = [1, 1]} : vector<16x32xf32> to vector<8x8xf32>
    %331 = tpu.transpose %329, [1, 0] : vector<8x8xf32> -> vector<8x8xf32>
    %cst_92 = arith.constant dense<0.000000e+00> : vector<8x8xf32>
    %332 = tpu.matmul %328, %331, %cst_92 {dimension_numbers = #tpu.dot_dimension_numbers<[1], [0], [0], [1], [0, 0, 1, 1], [], []>} : vector<8x8xf32>, vector<8x8xf32>, vector<8x8xf32> -> vector<8x8xf32>
    %cst_93 = arith.constant dense<0xFF800000> : vector<8xf32>
    %333 = vector.multi_reduction <maximumf>, %332, %cst_93 [1] : vector<8x8xf32> to vector<8xf32>
    %334 = vector.shape_cast %333 : vector<8xf32> to vector<8x1xf32>
    %335 = vector.broadcast %334 : vector<8x1xf32> to vector<8x8xf32>
    %336 = arith.subf %332, %335 : vector<8x8xf32>
    %337 = math.exp %336 : vector<8x8xf32>
    %cst_94 = arith.constant dense<0.000000e+00> : vector<8xf32>
    %338 = vector.multi_reduction <add>, %337, %cst_94 [1] : vector<8x8xf32> to vector<8xf32>
    %339 = vector.shape_cast %338 : vector<8xf32> to vector<8x1xf32>
    %340 = tpu.reciprocal %339 {approx = true} : vector<8x1xf32> -> vector<8x1xf32>
    %341 = vector.broadcast %340 : vector<8x1xf32> to vector<8x8xf32>
    %342 = arith.mulf %337, %341 : vector<8x8xf32>
    %cst_95 = arith.constant dense<0.000000e+00> : vector<8x8xf32>
    %343 = tpu.matmul %342, %330, %cst_95 {dimension_numbers = #tpu.dot_dimension_numbers<[1], [0], [0], [1], [0, 0, 1, 1], [], []>} : vector<8x8xf32>, vector<8x8xf32>, vector<8x8xf32> -> vector<8x8xf32>
    %c0_96 = arith.constant 0 : index
    %c0_97 = arith.constant 0 : index
    %344 = vector.load %arg23[%c0_96, %c0_97] : memref<16x32xf32, #tpu.memory_space<vmem>>, vector<8x8xf32>
    tpu.vector_store %arg23[%c0_96, %c0_97], %343 {strides = array<i32>} : memref<16x32xf32, #tpu.memory_space<vmem>>, vector<8x8xf32>,
    %345 = vector.extract_strided_slice %317 {offsets = [0, 8], sizes = [8, 8], strides = [1, 1]} : vector<16x32xf32> to vector<8x8xf32>
    %346 = vector.extract_strided_slice %322 {offsets = [0, 8], sizes = [8, 8], strides = [1, 1]} : vector<16x32xf32> to vector<8x8xf32>
    %347 = vector.extract_strided_slice %327 {offsets = [0, 8], sizes = [8, 8], strides = [1, 1]} : vector<16x32xf32> to vector<8x8xf32>
    %348 = tpu.transpose %346, [1, 0] : vector<8x8xf32> -> vector<8x8xf32>
    %cst_98 = arith.constant dense<0.000000e+00> : vector<8x8xf32>
    %349 = tpu.matmul %345, %348, %cst_98 {dimension_numbers = #tpu.dot_dimension_numbers<[1], [0], [0], [1], [0, 0, 1, 1], [], []>} : vector<8x8xf32>, vector<8x8xf32>, vector<8x8xf32> -> vector<8x8xf32>
    %cst_99 = arith.constant dense<0xFF800000> : vector<8xf32>
    %350 = vector.multi_reduction <maximumf>, %349, %cst_99 [1] : vector<8x8xf32> to vector<8xf32>
    %351 = vector.shape_cast %350 : vector<8xf32> to vector<8x1xf32>
    %352 = vector.broadcast %351 : vector<8x1xf32> to vector<8x8xf32>
    %353 = arith.subf %349, %352 : vector<8x8xf32>
    %354 = math.exp %353 : vector<8x8xf32>
    %cst_100 = arith.constant dense<0.000000e+00> : vector<8xf32>
    %355 = vector.multi_reduction <add>, %354, %cst_100 [1] : vector<8x8xf32> to vector<8xf32>
    %356 = vector.shape_cast %355 : vector<8xf32> to vector<8x1xf32>
    %357 = tpu.reciprocal %356 {approx = true} : vector<8x1xf32> -> vector<8x1xf32>
    %358 = vector.broadcast %357 : vector<8x1xf32> to vector<8x8xf32>
    %359 = arith.mulf %354, %358 : vector<8x8xf32>
    %cst_101 = arith.constant dense<0.000000e+00> : vector<8x8xf32>
    %360 = tpu.matmul %359, %347, %cst_101 {dimension_numbers = #tpu.dot_dimension_numbers<[1], [0], [0], [1], [0, 0, 1, 1], [], []>} : vector<8x8xf32>, vector<8x8xf32>, vector<8x8xf32> -> vector<8x8xf32>
    %c0_102 = arith.constant 0 : index
    %c8_103 = arith.constant 8 : index
    %361 = vector.load %arg23[%c0_102, %c8_103] : memref<16x32xf32, #tpu.memory_space<vmem>>, vector<8x8xf32>
    tpu.vector_store %arg23[%c0_102, %c8_103], %360 {strides = array<i32>} : memref<16x32xf32, #tpu.memory_space<vmem>>, vector<8x8xf32>,
    %362 = vector.extract_strided_slice %317 {offsets = [0, 16], sizes = [8, 8], strides = [1, 1]} : vector<16x32xf32> to vector<8x8xf32>
    %363 = vector.extract_strided_slice %322 {offsets = [0, 16], sizes = [8, 8], strides = [1, 1]} : vector<16x32xf32> to vector<8x8xf32>
    %364 = vector.extract_strided_slice %327 {offsets = [0, 16], sizes = [8, 8], strides = [1, 1]} : vector<16x32xf32> to vector<8x8xf32>
    %365 = tpu.transpose %363, [1, 0] : vector<8x8xf32> -> vector<8x8xf32>
    %cst_104 = arith.constant dense<0.000000e+00> : vector<8x8xf32>
    %366 = tpu.matmul %362, %365, %cst_104 {dimension_numbers = #tpu.dot_dimension_numbers<[1], [0], [0], [1], [0, 0, 1, 1], [], []>} : vector<8x8xf32>, vector<8x8xf32>, vector<8x8xf32> -> vector<8x8xf32>
    %cst_105 = arith.constant dense<0xFF800000> : vector<8xf32>
    %367 = vector.multi_reduction <maximumf>, %366, %cst_105 [1] : vector<8x8xf32> to vector<8xf32>
    %368 = vector.shape_cast %367 : vector<8xf32> to vector<8x1xf32>
    %369 = vector.broadcast %368 : vector<8x1xf32> to vector<8x8xf32>
    %370 = arith.subf %366, %369 : vector<8x8xf32>
    %371 = math.exp %370 : vector<8x8xf32>
    %cst_106 = arith.constant dense<0.000000e+00> : vector<8xf32>
    %372 = vector.multi_reduction <add>, %371, %cst_106 [1] : vector<8x8xf32> to vector<8xf32>
    %373 = vector.shape_cast %372 : vector<8xf32> to vector<8x1xf32>
    %374 = tpu.reciprocal %373 {approx = true} : vector<8x1xf32> -> vector<8x1xf32>
    %375 = vector.broadcast %374 : vector<8x1xf32> to vector<8x8xf32>
    %376 = arith.mulf %371, %375 : vector<8x8xf32>
    %cst_107 = arith.constant dense<0.000000e+00> : vector<8x8xf32>
    %377 = tpu.matmul %376, %364, %cst_107 {dimension_numbers = #tpu.dot_dimension_numbers<[1], [0], [0], [1], [0, 0, 1, 1], [], []>} : vector<8x8xf32>, vector<8x8xf32>, vector<8x8xf32> -> vector<8x8xf32>
    %c0_108 = arith.constant 0 : index
    %c16 = arith.constant 16 : index
    %378 = vector.load %arg23[%c0_108, %c16] : memref<16x32xf32, #tpu.memory_space<vmem>>, vector<8x8xf32>
    tpu.vector_store %arg23[%c0_108, %c16], %377 {strides = array<i32>} : memref<16x32xf32, #tpu.memory_space<vmem>>, vector<8x8xf32>,
    %379 = vector.extract_strided_slice %317 {offsets = [0, 24], sizes = [8, 8], strides = [1, 1]} : vector<16x32xf32> to vector<8x8xf32>
    %380 = vector.extract_strided_slice %322 {offsets = [0, 24], sizes = [8, 8], strides = [1, 1]} : vector<16x32xf32> to vector<8x8xf32>
    %381 = vector.extract_strided_slice %327 {offsets = [0, 24], sizes = [8, 8], strides = [1, 1]} : vector<16x32xf32> to vector<8x8xf32>
    %382 = tpu.transpose %380, [1, 0] : vector<8x8xf32> -> vector<8x8xf32>
    %cst_109 = arith.constant dense<0.000000e+00> : vector<8x8xf32>
    %383 = tpu.matmul %379, %382, %cst_109 {dimension_numbers = #tpu.dot_dimension_numbers<[1], [0], [0], [1], [0, 0, 1, 1], [], []>} : vector<8x8xf32>, vector<8x8xf32>, vector<8x8xf32> -> vector<8x8xf32>
    %cst_110 = arith.constant dense<0xFF800000> : vector<8xf32>
    %384 = vector.multi_reduction <maximumf>, %383, %cst_110 [1] : vector<8x8xf32> to vector<8xf32>
    %385 = vector.shape_cast %384 : vector<8xf32> to vector<8x1xf32>
    %386 = vector.broadcast %385 : vector<8x1xf32> to vector<8x8xf32>
    %387 = arith.subf %383, %386 : vector<8x8xf32>
    %388 = math.exp %387 : vector<8x8xf32>
    %cst_111 = arith.constant dense<0.000000e+00> : vector<8xf32>
    %389 = vector.multi_reduction <add>, %388, %cst_111 [1] : vector<8x8xf32> to vector<8xf32>
    %390 = vector.shape_cast %389 : vector<8xf32> to vector<8x1xf32>
    %391 = tpu.reciprocal %390 {approx = true} : vector<8x1xf32> -> vector<8x1xf32>
    %392 = vector.broadcast %391 : vector<8x1xf32> to vector<8x8xf32>
    %393 = arith.mulf %388, %392 : vector<8x8xf32>
    %cst_112 = arith.constant dense<0.000000e+00> : vector<8x8xf32>
    %394 = tpu.matmul %393, %381, %cst_112 {dimension_numbers = #tpu.dot_dimension_numbers<[1], [0], [0], [1], [0, 0, 1, 1], [], []>} : vector<8x8xf32>, vector<8x8xf32>, vector<8x8xf32> -> vector<8x8xf32>
    %c0_113 = arith.constant 0 : index
    %c24 = arith.constant 24 : index
    %395 = vector.load %arg23[%c0_113, %c24] : memref<16x32xf32, #tpu.memory_space<vmem>>, vector<8x8xf32>
    tpu.vector_store %arg23[%c0_113, %c24], %394 {strides = array<i32>} : memref<16x32xf32, #tpu.memory_space<vmem>>, vector<8x8xf32>,
    %396 = vector.extract_strided_slice %317 {offsets = [8, 0], sizes = [8, 8], strides = [1, 1]} : vector<16x32xf32> to vector<8x8xf32>
    %397 = vector.extract_strided_slice %322 {offsets = [8, 0], sizes = [8, 8], strides = [1, 1]} : vector<16x32xf32> to vector<8x8xf32>
    %398 = vector.extract_strided_slice %327 {offsets = [8, 0], sizes = [8, 8], strides = [1, 1]} : vector<16x32xf32> to vector<8x8xf32>
    %399 = tpu.transpose %397, [1, 0] : vector<8x8xf32> -> vector<8x8xf32>
    %cst_114 = arith.constant dense<0.000000e+00> : vector<8x8xf32>
    %400 = tpu.matmul %396, %399, %cst_114 {dimension_numbers = #tpu.dot_dimension_numbers<[1], [0], [0], [1], [0, 0, 1, 1], [], []>} : vector<8x8xf32>, vector<8x8xf32>, vector<8x8xf32> -> vector<8x8xf32>
    %cst_115 = arith.constant dense<0xFF800000> : vector<8xf32>
    %401 = vector.multi_reduction <maximumf>, %400, %cst_115 [1] : vector<8x8xf32> to vector<8xf32>
    %402 = vector.shape_cast %401 : vector<8xf32> to vector<8x1xf32>
    %403 = vector.broadcast %402 : vector<8x1xf32> to vector<8x8xf32>
    %404 = arith.subf %400, %403 : vector<8x8xf32>
    %405 = math.exp %404 : vector<8x8xf32>
    %cst_116 = arith.constant dense<0.000000e+00> : vector<8xf32>
    %406 = vector.multi_reduction <add>, %405, %cst_116 [1] : vector<8x8xf32> to vector<8xf32>
    %407 = vector.shape_cast %406 : vector<8xf32> to vector<8x1xf32>
    %408 = tpu.reciprocal %407 {approx = true} : vector<8x1xf32> -> vector<8x1xf32>
    %409 = vector.broadcast %408 : vector<8x1xf32> to vector<8x8xf32>
    %410 = arith.mulf %405, %409 : vector<8x8xf32>
    %cst_117 = arith.constant dense<0.000000e+00> : vector<8x8xf32>
    %411 = tpu.matmul %410, %398, %cst_117 {dimension_numbers = #tpu.dot_dimension_numbers<[1], [0], [0], [1], [0, 0, 1, 1], [], []>} : vector<8x8xf32>, vector<8x8xf32>, vector<8x8xf32> -> vector<8x8xf32>
    %c8_118 = arith.constant 8 : index
    %c0_119 = arith.constant 0 : index
    %412 = vector.load %arg23[%c8_118, %c0_119] : memref<16x32xf32, #tpu.memory_space<vmem>>, vector<8x8xf32>
    tpu.vector_store %arg23[%c8_118, %c0_119], %411 {strides = array<i32>} : memref<16x32xf32, #tpu.memory_space<vmem>>, vector<8x8xf32>,
    %413 = vector.extract_strided_slice %317 {offsets = [8, 8], sizes = [8, 8], strides = [1, 1]} : vector<16x32xf32> to vector<8x8xf32>
    %414 = vector.extract_strided_slice %322 {offsets = [8, 8], sizes = [8, 8], strides = [1, 1]} : vector<16x32xf32> to vector<8x8xf32>
    %415 = vector.extract_strided_slice %327 {offsets = [8, 8], sizes = [8, 8], strides = [1, 1]} : vector<16x32xf32> to vector<8x8xf32>
    %416 = tpu.transpose %414, [1, 0] : vector<8x8xf32> -> vector<8x8xf32>
    %cst_120 = arith.constant dense<0.000000e+00> : vector<8x8xf32>
    %417 = tpu.matmul %413, %416, %cst_120 {dimension_numbers = #tpu.dot_dimension_numbers<[1], [0], [0], [1], [0, 0, 1, 1], [], []>} : vector<8x8xf32>, vector<8x8xf32>, vector<8x8xf32> -> vector<8x8xf32>
    %cst_121 = arith.constant dense<0xFF800000> : vector<8xf32>
    %418 = vector.multi_reduction <maximumf>, %417, %cst_121 [1] : vector<8x8xf32> to vector<8xf32>
    %419 = vector.shape_cast %418 : vector<8xf32> to vector<8x1xf32>
    %420 = vector.broadcast %419 : vector<8x1xf32> to vector<8x8xf32>
    %421 = arith.subf %417, %420 : vector<8x8xf32>
    %422 = math.exp %421 : vector<8x8xf32>
    %cst_122 = arith.constant dense<0.000000e+00> : vector<8xf32>
    %423 = vector.multi_reduction <add>, %422, %cst_122 [1] : vector<8x8xf32> to vector<8xf32>
    %424 = vector.shape_cast %423 : vector<8xf32> to vector<8x1xf32>
    %425 = tpu.reciprocal %424 {approx = true} : vector<8x1xf32> -> vector<8x1xf32>
    %426 = vector.broadcast %425 : vector<8x1xf32> to vector<8x8xf32>
    %427 = arith.mulf %422, %426 : vector<8x8xf32>
    %cst_123 = arith.constant dense<0.000000e+00> : vector<8x8xf32>
    %428 = tpu.matmul %427, %415, %cst_123 {dimension_numbers = #tpu.dot_dimension_numbers<[1], [0], [0], [1], [0, 0, 1, 1], [], []>} : vector<8x8xf32>, vector<8x8xf32>, vector<8x8xf32> -> vector<8x8xf32>
    %c8_124 = arith.constant 8 : index
    %c8_125 = arith.constant 8 : index
    %429 = vector.load %arg23[%c8_124, %c8_125] : memref<16x32xf32, #tpu.memory_space<vmem>>, vector<8x8xf32>
    tpu.vector_store %arg23[%c8_124, %c8_125], %428 {strides = array<i32>} : memref<16x32xf32, #tpu.memory_space<vmem>>, vector<8x8xf32>,
    %430 = vector.extract_strided_slice %317 {offsets = [8, 16], sizes = [8, 8], strides = [1, 1]} : vector<16x32xf32> to vector<8x8xf32>
    %431 = vector.extract_strided_slice %322 {offsets = [8, 16], sizes = [8, 8], strides = [1, 1]} : vector<16x32xf32> to vector<8x8xf32>
    %432 = vector.extract_strided_slice %327 {offsets = [8, 16], sizes = [8, 8], strides = [1, 1]} : vector<16x32xf32> to vector<8x8xf32>
    %433 = tpu.transpose %431, [1, 0] : vector<8x8xf32> -> vector<8x8xf32>
    %cst_126 = arith.constant dense<0.000000e+00> : vector<8x8xf32>
    %434 = tpu.matmul %430, %433, %cst_126 {dimension_numbers = #tpu.dot_dimension_numbers<[1], [0], [0], [1], [0, 0, 1, 1], [], []>} : vector<8x8xf32>, vector<8x8xf32>, vector<8x8xf32> -> vector<8x8xf32>
    %cst_127 = arith.constant dense<0xFF800000> : vector<8xf32>
    %435 = vector.multi_reduction <maximumf>, %434, %cst_127 [1] : vector<8x8xf32> to vector<8xf32>
    %436 = vector.shape_cast %435 : vector<8xf32> to vector<8x1xf32>
    %437 = vector.broadcast %436 : vector<8x1xf32> to vector<8x8xf32>
    %438 = arith.subf %434, %437 : vector<8x8xf32>
    %439 = math.exp %438 : vector<8x8xf32>
    %cst_128 = arith.constant dense<0.000000e+00> : vector<8xf32>
    %440 = vector.multi_reduction <add>, %439, %cst_128 [1] : vector<8x8xf32> to vector<8xf32>
    %441 = vector.shape_cast %440 : vector<8xf32> to vector<8x1xf32>
    %442 = tpu.reciprocal %441 {approx = true} : vector<8x1xf32> -> vector<8x1xf32>
    %443 = vector.broadcast %442 : vector<8x1xf32> to vector<8x8xf32>
    %444 = arith.mulf %439, %443 : vector<8x8xf32>
    %cst_129 = arith.constant dense<0.000000e+00> : vector<8x8xf32>
    %445 = tpu.matmul %444, %432, %cst_129 {dimension_numbers = #tpu.dot_dimension_numbers<[1], [0], [0], [1], [0, 0, 1, 1], [], []>} : vector<8x8xf32>, vector<8x8xf32>, vector<8x8xf32> -> vector<8x8xf32>
    %c8_130 = arith.constant 8 : index
    %c16_131 = arith.constant 16 : index
    %446 = vector.load %arg23[%c8_130, %c16_131] : memref<16x32xf32, #tpu.memory_space<vmem>>, vector<8x8xf32>
    tpu.vector_store %arg23[%c8_130, %c16_131], %445 {strides = array<i32>} : memref<16x32xf32, #tpu.memory_space<vmem>>, vector<8x8xf32>,
    %447 = vector.extract_strided_slice %317 {offsets = [8, 24], sizes = [8, 8], strides = [1, 1]} : vector<16x32xf32> to vector<8x8xf32>
    %448 = vector.extract_strided_slice %322 {offsets = [8, 24], sizes = [8, 8], strides = [1, 1]} : vector<16x32xf32> to vector<8x8xf32>
    %449 = vector.extract_strided_slice %327 {offsets = [8, 24], sizes = [8, 8], strides = [1, 1]} : vector<16x32xf32> to vector<8x8xf32>
    %450 = tpu.transpose %448, [1, 0] : vector<8x8xf32> -> vector<8x8xf32>
    %cst_132 = arith.constant dense<0.000000e+00> : vector<8x8xf32>
    %451 = tpu.matmul %447, %450, %cst_132 {dimension_numbers = #tpu.dot_dimension_numbers<[1], [0], [0], [1], [0, 0, 1, 1], [], []>} : vector<8x8xf32>, vector<8x8xf32>, vector<8x8xf32> -> vector<8x8xf32>
    %cst_133 = arith.constant dense<0xFF800000> : vector<8xf32>
    %452 = vector.multi_reduction <maximumf>, %451, %cst_133 [1] : vector<8x8xf32> to vector<8xf32>
    %453 = vector.shape_cast %452 : vector<8xf32> to vector<8x1xf32>
    %454 = vector.broadcast %453 : vector<8x1xf32> to vector<8x8xf32>
    %455 = arith.subf %451, %454 : vector<8x8xf32>
    %456 = math.exp %455 : vector<8x8xf32>
    %cst_134 = arith.constant dense<0.000000e+00> : vector<8xf32>
    %457 = vector.multi_reduction <add>, %456, %cst_134 [1] : vector<8x8xf32> to vector<8xf32>
    %458 = vector.shape_cast %457 : vector<8xf32> to vector<8x1xf32>
    %459 = tpu.reciprocal %458 {approx = true} : vector<8x1xf32> -> vector<8x1xf32>
    %460 = vector.broadcast %459 : vector<8x1xf32> to vector<8x8xf32>
    %461 = arith.mulf %456, %460 : vector<8x8xf32>
    %cst_135 = arith.constant dense<0.000000e+00> : vector<8x8xf32>
    %462 = tpu.matmul %461, %449, %cst_135 {dimension_numbers = #tpu.dot_dimension_numbers<[1], [0], [0], [1], [0, 0, 1, 1], [], []>} : vector<8x8xf32>, vector<8x8xf32>, vector<8x8xf32> -> vector<8x8xf32>
    %c8_136 = arith.constant 8 : index
    %c24_137 = arith.constant 24 : index
    %463 = vector.load %arg23[%c8_136, %c24_137] : memref<16x32xf32, #tpu.memory_space<vmem>>, vector<8x8xf32>
    tpu.vector_store %arg23[%c8_136, %c24_137], %462 {strides = array<i32>} : memref<16x32xf32, #tpu.memory_space<vmem>>, vector<8x8xf32>,
    %c0_138 = arith.constant 0 : index
    %c0_139 = arith.constant 0 : index
    %464 = vector.load %arg23[%c0_138, %c0_139] : memref<16x32xf32, #tpu.memory_space<vmem>>, vector<16x32xf32>
    %c0_140 = arith.constant 0 : index
    %c0_141 = arith.constant 0 : index
    %465 = vector.load %arg10[%c0_140, %c0_141] : memref<32x32xf32, #tpu.memory_space<vmem>>, vector<32x32xf32>
    %cst_142 = arith.constant dense<0.000000e+00> : vector<16x32xf32>
    %466 = tpu.matmul %464, %465, %cst_142 {dimension_numbers = #tpu.dot_dimension_numbers<[1], [0], [0], [1], [0, 0, 1, 1], [], []>} : vector<16x32xf32>, vector<32x32xf32>, vector<16x32xf32> -> vector<16x32xf32>
    %c0_143 = arith.constant 0 : index
    %c0_144 = arith.constant 0 : index
    %467 = vector.load %arg14[%c0_143, %c0_144] : memref<1x32xf32, #tpu.memory_space<vmem>>, vector<1x32xf32>
    %468 = vector.broadcast %467 : vector<1x32xf32> to vector<16x32xf32>
    %469 = arith.addf %466, %468 : vector<16x32xf32>
    %c0_145 = arith.constant 0 : index
    %c0_146 = arith.constant 0 : index
    %470 = vector.load %arg15[%c0_145, %c0_146] : memref<64x512xf32, #tpu.memory_space<vmem>>, vector<64x512xf32>
    %471 = vector.extract_strided_slice %470 {offsets = [0, 0], sizes = [32, 512], strides = [1, 1]} : vector<64x512xf32> to vector<32x512xf32>
    %cst_147 = arith.constant dense<0.000000e+00> : vector<16x512xf32>
    %472 = tpu.matmul %469, %471, %cst_147 {dimension_numbers = #tpu.dot_dimension_numbers<[1], [0], [0], [1], [0, 0, 1, 1], [], []>} : vector<16x32xf32>, vector<32x512xf32>, vector<16x512xf32> -> vector<16x512xf32>
    %473 = vector.extract_strided_slice %470 {offsets = [32, 0], sizes = [32, 512], strides = [1, 1]} : vector<64x512xf32> to vector<32x512xf32>
    %cst_148 = arith.constant dense<0.000000e+00> : vector<16x512xf32>
    %474 = tpu.matmul %306, %473, %cst_148 {dimension_numbers = #tpu.dot_dimension_numbers<[1], [0], [0], [1], [0, 0, 1, 1], [], []>} : vector<16x32xf32>, vector<32x512xf32>, vector<16x512xf32> -> vector<16x512xf32>
    %475 = arith.addf %472, %474 : vector<16x512xf32>
    %c0_149 = arith.constant 0 : index
    %c0_150 = arith.constant 0 : index
    %476 = vector.load %arg16[%c0_149, %c0_150] : memref<1x512xf32, #tpu.memory_space<vmem>>, vector<1x512xf32>
    %477 = vector.broadcast %476 : vector<1x512xf32> to vector<16x512xf32>
    %478 = arith.addf %475, %477 : vector<16x512xf32>
    %cst_151 = arith.constant 0.000000e+00 : f32
    %479 = vector.broadcast %cst_151 : f32 to vector<16x512xf32>
    %480 = arith.maximumf %478, %479 : vector<16x512xf32>
    %cst_152 = arith.constant dense<0.000000e+00> : vector<16xf32>
    %481 = vector.multi_reduction <add>, %480, %cst_152 [1] : vector<16x512xf32> to vector<16xf32>
    %482 = vector.shape_cast %481 : vector<16xf32> to vector<16x1xf32>
    %cst_153 = arith.constant 5.120000e+02 : f32
    %483 = vector.broadcast %cst_153 : f32 to vector<16x1xf32>
    %484 = arith.divf %482, %483 : vector<16x1xf32>
    %485 = vector.broadcast %484 : vector<16x1xf32> to vector<16x512xf32>
    %486 = arith.subf %480, %485 : vector<16x512xf32>
    %487 = arith.mulf %486, %486 : vector<16x512xf32>
    %cst_154 = arith.constant dense<0.000000e+00> : vector<16xf32>
    %488 = vector.multi_reduction <add>, %487, %cst_154 [1] : vector<16x512xf32> to vector<16xf32>
    %489 = vector.shape_cast %488 : vector<16xf32> to vector<16x1xf32>
    %cst_155 = arith.constant 5.120000e+02 : f32
    %490 = vector.broadcast %cst_155 : f32 to vector<16x1xf32>
    %491 = arith.divf %489, %490 : vector<16x1xf32>
    %492 = vector.broadcast %484 : vector<16x1xf32> to vector<16x512xf32>
    %493 = arith.subf %480, %492 : vector<16x512xf32>
    %cst_156 = arith.constant 9.99999974E-6 : f32
    %494 = vector.broadcast %cst_156 : f32 to vector<16x1xf32>
    %495 = arith.addf %491, %494 : vector<16x1xf32>
    %496 = math.rsqrt %495 : vector<16x1xf32>
    %497 = vector.broadcast %496 : vector<16x1xf32> to vector<16x512xf32>
    %498 = arith.mulf %493, %497 : vector<16x512xf32>
    %c0_157 = arith.constant 0 : index
    %c0_158 = arith.constant 0 : index
    %499 = vector.load %arg17[%c0_157, %c0_158] : memref<1x512xf32, #tpu.memory_space<vmem>>, vector<1x512xf32>
    %500 = vector.broadcast %499 : vector<1x512xf32> to vector<16x512xf32>
    %501 = arith.mulf %498, %500 : vector<16x512xf32>
    %c0_159 = arith.constant 0 : index
    %c0_160 = arith.constant 0 : index
    %502 = vector.load %arg18[%c0_159, %c0_160] : memref<1x512xf32, #tpu.memory_space<vmem>>, vector<1x512xf32>
    %503 = vector.broadcast %502 : vector<1x512xf32> to vector<16x512xf32>
    %504 = arith.addf %501, %503 : vector<16x512xf32>
    %c0_161 = arith.constant 0 : index
    %c0_162 = arith.constant 0 : index
    %505 = vector.load %arg19[%c0_161, %c0_162] : memref<512x128xf32, #tpu.memory_space<vmem>>, vector<512x128xf32>
    %cst_163 = arith.constant dense<0.000000e+00> : vector<16x128xf32>
    %506 = tpu.matmul %504, %505, %cst_163 {dimension_numbers = #tpu.dot_dimension_numbers<[1], [0], [0], [1], [0, 0, 1, 1], [], []>} : vector<16x512xf32>, vector<512x128xf32>, vector<16x128xf32> -> vector<16x128xf32>
    %c0_164 = arith.constant 0 : index
    %c0_165 = arith.constant 0 : index
    %507 = vector.load %arg20[%c0_164, %c0_165] : memref<1x128xf32, #tpu.memory_space<vmem>>, vector<1x128xf32>
    %508 = vector.broadcast %507 : vector<1x128xf32> to vector<16x128xf32>
    %509 = arith.addf %506, %508 : vector<16x128xf32>
    %c0_166 = arith.constant 0 : index
    %c0_167 = arith.constant 0 : index
    %510 = vector.load %arg21[%c0_166, %c0_167] : memref<16x128xf32, #tpu.memory_space<vmem>>, vector<16x128xf32>
    tpu.vector_store %arg21[%c0_166, %c0_167], %509 {strides = array<i32>} : memref<16x128xf32, #tpu.memory_space<vmem>>, vector<16x128xf32>,
    return
  }
}

</mosaic_0001>

<bundles_post_ra>
// kernel: dil_modeli_forward.1
= control target key start
LH: loop header
LB: loop body
LE: loop exit
PB: predicated region body
PF: predicated region fallthrough
CT: control target
= control target key end

     0   :  { %s3470_s0 = inlined_call_operand.vmem [shape: s32[16,1], index: 0, kind: input, shape index: {}]   ;;  %s3471_s1 = inlined_call_operand.vmem [shape: f32[128,32], index: 1, kind: input, shape index: {}]   ;;  %s3472_s2 = inlined_call_operand.vmem [shape: f32[32,128], index: 2, kind: input, shape index: {}]   ;;  %s3473_s3 = inlined_call_operand.vmem [shape: f32[32,128], index: 3, kind: input, shape index: {}]   ;;  %s3474_s4 = inlined_call_operand.hbm [shape: f32[1,128], index: 4, kind: input, shape index: {}]   ;;  %s3475_s5 = inlined_call_operand.hbm [shape: f32[1,32], index: 5, kind: input, shape index: {}]   ;;  %s3476_s6 = inlined_call_operand.hbm [shape: f32[1,32], index: 6, kind: input, shape index: {}]   ;;  %s3477_s7 = inlined_call_operand.vmem [shape: f32[32,32], index: 7, kind: input, shape index: {}]   ;;  %s3478_s8 = inlined_call_operand.vmem [shape: f32[32,32], index: 8, kind: input, shape index: {}]   ;;  %s3479_s9 = inlined_call_operand.vmem [shape: f32[32,32], index: 9, kind: input, shape index: {}]   ;;  %s3480_s10 = inlined_call_operand.hbm [shape: f32[32,32], index: 10, kind: input, shape index: {}]   ;;  %s3481_s11 = inlined_call_operand.hbm [shape: f32[1,32], index: 11, kind: input, shape index: {}]   ;;  %s3482_s12 = inlined_call_operand.hbm [shape: f32[1,32], index: 12, kind: input, shape index: {}]   ;;  %s3483_s13 = inlined_call_operand.hbm [shape: f32[1,32], index: 13, kind: input, shape index: {}]   ;;  %s3484_s14 = inlined_call_operand.hbm [shape: f32[1,32], index: 14, kind: input, shape index: {}]   ;;  %s3485_s15 = inlined_call_operand.hbm [shape: f32[64,512], index: 15, kind: input, shape index: {}]   ;;  %s3486_s16 = inlined_call_operand.vmem [shape: f32[1,512], index: 16, kind: input, shape index: {}]   ;;  %s3487_s17 = inlined_call_operand.vmem [shape: f32[1,512], index: 17, kind: input, shape index: {}]   ;;  %s3488_s18 = inlined_call_operand.hbm [shape: f32[1,512], index: 18, kind: input, shape index: {}]   ;;  %s3489_s19 = inlined_call_operand.hbm [shape: f32[512,128], index: 19, kind: input, shape index: {}]   ;;  %s3490_s20 = inlined_call_operand.hbm [shape: f32[1,128], index: 20, kind: input, shape index: {}]   ;;  %s3491_s21 = inlined_call_operand.hbm [shape: f32[16,128], index: 21, kind: output, shape index: {}]  }
   0x1   :  { %3498 = sst [smem:[#allocation33_spill]] %s3470_s0 }
   0x2   :  { %3499 = sst [smem:[#allocation34_spill]] %s3471_s1 }
   0x3   :  { %3500 = sst [smem:[#allocation35_spill]] %s3472_s2 }
   0x4   :  { %3501 = sst [smem:[#allocation36_spill]] %s3473_s3 }
   0x5   :  { %3502 = sst [smem:[#allocation37_spill]] %s3474_s4 }
   0x6   :  { %3503 = sst [smem:[#allocation38_spill]] %s3475_s5 }
   0x7   :  { %26 = vsyncpa [#allocation5], 0 }
   0x8   :  { %27 = vsyncpa [#allocation8], 0 }
   0x9   :  { %28 = vsyncpa [#allocation11], 0 }
   0xa   :  { %29 = vsyncpa [#allocation14], 0 }
   0xb   :  { %30 = vsyncpa [#allocation17], 0 }
   0xc   :  { %31 = vsyncpa [#allocation20], 0 }
   0xd   :  { %32 = vsyncpa [#allocation23], 0  ;;  %s3504_s26 = sld [smem:[#allocation38_spill]] }
  0x13   :  { %s58_s27 = sshll.u32 %s3504_s26, 4  ;;  %s59_s27 = int_to_ptr.hbm [resolvable:$true] %s58_s27 }
  0x14   :  { %33 = vsyncpa [#allocation6], 0  ;;  %s2849_s3 = smov [#allocation7]   ;;  %s85_s4 = sshll.u32 %s3480_s10, 4  ;;  %s86_s4 = int_to_ptr.hbm [resolvable:$true] %s85_s4 }
  0x15   :  { %s60_s28 = sshll.u32 %s2849_s3, 4  ;;  %s2850_s30 = smov [#allocation10]   ;;  %s61_s28 = int_to_ptr.vmem [resolvable:$true] %s60_s28 }
  0x16   :  { %63 = dma.hbm_to_vmem [thread:$0]  %s59_s27, 16, %s61_s28, [#allocation8]  }
  0x17   :  { %s87_s5 = sshll.u32 %s2850_s30, 4  ;;  %s3496_s22 = smov 128   ;;  %s88_s5 = int_to_ptr.vmem [resolvable:$true] %s87_s5 }
  0x18   :  { %s2852_s23 = smov 8   ;;  %s110_s2 = sshll.u32 %s3482_s12, 4  ;;  %s111_s2 = int_to_ptr.hbm [resolvable:$true] %s110_s2 }
  0x19   :  { %93 = dma.hbm_to_vmem [thread:$0]  %s86_s4, 512, %s88_s5, [#allocation11], %s3496_s22, %s3496_s22, %s2852_s23  }
  0x1a   :  { %s2853_s25 = smov [#allocation13]   ;;  %s132_s3 = sshll.u32 %s3484_s14, 4  ;;  %s133_s3 = int_to_ptr.hbm [resolvable:$true] %s132_s3 }
  0x1b   :  { %s112_s26 = sshll.u32 %s2853_s25, 4  ;;  %s2854_s28 = smov [#allocation16]   ;;  %s113_s26 = int_to_ptr.vmem [resolvable:$true] %s112_s26 }
  0x1c   :  { %115 = dma.hbm_to_vmem [thread:$0]  %s111_s2, 16, %s113_s26, [#allocation14]  }
  0x1d   :  { %s134_s29 = sshll.u32 %s2854_s28, 4  ;;  %s160_s4 = sshll.u32 %s3488_s18, 4  ;;  %s135_s29 = int_to_ptr.vmem [resolvable:$true] %s134_s29  ;;  %s161_s4 = int_to_ptr.hbm [resolvable:$true] %s160_s4 }
  0x1e   :  { %137 = dma.hbm_to_vmem [thread:$0]  %s133_s3, 16, %s135_s29, [#allocation17]  }
  0x1f   :  { %s3505_s1 = sld [smem:[#allocation37_spill]]  ;;  %s2855_s25 = smov [#allocation19]  }
  0x20   :  { %s162_s22 = sshll.u32 %s2855_s25, 4  ;;  %s2856_s14 = smov [#allocation4]   ;;  %s163_s22 = int_to_ptr.vmem [resolvable:$true] %s162_s22 }
  0x21   :  { %165 = dma.hbm_to_vmem [thread:$0]  %s161_s4, 64, %s163_s22, [#allocation20]  }
  0x22   :  { %s49_s2 = sshll.u32 %s2856_s14, 4  ;;  %s69_s27 = sshll.u32 %s3476_s6, 4  ;;  %s50_s2 = int_to_ptr.vmem [resolvable:$true] %s49_s2  ;;  %s70_s27 = int_to_ptr.hbm [resolvable:$true] %s69_s27 }
  0x23   :  { %s99_s28 = sshll.u32 %s3481_s11, 4  ;;  %s2857_s29 = smov [#allocation9]   ;;  %s100_s28 = int_to_ptr.hbm [resolvable:$true] %s99_s28 }
  0x24   :  { %s71_s0 = sshll.u32 %s2857_s29, 4  ;;  %s2858_s30 = smov [#allocation12]   ;;  %s72_s0 = int_to_ptr.vmem [resolvable:$true] %s71_s0 }
  0x25   :  { %s47_s24 = sshll.u32 %s3505_s1, 4  ;;  %s101_s22 = sshll.u32 %s2858_s30, 4  ;;  %s48_s24 = int_to_ptr.hbm [resolvable:$true] %s47_s24  ;;  %s102_s22 = int_to_ptr.vmem [resolvable:$true] %s101_s22 }
  0x26   :  { %52 = dma.hbm_to_vmem [thread:$0]  %s48_s24, 16, %s50_s2, [#allocation5]  }
  0x27   :  { %74 = dma.hbm_to_vmem [thread:$0]  %s70_s27, 16, %s72_s0, [#allocation8]  }
  0x28   :  { %s121_s5 = sshll.u32 %s3483_s13, 4  ;;  %s142_s24 = sshll.u32 %s3485_s15, 4  ;;  %s122_s5 = int_to_ptr.hbm [resolvable:$true] %s121_s5  ;;  %s143_s24 = int_to_ptr.hbm [resolvable:$true] %s142_s24 }
  0x29   :  { %104 = dma.hbm_to_vmem [thread:$0]  %s100_s28, 16, %s102_s22, [#allocation11]  }
  0x2a   :  { %s2859_s25 = smov [#allocation15]   ;;  %s2860_s14 = smov [#allocation18]  }
  0x2b   :  { %s123_s11 = sshll.u32 %s2859_s25, 4  ;;  %s144_s2 = sshll.u32 %s2860_s14, 4  ;;  %s124_s11 = int_to_ptr.vmem [resolvable:$true] %s123_s11  ;;  %s145_s2 = int_to_ptr.vmem [resolvable:$true] %s144_s2 }
  0x2c   :  { %126 = dma.hbm_to_vmem [thread:$0]  %s122_s5, 16, %s124_s11, [#allocation14]  }
  0x2d   :  { %s2861_s26 = smov 512   ;;  %s2862_s10 = smov 32  }
  0x2e   :  { %150 = dma.hbm_to_vmem [thread:$0]  %s143_s24, 4096, %s145_s2, [#allocation17], %s2861_s26, %s2861_s26, %s2862_s10  }
  0x2f   :  { %s170_s18 = sshll.u32 %s3489_s19, 4  ;;  %s2863_s3 = smov [#allocation21]   ;;  %s171_s18 = int_to_ptr.hbm [resolvable:$true] %s170_s18 }
  0x30   :  { %s172_s28 = sshll.u32 %s2863_s3, 4  ;;  %s184_s0 = sshll.u32 %s3490_s20, 4  ;;  %s173_s28 = int_to_ptr.vmem [resolvable:$true] %s172_s28  ;;  %s185_s0 = int_to_ptr.hbm [resolvable:$true] %s184_s0 }
  0x31   :  { %s3506_s30 = smov 128   ;;  %s2864_s22 = smov [#allocation22]  }
  0x32   :  { %178 = dma.hbm_to_vmem [thread:$0]  %s171_s18, 8192, %s173_s28, [#allocation20], %s3506_s30, %s3506_s30, %s2852_s23  }
  0x33   :  { %s186_s4 = sshll.u32 %s2864_s22, 4  ;;  %s187_s4 = int_to_ptr.vmem [resolvable:$true] %s186_s4 }
  0x34   :  { %189 = dma.hbm_to_vmem [thread:$0]  %s185_s0, 16, %s187_s4, [#allocation23]  }
  0x35   :  { %2833 = dma.done.wait [#allocation5], 16  }
  0x36   :  { %2834 = vsyncadd [#allocation5], 4294967280 }
  0x37   :  { %2835 = dma.done.wait [#allocation8], 32  }
  0x38   :  { %2836 = vsyncadd [#allocation8], 4294967264 }
  0x39   :  { %2837 = dma.done.wait [#allocation11], 528  }
  0x3a   :  { %2838 = vsyncadd [#allocation11], 4294966768 }
  0x3b   :  { %2839 = dma.done.wait [#allocation14], 32  }
  0x3c   :  { %2840 = vsyncadd [#allocation14], 4294967264 }
  0x3d   :  { %2841 = dma.done.wait [#allocation17], 4112  }
  0x3e   :  { %2842 = vsyncadd [#allocation17], 4294963184 }
  0x3f   :  { %2843 = dma.done.wait [#allocation20], 8256  }
  0x40   :  { %2844 = vsyncadd [#allocation20], 4294959040 }
  0x41   :  { %2845 = dma.done.wait [#allocation23], 16  }
  0x42   :  { %2846 = vsyncadd [#allocation23], 4294967280  ;;  %v2865_v0 = vmov 0   ;;  %s3507_s12 = sld [smem:[#allocation33_spill]]  ;;  %v240_v22 = vlaneseq  ;;  %v2866_v25 = vmov 1.0   ;;  %vm301_vm2 = vcmask 261120  }
  0x43   :  { %2397 = vset.pattern.permute.xlu0 %v2865_v0  ;;  %s3508_s1 = sld [smem:[#allocation34_spill]]  ;;  %v2867_v34 = vmov 0.0   ;;  %v2398_v35 = vld [vmem:[#allocation4] ss:$0 sm:$0xff]  ;;  %s2868_s27 = smov 64   ;;  %vm400_vm7 = vcmask 253952  }
  0x44   :  { %s3509_s0 = sld [smem:[#allocation35_spill]]  ;;  %v241_v23 = vand.u32 127, %v240_v22  ;;  %vm402_vm8 = vcmask 254977   ;;  %s2873_s18 = smov 24  }
  0x45   :  { %s3510_s24 = sld [smem:[#allocation36_spill]]  ;;  %s2874_s3 = smov 16  }
  0x46   :  { %s2277_s19 = sshll.u32 %s3491_s21, 4  ;;  %s2278_s19 = int_to_ptr.hbm [resolvable:$true] %s2277_s19 }
  0x48   :  { %v238_v1 = vld [vmem:[%s3507_s12] sm:$0xff]  ;;  %v239_v6 = vld [vmem:[%s3507_s12 + $0x8] sm:$0xff] }
  0x49   :  { %v269_v2 = vld [vmem:[%s3508_s1 + $0x78] sm:$0xff]  ;;  %243 = vperm.xlu0 %2397, %v238_v1   ;;  %v268_v3 = vld [vmem:[%s3508_s1 + $0x70] sm:$0xff]  ;;  %v267_v4 = vld [vmem:[%s3508_s1 + $0x68] sm:$0xff] }
  0x4a   :  { %270 = vmatpush.msra.mxu0 %v269_v2  ;;  %v266_v5 = vld [vmem:[%s3508_s1 + $0x60] sm:$0xff]  ;;  %v265_v7 = vld [vmem:[%s3508_s1 + $0x58] sm:$0xff]  ;;  %v264_v8 = vld [vmem:[%s3508_s1 + $0x50] sm:$0xff] }
  0x4b   :  { %v263_v9 = vld [vmem:[%s3508_s1 + $0x48] sm:$0xff]  ;;  %v262_v10 = vld [vmem:[%s3508_s1 + $0x40] sm:$0xff]  ;;  %v261_v11 = vld [vmem:[%s3508_s1 + $0x38] sm:$0xff] }
  0x4c   :  { %271 = vmatpush.msra.mxu0 %v268_v3  ;;  %v260_v12 = vld [vmem:[%s3508_s1 + $0x30] sm:$0xff]  ;;  %v259_v13 = vld [vmem:[%s3508_s1 + $0x28] sm:$0xff]  ;;  %v258_v14 = vld [vmem:[%s3508_s1 + $0x20] sm:$0xff] }
  0x4d   :  { %v257_v15 = vld [vmem:[%s3508_s1 + $0x18] sm:$0xff]  ;;  %v256_v16 = vld [vmem:[%s3508_s1 + $0x10] sm:$0xff]  ;;  %v255_v17 = vld [vmem:[%s3508_s1 + $0x8] sm:$0xff] }
  0x4e   :  { %272 = vmatpush.msra.mxu0 %v267_v4  ;;  %v254_v18 = vld [vmem:[%s3508_s1] sm:$0xff]  ;;  %v296_v19 = vld [vmem:[%s3509_s0 + $0x18] sm:$0xff]  ;;  %v295_v20 = vld [vmem:[%s3509_s0 + $0x10] sm:$0xff] }
  0x4f   :  { %320 = vmatpush.msra.mxu1 %v296_v19  ;;  %2365 = vmatpush.msra.mxu2 %v296_v19  ;;  %v294_v21 = vld [vmem:[%s3509_s0 + $0x8] sm:$0xff]  ;;  %v293_v27 = vld [vmem:[%s3509_s0] sm:$0xff]  ;;  %v3099_v28 = vld [vmem:[%s3510_s24 + $0x18] sm:$0xff] }
  0x50   :  { %273 = vmatpush.msra.mxu0 %v266_v5  ;;  %v3104_v29 = vld [vmem:[%s3510_s24 + $0x10] sm:$0xff]  ;;  %418 = vmatpush.msra.mxu3 %v3099_v28  ;;  %v3111_v30 = vld [vmem:[%s3510_s24 + $0x8] sm:$0xff]  ;;  %v3119_v31 = vld [vmem:[%s3510_s24] sm:$0xff] }
  0x51   :  { %246 = vperm.xlu0 %2397, %v239_v6   ;;  %321 = vmatpush.msra.mxu1 %v295_v20 }
  0x52   :  { %274 = vmatpush.msra.mxu0 %v265_v7  ;;  %2366 = vmatpush.msra.mxu2 %v295_v20 }
  0x53   :  { %322 = vmatpush.msra.mxu1 %v294_v21  ;;  %419 = vmatpush.msra.mxu3 %v3104_v29 }
  0x54   :  { %275 = vmatpush.msra.mxu0 %v264_v8  ;;  %2367 = vmatpush.msra.mxu2 %v294_v21 }
  0x55   :  { %323 = vmatpush.msra.mxu1 %v293_v27  ;;  %420 = vmatpush.msra.mxu3 %v3111_v30 }
  0x56   :  { %276 = vmatpush.msra.mxu0 %v263_v9  ;;  %2368 = vmatpush.msra.mxu2 %v293_v27 }
  0x57   :  { %649 = vmatpush.msrb.mxu1 %v3099_v28  ;;  %421 = vmatpush.msra.mxu3 %v3119_v31 }
  0x58   :  { %277 = vmatpush.msra.mxu0 %v262_v10  ;;  %350 = vmatpush.msrb.mxu2 %v3099_v28 }
  0x59   :  { %650 = vmatpush.msrb.mxu1 %v3104_v29  ;;  %572 = vmatpush.msrb.mxu3 %v3099_v28 }
  0x5a   :  { %278 = vmatpush.msra.mxu0 %v261_v11  ;;  %351 = vmatpush.msrb.mxu2 %v3104_v29 }
  0x5b   :  { %651 = vmatpush.msrb.mxu1 %v3111_v30  ;;  %573 = vmatpush.msrb.mxu3 %v3104_v29 }
  0x5c   :  { %279 = vmatpush.msra.mxu0 %v260_v12  ;;  %352 = vmatpush.msrb.mxu2 %v3111_v30 }
  0x5d   :  { %652 = vmatpush.msrb.mxu1 %v3119_v31  ;;  %574 = vmatpush.msrb.mxu3 %v3111_v30 }
  0x5e   :  { %280 = vmatpush.msra.mxu0 %v259_v13  ;;  %353 = vmatpush.msrb.mxu2 %v3119_v31 }
  0x5f   :  { %575 = vmatpush.msrb.mxu3 %v3119_v31 }
  0x60   :  { %281 = vmatpush.msra.mxu0 %v258_v14 }
  0x62   :  { %282 = vmatpush.msra.mxu0 %v257_v15 }
  0x64   :  { %283 = vmatpush.msra.mxu0 %v256_v16 }
  0x66   :  { %284 = vmatpush.msra.mxu0 %v255_v17 }
  0x68   :  { %285 = vmatpush.msra.mxu0 %v254_v18 }
  0xbb   :  { %v244_v24 = vpop.permute.xlu0 %243 }
  0xbc   :  { %vm248_vm0 = vcmp.eq.s32.totalorder %v241_v23, %v244_v24 }
  0xbd   :  { %2298 = vmatmul.msk.f32.vlgmr.msra.gmra.mxu0 %vm248_vm0, %v2866_v25 }
  0xc3   :  { %v247_v26 = vpop.permute.xlu0 %246 }
  0xc4   :  { %vm249_vm1 = vcmp.eq.s32.totalorder %v241_v23, %v247_v26 }
  0xc5   :  { %2299 = vmatmul.msk.f32.gmra.mxu0 %vm249_vm1, %v2866_v25 }
 0x13a   :  { %v287_v32 = vpop.f32.mrf.mxu0 }
 0x13b   :  { %2300 = vmatmul.msk.f32.vlgmr.msra.gmra.mxu1 %vm301_vm2, %v287_v32 }
 0x13c   :  { %868 = vmatpush.msra.mxu1 %v3099_v28 }
 0x13e   :  { %869 = vmatpush.msra.mxu1 %v3104_v29 }
 0x140   :  { %870 = vmatpush.msra.mxu1 %v3111_v30 }
 0x142   :  { %v290_v33 = vpop.f32.mrf.mxu0  ;;  %871 = vmatpush.msra.mxu1 %v3119_v31 }
 0x143   :  { %2301 = vmatmul.msk.f32.vlgmr.msra.gmra.mxu2 %vm301_vm2, %v290_v33 }
 0x144   :  { %495 = vmatpush.msra.mxu2 %v3099_v28 }
 0x146   :  { %496 = vmatpush.msra.mxu2 %v3104_v29 }
 0x148   :  { %497 = vmatpush.msra.mxu2 %v3111_v30 }
 0x14a   :  { %498 = vmatpush.msra.mxu2 %v3119_v31 }
 0x14b   :  { %354 = vmatmul.f32.vlgmr.msrb.gmra.mxu2 %v2867_v34 }
 0x14c   :  { %718 = vmatpush.msrb.mxu2 %v3099_v28 }
 0x14e   :  { %719 = vmatpush.msrb.mxu2 %v3104_v29 }
 0x150   :  { %720 = vmatpush.msrb.mxu2 %v3111_v30 }
 0x152   :  { %721 = vmatpush.msrb.mxu2 %v3119_v31 }
 0x1b8   :  { %v325_v38 = vpop.f32.mrf.mxu1 }
 0x1b9   :  { %v3148_v39 = vadd.f32 %v2398_v35, %v325_v38 }
 0x1c6   :  { %v328_v36 = vpop.f32.mrf.mxu2 }
 0x1c7   :  { %v3146_v37 = vadd.f32 %v2398_v35, %v328_v36 }
 0x1ce   :  { %v355_v40 = vpop.f32.mrf.mxu2 }
 0x1cf   :  { %v358_v41 = vadd.f32 %v355_v40, %v3148_v39 }
 0x1d1   :  { %2405 = vtanh.f32 %v358_v41  ;;  %v2302_v43 = vmul.f32 -1.442695, %v358_v41 }
 0x1d3   :  { %2407 = vpow2.f32 %v2302_v43 }
 0x1d7   :  { %v2406_v42 = vpop.eup %2405 }
 0x1d8   :  { %381 = vrot.lane.b32.xlu1 %v2406_v42, %s2868_s27 }
 0x1d9   :  { %v2408_v44 = vpop.eup %2407 }
 0x1da   :  { %v362_v45 = vadd.f32 1.0, %v2408_v44 }
 0x1dc   :  { %2409 = vrcp.f32 %v362_v45  ;;  %v374_v51 = vand.u32 2147483648, %v362_v45  ;;  %vm368_vm4 = vweird.f32 %v362_v45  ;;  %v372_v52 = vand.u32 2147483647, %v362_v45 }
 0x1de   :  { %v375_v54 = vor.u32 1.1754944e-38, %v374_v51  ;;  %vm373_vm6 = vcmp.eq.f32.partialorder %v372_v52, 8.507059e+37 }
 0x1e2   :  { %v2410_v46 = vpop.eup %2409 }
 0x1e3   :  { %v364_v47 = vmul.f32 %v2410_v46, %v362_v45  ;;  %vm369_vm3 = vweird.f32 %v2410_v46 }
 0x1e4   :  { %vm370_vm5 = vmor %vm368_vm4, %vm369_vm3 }
 0x1e5   :  { %v365_v48 = vsub.f32 1.0, %v364_v47 }
 0x1e7   :  { %v366_v49 = vmul.f32 %v2410_v46, %v365_v48 }
 0x1e9   :  { %v367_v50 = vadd.f32 %v2410_v46, %v366_v49 }
 0x1eb   :  { %v371_v53 = vsel %vm370_vm5, %v2410_v46, %v367_v50 }
 0x1ec   :  { %v376_v56 = vsel %vm373_vm6, %v375_v54, %v371_v53 }
 0x1ed   :  { %v379_v58 = vmul.f32 0.0, %v376_v56 }
 0x24a   :  { %v382_v55 = vpop.permute.xlu1 %381 }
 0x24b   :  { %v384_v57 = vmul.f32 %v382_v55, %v376_v56 }
 0x24d   :  { %386 = vrot.lane.b32.xlu1 %v384_v57, %s2862_s10 }
 0x2bf   :  { %v387_v59 = vpop.permute.xlu1 %386 }
 0x2c0   :  { %v389_v60 = vadd.f32 %v387_v59, %v379_v58 }
 0x2c2   :  { %2411 = vtanh.f32 %v389_v60  ;;  %v451_v20 = vrot.slane %v389_v60, 6 }
 0x2c8   :  { %v2412_v61 = vpop.eup %2411 }
 0x2c9   :  { %392 = vrot.lane.b32.xlu2 %v2412_v61, %s2868_s27 }
 0x323   :  { %v393_v62 = vpop.permute.xlu2 %392 }
 0x324   :  { %v395_v63 = vmul.f32 %v393_v62, %v376_v56 }
 0x326   :  { %397 = vrot.lane.b32.xlu2 %v395_v63, %s2862_s10 }
 0x380   :  { %v398_v0 = vpop.permute.xlu2 %397 }
 0x381   :  { %401 = vst.msk [vmem:[#allocation2] sm:$0x1] %vm400_vm7, %v398_v0  ;;  %2303 = vmatmul.msk.f32.vlgmr.msra.gmra.mxu3 %vm301_vm2, %v398_v0 }
 0x382   :  { %403 = vst.msk [vmem:[#allocation2 + $0x7] sm:$0x2] %vm402_vm8, %v398_v0  ;;  %793 = vmatpush.msra.mxu3 %v3099_v28 }
 0x384   :  { %794 = vmatpush.msra.mxu3 %v3104_v29 }
 0x386   :  { %795 = vmatpush.msra.mxu3 %v3111_v30 }
 0x388   :  { %796 = vmatpush.msra.mxu3 %v3119_v31 }
 0x404   :  { %v423_v1 = vpop.f32.mrf.mxu3 }
 0x405   :  { %v427_v2 = vrot.slane %v423_v1, 6 }
 0x407   :  { %v429_v3 = vadd.f32 %v427_v2, %v3148_v39 }
 0x409   :  { %2413 = vtanh.f32 %v429_v3  ;;  %v2304_v5 = vmul.f32 -1.442695, %v429_v3 }
 0x40b   :  { %2415 = vpow2.f32 %v2304_v5 }
 0x40f   :  { %v2414_v4 = vpop.eup %2413 }
 0x410   :  { %455 = vrot.lane.b32.xlu0 %v2414_v4, %s2868_s27 }
 0x411   :  { %v2416_v6 = vpop.eup %2415 }
 0x412   :  { %v433_v7 = vadd.f32 1.0, %v2416_v6 }
 0x414   :  { %2417 = vrcp.f32 %v433_v7  ;;  %v445_v13 = vand.u32 2147483648, %v433_v7  ;;  %vm439_vm10 = vweird.f32 %v433_v7  ;;  %v443_v14 = vand.u32 2147483647, %v433_v7 }
 0x416   :  { %v446_v16 = vor.u32 1.1754944e-38, %v445_v13  ;;  %vm444_vm12 = vcmp.eq.f32.partialorder %v443_v14, 8.507059e+37 }
 0x41a   :  { %v2418_v8 = vpop.eup %2417 }
 0x41b   :  { %v435_v9 = vmul.f32 %v2418_v8, %v433_v7  ;;  %vm440_vm9 = vweird.f32 %v2418_v8 }
 0x41c   :  { %vm441_vm11 = vmor %vm439_vm10, %vm440_vm9 }
 0x41d   :  { %v436_v10 = vsub.f32 1.0, %v435_v9 }
 0x41f   :  { %v437_v11 = vmul.f32 %v2418_v8, %v436_v10 }
 0x421   :  { %v438_v12 = vadd.f32 %v2418_v8, %v437_v11 }
 0x423   :  { %v442_v15 = vsel %vm441_vm11, %v2418_v8, %v438_v12 }
 0x424   :  { %v447_v18 = vsel %vm444_vm12, %v446_v16, %v442_v15 }
 0x425   :  { %v453_v21 = vmul.f32 %v451_v20, %v447_v18 }
 0x482   :  { %v456_v17 = vpop.permute.xlu0 %455 }
 0x483   :  { %v458_v19 = vmul.f32 %v456_v17, %v447_v18 }
 0x485   :  { %460 = vrot.lane.b32.xlu1 %v458_v19, %s2862_s10 }
 0x4f7   :  { %v461_v22 = vpop.permute.xlu1 %460 }
 0x4f8   :  { %v463_v23 = vadd.f32 %v461_v22, %v453_v21 }
 0x4fa   :  { %2419 = vtanh.f32 %v463_v23  ;;  %v528_v50 = vrot.slane %v463_v23, 6 }
 0x500   :  { %v2420_v24 = vpop.eup %2419 }
 0x501   :  { %466 = vrot.lane.b32.xlu2 %v2420_v24, %s2868_s27 }
 0x55b   :  { %v467_v25 = vpop.permute.xlu2 %466 }
 0x55c   :  { %v3166_v26 = vmul.f32 %v467_v25, %v447_v18 }
 0x55e   :  { %v478_v27 = vrot.slane %v3166_v26, 2 }
 0x560   :  { %479 = vrot.lane.b32.xlu0 %v478_v27, %s2862_s10 }
 0x5d2   :  { %v480_v28 = vpop.permute.xlu0 %479 }
 0x5d3   :  { %2305 = vmatmul.msk.f32.vlgmr.msra.gmra.mxu2 %vm301_vm2, %v480_v28 }
 0x656   :  { %v500_v29 = vpop.f32.mrf.mxu2 }
 0x657   :  { %v504_v30 = vrot.slane %v500_v29, 4 }
 0x659   :  { %v506_v31 = vadd.f32 %v504_v30, %v3148_v39 }
 0x65b   :  { %2421 = vtanh.f32 %v506_v31  ;;  %v2306_v33 = vmul.f32 -1.442695, %v506_v31 }
 0x65d   :  { %2423 = vpow2.f32 %v2306_v33 }
 0x661   :  { %v2422_v32 = vpop.eup %2421 }
 0x662   :  { %532 = vrot.lane.b32.xlu1 %v2422_v32, %s2868_s27 }
 0x663   :  { %v2424_v34 = vpop.eup %2423 }
 0x664   :  { %v510_v35 = vadd.f32 1.0, %v2424_v34 }
 0x666   :  { %2425 = vrcp.f32 %v510_v35  ;;  %v522_v43 = vand.u32 2147483648, %v510_v35  ;;  %vm516_vm14 = vweird.f32 %v510_v35  ;;  %v520_v44 = vand.u32 2147483647, %v510_v35 }
 0x668   :  { %v523_v46 = vor.u32 1.1754944e-38, %v522_v43  ;;  %vm521_vm0 = vcmp.eq.f32.partialorder %v520_v44, 8.507059e+37 }
 0x66c   :  { %v2426_v36 = vpop.eup %2425 }
 0x66d   :  { %v512_v38 = vmul.f32 %v2426_v36, %v510_v35  ;;  %vm517_vm13 = vweird.f32 %v2426_v36 }
 0x66e   :  { %vm518_vm15 = vmor %vm516_vm14, %vm517_vm13 }
 0x66f   :  { %v513_v40 = vsub.f32 1.0, %v512_v38 }
 0x671   :  { %v514_v41 = vmul.f32 %v2426_v36, %v513_v40 }
 0x673   :  { %v515_v42 = vadd.f32 %v2426_v36, %v514_v41 }
 0x675   :  { %v519_v45 = vsel %vm518_vm15, %v2426_v36, %v515_v42 }
 0x676   :  { %v524_v48 = vsel %vm521_vm0, %v523_v46, %v519_v45 }
 0x677   :  { %v530_v51 = vmul.f32 %v528_v50, %v524_v48 }
 0x6d4   :  { %v533_v47 = vpop.permute.xlu1 %532 }
 0x6d5   :  { %v535_v49 = vmul.f32 %v533_v47, %v524_v48 }
 0x6d7   :  { %537 = vrot.lane.b32.xlu2 %v535_v49, %s2862_s10 }
 0x731   :  { %v538_v52 = vpop.permute.xlu2 %537 }
 0x732   :  { %v540_v53 = vadd.f32 %v538_v52, %v530_v51 }
 0x734   :  { %2427 = vtanh.f32 %v540_v53  ;;  %v605_v13 = vrot.slane %v540_v53, 6 }
 0x73a   :  { %v2428_v54 = vpop.eup %2427 }
 0x73b   :  { %543 = vrot.lane.b32.xlu0 %v2428_v54, %s2868_s27 }
 0x7ad   :  { %v544_v55 = vpop.permute.xlu0 %543 }
 0x7ae   :  { %v3175_v56 = vmul.f32 %v544_v55, %v524_v48 }
 0x7b0   :  { %v555_v57 = vrot.slane %v3175_v56, 4 }
 0x7b2   :  { %556 = vrot.lane.b32.xlu1 %v555_v57, %s2862_s10 }
 0x824   :  { %v557_v58 = vpop.permute.xlu1 %556 }
 0x825   :  { %2307 = vmatmul.msk.f32.vlgmr.msrb.gmra.mxu3 %vm301_vm2, %v557_v58 }
 0x8a8   :  { %v577_v59 = vpop.f32.mrf.mxu3 }
 0x8a9   :  { %v581_v60 = vrot.slane %v577_v59, 2 }
 0x8ab   :  { %v583_v61 = vadd.f32 %v581_v60, %v3148_v39 }
 0x8ad   :  { %2429 = vtanh.f32 %v583_v61  ;;  %v2308_v63 = vmul.f32 -1.442695, %v583_v61 }
 0x8af   :  { %2431 = vpow2.f32 %v2308_v63 }
 0x8b3   :  { %v2430_v62 = vpop.eup %2429 }
 0x8b4   :  { %609 = vrot.lane.b32.xlu2 %v2430_v62, %s2868_s27 }
 0x8b5   :  { %v2432_v0 = vpop.eup %2431 }
 0x8b6   :  { %v587_v1 = vadd.f32 1.0, %v2432_v0 }
 0x8b8   :  { %2433 = vrcp.f32 %v587_v1  ;;  %v599_v7 = vand.u32 2147483648, %v587_v1  ;;  %vm593_vm3 = vweird.f32 %v587_v1  ;;  %v597_v8 = vand.u32 2147483647, %v587_v1 }
 0x8ba   :  { %v600_v9 = vor.u32 1.1754944e-38, %v599_v7  ;;  %vm598_vm5 = vcmp.eq.f32.partialorder %v597_v8, 8.507059e+37 }
 0x8be   :  { %v2434_v2 = vpop.eup %2433 }
 0x8bf   :  { %v589_v3 = vmul.f32 %v2434_v2, %v587_v1  ;;  %vm594_vm1 = vweird.f32 %v2434_v2 }
 0x8c0   :  { %vm595_vm4 = vmor %vm593_vm3, %vm594_vm1 }
 0x8c1   :  { %v590_v4 = vsub.f32 1.0, %v589_v3 }
 0x8c3   :  { %v591_v5 = vmul.f32 %v2434_v2, %v590_v4 }
 0x8c5   :  { %v592_v6 = vadd.f32 %v2434_v2, %v591_v5 }
 0x8c7   :  { %v596_v39 = vsel %vm595_vm4, %v2434_v2, %v592_v6 }
 0x8c8   :  { %v601_v11 = vsel %vm598_vm5, %v600_v9, %v596_v39 }
 0x8c9   :  { %v607_v14 = vmul.f32 %v605_v13, %v601_v11 }
 0x90e   :  { %v610_v10 = vpop.permute.xlu2 %609 }
 0x90f   :  { %v612_v12 = vmul.f32 %v610_v10, %v601_v11 }
 0x911   :  { %614 = vrot.lane.b32.xlu0 %v612_v12, %s2862_s10 }
 0x983   :  { %v615_v15 = vpop.permute.xlu0 %614 }
 0x984   :  { %v617_v16 = vadd.f32 %v615_v15, %v607_v14 }
 0x986   :  { %2435 = vtanh.f32 %v617_v16  ;;  %v679_v43 = vrot.slane %v617_v16, 6 }
 0x98c   :  { %v2436_v17 = vpop.eup %2435 }
 0x98d   :  { %620 = vrot.lane.b32.xlu1 %v2436_v17, %s2868_s27 }
 0x9ff   :  { %v621_v18 = vpop.permute.xlu1 %620 }
 0xa00   :  { %v3184_v19 = vmul.f32 %v621_v18, %v601_v11 }
 0xa02   :  { %v632_v20 = vrot.slane %v3184_v19, 6 }
 0xa04   :  { %633 = vrot.lane.b32.xlu2 %v632_v20, %s2862_s10 }
 0xa5e   :  { %v634_v21 = vpop.permute.xlu2 %633 }
 0xa5f   :  { %2309 = vmatmul.msk.f32.vlgmr.msrb.gmra.mxu1 %vm301_vm2, %v634_v21 }
 0xadc   :  { %v654_v22 = vpop.f32.mrf.mxu1 }
 0xadd   :  { %v657_v23 = vadd.f32 %v654_v22, %v3146_v37 }
 0xadf   :  { %2437 = vtanh.f32 %v657_v23  ;;  %v2310_v25 = vmul.f32 -1.442695, %v657_v23 }
 0xae1   :  { %2439 = vpow2.f32 %v2310_v25 }
 0xae5   :  { %v2438_v24 = vpop.eup %2437 }
 0xae6   :  { %683 = vrot.lane.b32.xlu0 %v2438_v24, %s2868_s27 }
 0xae7   :  { %v2440_v27 = vpop.eup %2439 }
 0xae8   :  { %v661_v28 = vadd.f32 1.0, %v2440_v27 }
 0xaea   :  { %2441 = vrcp.f32 %v661_v28  ;;  %v673_v34 = vand.u32 2147483648, %v661_v28  ;;  %vm667_vm9 = vweird.f32 %v661_v28  ;;  %v671_v35 = vand.u32 2147483647, %v661_v28 }
 0xaec   :  { %v674_v38 = vor.u32 1.1754944e-38, %v673_v34  ;;  %vm672_vm11 = vcmp.eq.f32.partialorder %v671_v35, 8.507059e+37 }
 0xaf0   :  { %v2442_v29 = vpop.eup %2441 }
 0xaf1   :  { %v663_v30 = vmul.f32 %v2442_v29, %v661_v28  ;;  %vm668_vm6 = vweird.f32 %v2442_v29 }
 0xaf2   :  { %vm669_vm10 = vmor %vm667_vm9, %vm668_vm6  ;;  %vm474_vm9 = vcmask 256002  }
 0xaf3   :  { %v664_v31 = vsub.f32 1.0, %v663_v30 }
 0xaf5   :  { %v665_v32 = vmul.f32 %v2442_v29, %v664_v31 }
 0xaf7   :  { %v666_v33 = vadd.f32 %v2442_v29, %v665_v32 }
 0xaf9   :  { %v670_v36 = vsel %vm669_vm10, %v2442_v29, %v666_v33  ;;  %vm476_vm10 = vcmask 257027  }
 0xafa   :  { %v675_v41 = vsel %vm672_vm11, %v674_v38, %v670_v36  ;;  %vm551_vm11 = vcmask 258052  }
 0xafb   :  { %v681_v44 = vmul.f32 %v679_v43, %v675_v41 }
 0xb58   :  { %v684_v40 = vpop.permute.xlu0 %683 }
 0xb59   :  { %v686_v42 = vmul.f32 %v684_v40, %v675_v41 }
 0xb5b   :  { %688 = vrot.lane.b32.xlu1 %v686_v42, %s2862_s10 }
 0xbcd   :  { %v689_v45 = vpop.permute.xlu1 %688 }
 0xbce   :  { %v691_v46 = vadd.f32 %v689_v45, %v681_v44 }
 0xbd0   :  { %2443 = vtanh.f32 %v691_v46  ;;  %v751_v7 = vrot.slane %v691_v46, 6 }
 0xbd6   :  { %v2444_v47 = vpop.eup %2443 }
 0xbd7   :  { %694 = vrot.lane.b32.xlu2 %v2444_v47, %s2868_s27 }
 0xc31   :  { %v695_v48 = vpop.permute.xlu2 %694 }
 0xc32   :  { %v697_v49 = vmul.f32 %v695_v48, %v675_v41 }
 0xc34   :  { %699 = vrot.lane.b32.xlu0 %v697_v49, %s2862_s10 }
 0xca6   :  { %v700_v50 = vpop.permute.xlu0 %699 }
 0xca7   :  { %702 = vst.msk [vmem:[#allocation2 + $0x4] sm:$0x1] %vm400_vm7, %v700_v50  ;;  %2311 = vmatmul.msk.f32.vlgmr.msrb.gmra.mxu2 %vm301_vm2, %v700_v50 }
 0xca8   :  { %703 = vst.msk [vmem:[#allocation2 + $0xb] sm:$0x2] %vm402_vm8, %v700_v50 }
 0xd2a   :  { %v723_v51 = vpop.f32.mrf.mxu2 }
 0xd2b   :  { %v727_v52 = vrot.slane %v723_v51, 6 }
 0xd2d   :  { %v729_v53 = vadd.f32 %v727_v52, %v3146_v37 }
 0xd2f   :  { %2445 = vtanh.f32 %v729_v53  ;;  %v2312_v55 = vmul.f32 -1.442695, %v729_v53 }
 0xd31   :  { %2447 = vpow2.f32 %v2312_v55 }
 0xd35   :  { %v2446_v54 = vpop.eup %2445 }
 0xd36   :  { %755 = vrot.lane.b32.xlu1 %v2446_v54, %s2868_s27 }
 0xd37   :  { %v2448_v57 = vpop.eup %2447 }
 0xd38   :  { %v733_v58 = vadd.f32 1.0, %v2448_v57 }
 0xd3a   :  { %2449 = vrcp.f32 %v733_v58  ;;  %v745_v0 = vand.u32 2147483648, %v733_v58  ;;  %vm739_vm8 = vweird.f32 %v733_v58  ;;  %v743_v1 = vand.u32 2147483647, %v733_v58 }
 0xd3c   :  { %v746_v3 = vor.u32 1.1754944e-38, %v745_v0  ;;  %vm744_vm13 = vcmp.eq.f32.partialorder %v743_v1, 8.507059e+37 }
 0xd40   :  { %v2450_v59 = vpop.eup %2449 }
 0xd41   :  { %v735_v60 = vmul.f32 %v2450_v59, %v733_v58  ;;  %vm740_vm7 = vweird.f32 %v2450_v59 }
 0xd42   :  { %vm741_vm12 = vmor %vm739_vm8, %vm740_vm7  ;;  %vm553_vm7 = vcmask 259077   ;;  %vm628_vm8 = vcmask 260102  }
 0xd43   :  { %v736_v61 = vsub.f32 1.0, %v735_v60 }
 0xd45   :  { %v737_v62 = vmul.f32 %v2450_v59, %v736_v61 }
 0xd47   :  { %v738_v63 = vadd.f32 %v2450_v59, %v737_v62 }
 0xd49   :  { %v742_v2 = vsel %vm741_vm12, %v2450_v59, %v738_v63  ;;  %vm630_vm12 = vcmask 261127  }
 0xd4a   :  { %v747_v5 = vsel %vm744_vm13, %v746_v3, %v742_v2 }
 0xd4b   :  { %v753_v8 = vmul.f32 %v751_v7, %v747_v5 }
 0xda8   :  { %v756_v4 = vpop.permute.xlu1 %755 }
 0xda9   :  { %v758_v6 = vmul.f32 %v756_v4, %v747_v5 }
 0xdab   :  { %760 = vrot.lane.b32.xlu2 %v758_v6, %s2862_s10 }
 0xe05   :  { %v761_v39 = vpop.permute.xlu2 %760 }
 0xe06   :  { %v763_v9 = vadd.f32 %v761_v39, %v753_v8 }
 0xe08   :  { %2451 = vtanh.f32 %v763_v9  ;;  %v826_v36 = vrot.slane %v763_v9, 6 }
 0xe0e   :  { %v2452_v10 = vpop.eup %2451 }
 0xe0f   :  { %766 = vrot.lane.b32.xlu0 %v2452_v10, %s2868_s27 }
 0xe81   :  { %v767_v11 = vpop.permute.xlu0 %766 }
 0xe82   :  { %v769_v12 = vmul.f32 %v767_v11, %v747_v5 }
 0xe84   :  { %v776_v13 = vrot.slane %v769_v12, 2 }
 0xe86   :  { %777 = vrot.lane.b32.xlu1 %v776_v13, %s2862_s10 }
 0xef8   :  { %v778_v14 = vpop.permute.xlu1 %777 }
 0xef9   :  { %2313 = vmatmul.msk.f32.vlgmr.msra.gmra.mxu3 %vm301_vm2, %v778_v14 }
 0xf7c   :  { %v798_v15 = vpop.f32.mrf.mxu3 }
 0xf7d   :  { %v802_v16 = vrot.slane %v798_v15, 4 }
 0xf7f   :  { %v804_v17 = vadd.f32 %v802_v16, %v3146_v37 }
 0xf81   :  { %2453 = vtanh.f32 %v804_v17  ;;  %v2314_v20 = vmul.f32 -1.442695, %v804_v17  ;;  %v2869_v17 = vmov 32.0  }
 0xf83   :  { %2455 = vpow2.f32 %v2314_v20 }
 0xf87   :  { %v2454_v18 = vpop.eup %2453 }
 0xf88   :  { %830 = vrot.lane.b32.xlu2 %v2454_v18, %s2868_s27 }
 0xf89   :  { %v2456_v21 = vpop.eup %2455 }
 0xf8a   :  { %v808_v22 = vadd.f32 1.0, %v2456_v21 }
 0xf8c   :  { %2457 = vrcp.f32 %v808_v22  ;;  %v820_v29 = vand.u32 2147483648, %v808_v22  ;;  %vm814_vm15 = vweird.f32 %v808_v22  ;;  %v818_v30 = vand.u32 2147483647, %v808_v22 }
 0xf8e   :  { %v821_v32 = vor.u32 1.1754944e-38, %v820_v29  ;;  %vm819_vm1 = vcmp.eq.f32.partialorder %v818_v30, 8.507059e+37 }
 0xf92   :  { %v2458_v23 = vpop.eup %2457 }
 0xf93   :  { %v810_v24 = vmul.f32 %v2458_v23, %v808_v22  ;;  %vm815_vm14 = vweird.f32 %v2458_v23 }
 0xf94   :  { %vm816_vm0 = vmor %vm814_vm15, %vm815_vm14 }
 0xf95   :  { %v811_v25 = vsub.f32 1.0, %v810_v24 }
 0xf97   :  { %v812_v27 = vmul.f32 %v2458_v23, %v811_v25 }
 0xf99   :  { %v813_v28 = vadd.f32 %v2458_v23, %v812_v27 }
 0xf9b   :  { %v817_v31 = vsel %vm816_vm0, %v2458_v23, %v813_v28 }
 0xf9c   :  { %v822_v34 = vsel %vm819_vm1, %v821_v32, %v817_v31 }
 0xf9d   :  { %v828_v38 = vmul.f32 %v826_v36, %v822_v34 }
 0xfe2   :  { %v831_v33 = vpop.permute.xlu2 %830 }
 0xfe3   :  { %v833_v35 = vmul.f32 %v831_v33, %v822_v34 }
 0xfe5   :  { %835 = vrot.lane.b32.xlu0 %v833_v35, %s2862_s10 }
0x1057   :  { %v836_v40 = vpop.permute.xlu0 %835 }
0x1058   :  { %v838_v41 = vadd.f32 %v836_v40, %v828_v38 }
0x105a   :  { %2459 = vtanh.f32 %v838_v41  ;;  %v901_v3 = vrot.slane %v838_v41, 6 }
0x1060   :  { %v2460_v42 = vpop.eup %2459 }
0x1061   :  { %841 = vrot.lane.b32.xlu1 %v2460_v42, %s2868_s27 }
0x10d3   :  { %v842_v43 = vpop.permute.xlu1 %841 }
0x10d4   :  { %v844_v44 = vmul.f32 %v842_v43, %v822_v34 }
0x10d6   :  { %v851_v45 = vrot.slane %v844_v44, 4 }
0x10d8   :  { %852 = vrot.lane.b32.xlu2 %v851_v45, %s2862_s10 }
0x1132   :  { %v853_v46 = vpop.permute.xlu2 %852 }
0x1133   :  { %2315 = vmatmul.msk.f32.vlgmr.msra.gmra.mxu1 %vm301_vm2, %v853_v46 }
0x11b0   :  { %v873_v47 = vpop.f32.mrf.mxu1 }
0x11b1   :  { %v877_v48 = vrot.slane %v873_v47, 2 }
0x11b3   :  { %v879_v49 = vadd.f32 %v877_v48, %v3146_v37 }
0x11b5   :  { %2461 = vtanh.f32 %v879_v49  ;;  %v2316_v51 = vmul.f32 -1.442695, %v879_v49 }
0x11b7   :  { %2463 = vpow2.f32 %v2316_v51 }
0x11bb   :  { %v2462_v50 = vpop.eup %2461 }
0x11bc   :  { %905 = vrot.lane.b32.xlu0 %v2462_v50, %s2868_s27 }
0x11bd   :  { %v2464_v52 = vpop.eup %2463 }
0x11be   :  { %v883_v53 = vadd.f32 1.0, %v2464_v52 }
0x11c0   :  { %2465 = vrcp.f32 %v883_v53  ;;  %v895_v37 = vand.u32 2147483648, %v883_v53  ;;  %vm889_vm4 = vweird.f32 %v883_v53  ;;  %v893_v60 = vand.u32 2147483647, %v883_v53 }
0x11c2   :  { %v896_v62 = vor.u32 1.1754944e-38, %v895_v37  ;;  %vm894_vm6 = vcmp.eq.f32.partialorder %v893_v60, 8.507059e+37 }
0x11c4   :  { %471 = vrot.lane.b32.xlu0 %v3166_v26, %s2862_s10 }
0x11c6   :  { %v2466_v54 = vpop.eup %2465 }
0x11c7   :  { %v885_v55 = vmul.f32 %v2466_v54, %v883_v53  ;;  %vm890_vm3 = vweird.f32 %v2466_v54 }
0x11c8   :  { %vm891_vm5 = vmor %vm889_vm4, %vm890_vm3 }
0x11c9   :  { %v886_v57 = vsub.f32 1.0, %v885_v55 }
0x11cb   :  { %v887_v58 = vmul.f32 %v2466_v54, %v886_v57 }
0x11cc   :  { %771 = vrot.lane.b32.xlu0 %v769_v12, %s2862_s10 }
0x11cd   :  { %v888_v59 = vadd.f32 %v2466_v54, %v887_v58 }
0x11cf   :  { %v892_v61 = vsel %vm891_vm5, %v2466_v54, %v888_v59 }
0x11d0   :  { %v897_v63 = vsel %vm894_vm6, %v896_v62, %v892_v61 }
0x11d1   :  { %v903_v4 = vmul.f32 %v901_v3, %v897_v63 }
0x122e   :  { %v906_v26 = vpop.permute.xlu0 %905 }
0x122f   :  { %v908_v0 = vmul.f32 %v906_v26, %v897_v63 }
0x1231   :  { %910 = vrot.lane.b32.xlu1 %v908_v0, %s2862_s10 }
0x1236   :  { %v472_v1 = vpop.permute.xlu0 %471 }
0x1237   :  { %475 = vst.msk [vmem:[#allocation2 - $0x1] sm:$0x4] %vm474_vm9, %v472_v1 }
0x1238   :  { %477 = vst.msk [vmem:[#allocation2 + $0x6] sm:$0x8] %vm476_vm10, %v472_v1 }
0x1239   :  { %548 = vrot.lane.b32.xlu1 %v3175_v56, %s2862_s10 }
0x123e   :  { %v772_v2 = vpop.permute.xlu0 %771 }
0x123f   :  { %774 = vst.msk [vmem:[#allocation2 + $0x3] sm:$0x4] %vm474_vm9, %v772_v2 }
0x1240   :  { %775 = vst.msk [vmem:[#allocation2 + $0xa] sm:$0x8] %vm476_vm10, %v772_v2 }
0x1241   :  { %846 = vrot.lane.b32.xlu1 %v844_v44, %s2862_s10 }
0x12a3   :  { %v911_v5 = vpop.permute.xlu1 %910 }
0x12a4   :  { %v913_v6 = vadd.f32 %v911_v5, %v903_v4 }
0x12a6   :  { %2467 = vtanh.f32 %v913_v6 }
0x12a7   :  { %2469 = vrcp.f32 %v2869_v17 }
0x12ab   :  { %v549_v7 = vpop.permute.xlu1 %548 }
0x12ac   :  { %v2468_v8 = vpop.eup %2467  ;;  %552 = vst.msk [vmem:[#allocation2 - $0x2] sm:$0x10] %vm551_vm11, %v549_v7 }
0x12ad   :  { %554 = vst.msk [vmem:[#allocation2 + $0x5] sm:$0x20] %vm553_vm7, %v549_v7  ;;  %916 = vrot.lane.b32.xlu2 %v2468_v8, %s2868_s27  ;;  %v2470_v18 = vpop.eup %2469 }
0x12ae   :  { %v937_v20 = vmul.f32 32.0, %v2470_v18  ;;  %vm941_vm13 = vweird.f32 %v2470_v18 }
0x12b0   :  { %v938_v21 = vsub.f32 1.0, %v937_v20 }
0x12b2   :  { %v939_v22 = vmul.f32 %v2470_v18, %v938_v21  ;;  %v1060_v21 = vld [vmem:[%s3477_s7 + $0x18] sm:$0xff] }
0x12b3   :  { %v847_v39 = vpop.permute.xlu1 %846 }
0x12b4   :  { %849 = vst.msk [vmem:[#allocation2 + $0x2] sm:$0x10] %vm551_vm11, %v847_v39  ;;  %v940_v23 = vadd.f32 %v2470_v18, %v939_v22  ;;  %v1064_v22 = vmul.f32 0.35355338, %v1060_v21 }
0x12b5   :  { %850 = vst.msk [vmem:[#allocation2 + $0x9] sm:$0x20] %vm553_vm7, %v847_v39  ;;  %625 = vrot.lane.b32.xlu2 %v3184_v19, %s2862_s10 }
0x12b6   :  { %v3232_v24 = vsel %vm941_vm13, %v2470_v18, %v940_v23  ;;  %v1102_v23 = vld [vmem:[%s3478_s8 + $0x18] sm:$0xff]  ;;  %1088 = vmatpush.msra.mxu2 %v1064_v22 }
0x12b7   :  { %1119 = vmatpush.msrb.mxu3 %v1102_v23 }
0x1307   :  { %v917_v56 = vpop.permute.xlu2 %916 }
0x1308   :  { %v919_v9 = vmul.f32 %v917_v56, %v897_v63 }
0x130a   :  { %921 = vrot.lane.b32.xlu2 %v919_v9, %s2862_s10 }
0x130f   :  { %v626_v10 = vpop.permute.xlu2 %625 }
0x1310   :  { %629 = vst.msk [vmem:[#allocation2 - $0x3] sm:$0x40] %vm628_vm8, %v626_v10 }
0x1311   :  { %631 = vst.msk [vmem:[#allocation2 + $0x4] sm:$0x80] %vm630_vm12, %v626_v10 }
0x1364   :  { %v922_v11 = vpop.permute.xlu2 %921 }
0x1365   :  { %924 = vst.msk [vmem:[#allocation2 + $0x1] sm:$0x40] %vm628_vm8, %v922_v11 }
0x1366   :  { %925 = vst.msk [vmem:[#allocation2 + $0x8] sm:$0x80] %vm630_vm12, %v922_v11 }
0x136c   :  { %v3222_v12 = vld [vmem:[#allocation2] sm:$0xff] }
0x136d   :  { %v3224_v13 = vld [vmem:[#allocation2 + $0x8] sm:$0xff]  ;;  %v928_v14 = vmul.f32 %v3222_v12, %v3222_v12 }
0x136e   :  { %v929_v19 = vmul.f32 %v3224_v13, %v3224_v13 }
0x136f   :  { %v930_v15 = vsel %vm301_vm2, %v928_v14, 0.0 }
0x1370   :  { %v933_v16 = vsel %vm301_vm2, %v929_v19, 0.0  ;;  %931 = vadd.xlane.f32.xlu0 %v930_v15 }
0x1371   :  { %934 = vadd.xlane.f32.xlu1 %v933_v16 }
0x13e3   :  { %v932_v25 = vpop.xlane.xlu0 %931 }
0x13e4   :  { %v935_v27 = vpop.xlane.xlu1 %934  ;;  %v943_v28 = vmul.f32 %v3232_v24, %v932_v25  ;;  %v1133_v25 = vld [vmem:[%s3479_s9 + $0x18] sm:$0xff] }
0x13e5   :  { %v944_v29 = vmul.f32 %v3232_v24, %v935_v27  ;;  %v1059_v27 = vld [vmem:[%s3477_s7 + $0x10] sm:$0xff]  ;;  %1150 = vmatpush.msrb.mxu1 %v1133_v25 }
0x13e6   :  { %2471 = vrsqrt.f32 %v943_v28  ;;  %vm952_vm14 = vcmp.eq.f32.partialorder %v943_v28, inf  ;;  %v955_v46 = vand.u32 2147483648, %v943_v28  ;;  %vm954_vm15 = vcmp.eq.f32.partialorder %v943_v28, 0.0 }
0x13e7   :  { %2473 = vrsqrt.f32 %v944_v29  ;;  %vm964_vm0 = vcmp.eq.f32.partialorder %v944_v29, inf  ;;  %v967_v48 = vand.u32 2147483648, %v944_v29  ;;  %vm966_vm1 = vcmp.eq.f32.partialorder %v944_v29, 0.0 }
0x13ec   :  { %v2472_v30 = vpop.eup %2471 }
0x13ed   :  { %v2474_v31 = vpop.eup %2473  ;;  %v946_v32 = vmul.f32 %v2472_v30, %v943_v28 }
0x13ee   :  { %v958_v33 = vmul.f32 %v2474_v31, %v944_v29 }
0x13ef   :  { %v947_v34 = vmul.f32 %v2472_v30, %v946_v32 }
0x13f0   :  { %v959_v35 = vmul.f32 %v2474_v31, %v958_v33  ;;  %v1100_v33 = vld [vmem:[%s3478_s8 + $0x8] sm:$0xff] }
0x13f1   :  { %v948_v36 = vmul.f32 0.5, %v947_v34  ;;  %v1131_v34 = vld [vmem:[%s3479_s9 + $0x8] sm:$0xff] }
0x13f2   :  { %v960_v38 = vmul.f32 0.5, %v959_v35  ;;  %v1057_v35 = vld [vmem:[%s3477_s7] sm:$0xff] }
0x13f3   :  { %v949_v40 = vsub.f32 1.5, %v948_v36  ;;  %v1061_v36 = vmul.f32 0.35355338, %v1057_v35  ;;  %v1765_v35 = vld [vmem:[#allocation18 + $0x88] sm:$0xff] }
0x13f4   :  { %v961_v41 = vsub.f32 1.5, %v960_v38  ;;  %v1099_v38 = vld [vmem:[%s3478_s8] sm:$0xff] }
0x13f5   :  { %v950_v42 = vmul.f32 %v2472_v30, %v949_v40  ;;  %v1132_v30 = vld [vmem:[%s3479_s9 + $0x10] sm:$0xff]  ;;  %v1130_v40 = vld [vmem:[%s3479_s9] sm:$0xff]  ;;  %s2872_s9 = smov 104  }
0x13f6   :  { %v962_v43 = vmul.f32 %v2474_v31, %v961_v41  ;;  %v1058_v31 = vld [vmem:[%s3477_s7 + $0x8] sm:$0xff]  ;;  %1151 = vmatpush.msrb.mxu1 %v1132_v30  ;;  %s2870_s7 = smov 120   ;;  %v1777_v30 = vld [vmem:[#allocation18 + $0xe8] sm:$0xff] }
0x13f7   :  { %v951_v44 = vmul.f32 %v950_v42, %v943_v28  ;;  %v1062_v32 = vmul.f32 0.35355338, %v1058_v31 }
0x13f8   :  { %v963_v45 = vmul.f32 %v962_v43, %v944_v29  ;;  %1152 = vmatpush.msrb.mxu1 %v1131_v34  ;;  %v1769_v34 = vld [vmem:[#allocation18 + $0xa8] sm:$0xff] }
0x13f9   :  { %v953_v47 = vsel %vm952_vm14, %v943_v28, %v951_v44  ;;  %v1063_v28 = vmul.f32 0.35355338, %v1059_v27 }
0x13fa   :  { %v956_v49 = vsel %vm954_vm15, %v955_v46, %v953_v47  ;;  %v965_v50 = vsel %vm964_vm0, %v944_v29, %v963_v45  ;;  %v1101_v29 = vld [vmem:[%s3478_s8 + $0x10] sm:$0xff]  ;;  %1153 = vmatpush.msrb.mxu1 %v1130_v40  ;;  %s2871_s8 = smov 112  }
0x13fb   :  { %v969_v51 = vadd.f32 1e-05, %v956_v49  ;;  %v968_v52 = vsel %vm966_vm1, %v967_v48, %v965_v50  ;;  %1089 = vmatpush.msra.mxu2 %v1063_v28  ;;  %1120 = vmatpush.msrb.mxu3 %v1101_v29  ;;  %vm1161_vm1 = vcmask 64512  }
0x13fc   :  { %v970_v53 = vadd.f32 1e-05, %v968_v52 }
0x13fd   :  { %2475 = vrcp.f32 %v969_v51  ;;  %v982_v37 = vand.u32 2147483648, %v969_v51  ;;  %v980_v62 = vand.u32 2147483647, %v969_v51  ;;  %vm976_vm4 = vweird.f32 %v969_v51  ;;  %1090 = vmatpush.msra.mxu2 %v1062_v32  ;;  %1121 = vmatpush.msrb.mxu3 %v1100_v33  ;;  %v1773_v32 = vld [vmem:[#allocation18 + $0xc8] sm:$0xff] }
0x13fe   :  { %2477 = vrcp.f32 %v970_v53  ;;  %v997_v2 = vand.u32 2147483648, %v970_v53  ;;  %vm991_vm10 = vweird.f32 %v970_v53  ;;  %v995_v4 = vand.u32 2147483647, %v970_v53 }
0x13ff   :  { %v983_v0 = vor.u32 1.1754944e-38, %v982_v37  ;;  %vm981_vm9 = vcmp.eq.f32.partialorder %v980_v62, 8.507059e+37  ;;  %1091 = vmatpush.msra.mxu2 %v1061_v36  ;;  %1122 = vmatpush.msrb.mxu3 %v1099_v38 }
0x1400   :  { %v998_v8 = vor.u32 1.1754944e-38, %v997_v2  ;;  %vm996_vm7 = vcmp.eq.f32.partialorder %v995_v4, 8.507059e+37  ;;  %v3303_v4 = vld [vmem:[#allocation15] ss:$0 sm:$0xff] }
0x1403   :  { %v2476_v54 = vpop.eup %2475 }
0x1404   :  { %v2478_v55 = vpop.eup %2477  ;;  %v972_v57 = vmul.f32 %v2476_v54, %v969_v51  ;;  %vm977_vm3 = vweird.f32 %v2476_v54 }
0x1405   :  { %v987_v58 = vmul.f32 %v2478_v55, %v970_v53  ;;  %vm992_vm5 = vweird.f32 %v2478_v55  ;;  %vm978_vm6 = vmor %vm976_vm4, %vm977_vm3  ;;  %vm1293_vm3 = vcmask 130112   ;;  %vm1364_vm4 = vcmask 195712  }
0x1406   :  { %v973_v59 = vsub.f32 1.0, %v972_v57  ;;  %vm993_vm11 = vmor %vm991_vm10, %vm992_vm5  ;;  %vm1435_vm5 = vcmask 261312  }
0x1407   :  { %v988_v60 = vsub.f32 1.0, %v987_v58 }
0x1408   :  { %v974_v61 = vmul.f32 %v2476_v54, %v973_v59  ;;  %v2400_v59 = vld [vmem:[#allocation9] ss:$0 sm:$0xff] }
0x1409   :  { %v989_v26 = vmul.f32 %v2478_v55, %v988_v60 }
0x140a   :  { %v975_v63 = vadd.f32 %v2476_v54, %v974_v61 }
0x140b   :  { %v990_v1 = vadd.f32 %v2478_v55, %v989_v26 }
0x140c   :  { %v979_v3 = vsel %vm978_vm6, %v2476_v54, %v975_v63 }
0x140d   :  { %v984_v5 = vsel %vm981_vm9, %v983_v0, %v979_v3  ;;  %v994_v7 = vsel %vm993_vm11, %v2478_v55, %v990_v1  ;;  %v2399_v55 = vld [vmem:[#allocation7] ss:$0 sm:$0xff]  ;;  %v1065_v3 = vld [vmem:[#allocation12] sm:$0x1] }
0x140e   :  { %v985_v6 = vmul.f32 %v984_v5, %v3222_v12  ;;  %v999_v56 = vsel %vm996_vm7, %v998_v8, %v994_v7  ;;  %v1066_v5 = vmul.f32 0.35355338, %v1065_v3 }
0x140f   :  { %v1000_v9 = vmul.f32 %v999_v56, %v3224_v13 }
0x1410   :  { %v1001_v39 = vsel %vm301_vm2, %v985_v6, 0.0  ;;  %v1068_v8 = vperm.slane %v1066_v5, 0 }
0x1411   :  { %1002 = vadd.xlane.f32.xlu2 %v1001_v39  ;;  %v1004_v10 = vsel %vm301_vm2, %v1000_v9, 0.0  ;;  %v2402_v39 = vld [vmem:[#allocation13] ss:$0 sm:$0xff] }
0x1419   :  { %1005 = vadd.xlane.f32.xlu2 %v1004_v10 }
0x1484   :  { %v1003_v11 = vpop.xlane.xlu2 %1002 }
0x1485   :  { %v1007_v14 = vmul.f32 %v1003_v11, %v3232_v24 }
0x1487   :  { %v1009_v19 = vsub.f32 %v985_v6, %v1007_v14 }
0x1489   :  { %v1011_v15 = vmul.f32 %v1009_v19, %v1009_v19 }
0x148b   :  { %v1013_v16 = vsel %vm301_vm2, %v1011_v15, 0.0 }
0x148c   :  { %1014 = vadd.xlane.f32.xlu0 %v1013_v16  ;;  %v1006_v12 = vpop.xlane.xlu2 %1005 }
0x148d   :  { %v1008_v17 = vmul.f32 %v1006_v12, %v3232_v24 }
0x148f   :  { %v3243_v18 = vsub.f32 %v1000_v9, %v1008_v17 }
0x1491   :  { %v1012_v20 = vmul.f32 %v3243_v18, %v3243_v18 }
0x1493   :  { %v1016_v13 = vsel %vm301_vm2, %v1012_v20, 0.0 }
0x1494   :  { %1017 = vadd.xlane.f32.xlu1 %v1016_v13 }
0x14ff   :  { %v1015_v41 = vpop.xlane.xlu0 %1014 }
0x1500   :  { %v1019_v42 = vmul.f32 %v1015_v41, %v3232_v24 }
0x1502   :  { %v1021_v43 = vadd.f32 1e-05, %v1019_v42 }
0x1504   :  { %2479 = vrsqrt.f32 %v1021_v43  ;;  %vm1029_vm12 = vweird.f32 %v1021_v43 }
0x1507   :  { %v1018_v44 = vpop.xlane.xlu1 %1017 }
0x1508   :  { %v1020_v45 = vmul.f32 %v1018_v44, %v3232_v24 }
0x150a   :  { %v2480_v46 = vpop.eup %2479  ;;  %v1022_v47 = vadd.f32 1e-05, %v1020_v45 }
0x150b   :  { %v1024_v48 = vmul.f32 %v2480_v46, %v1021_v43  ;;  %vm1030_vm8 = vweird.f32 %v2480_v46 }
0x150c   :  { %2481 = vrsqrt.f32 %v1022_v47  ;;  %vm1031_vm13 = vmor %vm1029_vm12, %vm1030_vm8  ;;  %vm1039_vm15 = vweird.f32 %v1022_v47 }
0x150d   :  { %v1025_v49 = vmul.f32 %v2480_v46, %v1024_v48 }
0x150f   :  { %v1026_v50 = vmul.f32 0.5, %v1025_v49 }
0x1511   :  { %v1027_v51 = vsub.f32 1.5, %v1026_v50 }
0x1512   :  { %v2482_v52 = vpop.eup %2481 }
0x1513   :  { %v1028_v53 = vmul.f32 %v2480_v46, %v1027_v51  ;;  %v1034_v54 = vmul.f32 %v2482_v52, %v1022_v47  ;;  %vm1040_vm14 = vweird.f32 %v2482_v52 }
0x1514   :  { %vm1041_vm0 = vmor %vm1039_vm15, %vm1040_vm14 }
0x1515   :  { %v1032_v57 = vsel %vm1031_vm13, %v2480_v46, %v1028_v53  ;;  %v1035_v58 = vmul.f32 %v2482_v52, %v1034_v54 }
0x1516   :  { %v1043_v37 = vmul.f32 %v1032_v57, %v1009_v19 }
0x1517   :  { %v1036_v60 = vmul.f32 0.5, %v1035_v58 }
0x1518   :  { %v1049_v24 = vmul.f32 %v2399_v55, %v1043_v37 }
0x1519   :  { %v1037_v61 = vsub.f32 1.5, %v1036_v60 }
0x151a   :  { %v3286_v62 = vadd.f32 %v2400_v59, %v1049_v24 }
0x151b   :  { %v1038_v26 = vmul.f32 %v2482_v52, %v1037_v61 }
0x151c   :  { %2317 = vmatmul.msk.f32.vlgmr.msra.gmra.mxu2 %vm301_vm2, %v3286_v62  ;;  %2319 = vmatmul.msk.f32.vlgmr.msrb.gmra.mxu3 %vm301_vm2, %v3286_v62 }
0x151d   :  { %v1042_v63 = vsel %vm1041_vm0, %v2482_v52, %v1038_v26  ;;  %2321 = vmatmul.msk.f32.vlgmr.msrb.gmra.mxu1 %vm301_vm2, %v3286_v62 }
0x151e   :  { %v1044_v0 = vmul.f32 %v1042_v63, %v3243_v18 }
0x1520   :  { %v1050_v1 = vmul.f32 %v2399_v55, %v1044_v0 }
0x1522   :  { %v3295_v2 = vadd.f32 %v2400_v59, %v1050_v1 }
0x1524   :  { %2318 = vmatmul.msk.f32.gmra.mxu2 %vm301_vm2, %v3295_v2  ;;  %2320 = vmatmul.msk.f32.gmra.mxu3 %vm301_vm2, %v3295_v2 }
0x1525   :  { %2322 = vmatmul.msk.f32.gmra.mxu1 %vm301_vm2, %v3295_v2 }
0x159a   :  { %v1155_v6 = vpop.f32.mrf.mxu1 }
0x159b   :  { %v3306_v7 = vadd.f32 %v3303_v4, %v1155_v6 }
0x159d   :  { %1217 = vmatpush.msrb.mxu2 %v3306_v7 }
0x159f   :  { %v1093_v56 = vpop.f32.mrf.mxu2  ;;  %v1124_v9 = vpop.f32.mrf.mxu3 }
0x15a0   :  { %v1094_v10 = vadd.f32 %v1093_v56, %v1068_v8  ;;  %v1125_v11 = vadd.f32 %v2402_v39, %v1124_v9 }
0x15a2   :  { %1225 = vrot.lane.b32.xlu2 %v1125_v11, %s2870_s7  ;;  %2323 = vmatpush.xpose.msk.msrb.mxu0 %vm1161_vm1, %v1125_v11  ;;  %v3342_v36 = vpop.f32.mrf.mxu1 }
0x15a3   :  { %1223 = vrot.lane.b32.xlu0 %v1094_v10, %s2870_s7  ;;  %1297 = vrot.lane.b32.xlu1 %v1125_v11, %s2871_s8 }
0x15a5   :  { %2324 = vmatmul.msk.f32.vlgmr.msrb.gmra.mxu0 %vm1161_vm1, %v1094_v10 }
0x15a7   :  { %v1096_v14 = vpop.f32.mrf.mxu2  ;;  %v1127_v19 = vpop.f32.mrf.mxu3 }
0x15a8   :  { %v1097_v15 = vadd.f32 %v1096_v14, %v1068_v8  ;;  %v1128_v16 = vadd.f32 %v2402_v39, %v1127_v19 }
0x15aa   :  { %1295 = vrot.lane.b32.xlu2 %v1094_v10, %s2871_s8 }
0x15ab   :  { %1368 = vrot.lane.b32.xlu0 %v1125_v11, %s2872_s9  ;;  %1366 = vrot.lane.b32.xlu1 %v1094_v10, %s2872_s9 }
0x15b2   :  { %1498 = vrot.lane.b32.xlu2 %v1097_v15, %s2870_s7 }
0x15b3   :  { %1571 = vrot.lane.b32.xlu1 %v1128_v16, %s2871_s8  ;;  %1500 = vrot.lane.b32.xlu0 %v1128_v16, %s2870_s7 }
0x15ba   :  { %1569 = vrot.lane.b32.xlu2 %v1097_v15, %s2871_s8 }
0x15bb   :  { %1641 = vrot.lane.b32.xlu0 %v1128_v16, %s2872_s9  ;;  %1639 = vrot.lane.b32.xlu1 %v1097_v15, %s2872_s9 }
0x15fc   :  { %v1226_v12 = vpop.permute.xlu2 %1225 }
0x15fd   :  { %2326 = vmatpush.xpose.msk.msra.mxu3 %vm1161_vm1, %v1226_v12 }
0x1604   :  { %v1296_v17 = vpop.permute.xlu2 %1295 }
0x160c   :  { %v1499_v22 = vpop.permute.xlu2 %1498 }
0x1614   :  { %v1570_v29 = vpop.permute.xlu2 %1569 }
0x1615   :  { %v1224_v18 = vpop.permute.xlu0 %1223  ;;  %v1298_v20 = vpop.permute.xlu1 %1297 }
0x1616   :  { %2327 = vmatmul.msk.f32.vlgmr.msra.gmra.mxu3 %vm1161_vm1, %v1224_v18  ;;  %2329 = vmatpush.xpose.msk.msra.mxu1 %vm1161_vm1, %v1298_v20 }
0x1619   :  { %2330 = vmatmul.msk.f32.vlgmr.msra.gmra.mxu1 %vm1161_vm1, %v1296_v17 }
0x161a   :  { %2335 = vmatpush.xpose.msk.msrb.mxu1 %vm1161_vm1, %v1128_v16 }
0x161d   :  { %v1369_v13 = vpop.permute.xlu0 %1368  ;;  %v1367_v21 = vpop.permute.xlu1 %1366 }
0x161e   :  { %2332 = vmatpush.xpose.msk.msrb.mxu3 %vm1161_vm1, %v1369_v13 }
0x1621   :  { %2333 = vmatmul.msk.f32.vlgmr.msrb.gmra.mxu3 %vm1161_vm1, %v1367_v21  ;;  %2336 = vmatmul.msk.f32.vlgmr.msrb.gmra.mxu1 %vm1161_vm1, %v1097_v15 }
0x1622   :  { %v1185_v23 = vpop.f32.mrf.mxu0 }
0x1623   :  { %v1188_v25 = vsel %vm1161_vm1, %v1185_v23, -inf }
0x1624   :  { %1189 = vmax.xlane.f32.xlu0 %v1188_v25 }
0x1625   :  { %v1501_v27 = vpop.permute.xlu0 %1500  ;;  %v1572_v28 = vpop.permute.xlu1 %1571 }
0x1626   :  { %2338 = vmatpush.xpose.msk.msra.mxu3 %vm1161_vm1, %v1501_v27  ;;  %2341 = vmatpush.xpose.msk.msra.mxu1 %vm1161_vm1, %v1572_v28 }
0x1629   :  { %2339 = vmatmul.msk.f32.vlgmr.msra.gmra.mxu3 %vm1161_vm1, %v1499_v22  ;;  %2342 = vmatmul.msk.f32.vlgmr.msra.gmra.mxu1 %vm1161_vm1, %v1570_v29 }
0x162d   :  { %v1642_v31 = vpop.permute.xlu0 %1641  ;;  %v1640_v33 = vpop.permute.xlu1 %1639 }
0x162e   :  { %2344 = vmatpush.xpose.msk.msrb.mxu3 %vm1161_vm1, %v1642_v31 }
0x1631   :  { %2345 = vmatmul.msk.f32.vlgmr.msrb.gmra.mxu3 %vm1161_vm1, %v1640_v33  ;;  %v1159_v33 = vadd.f32 %v3303_v4, %v3342_v36 }
0x1632   :  { %1815 = vmatpush.msra.mxu3 %v1777_v30 }
0x1634   :  { %1816 = vmatpush.msra.mxu3 %v1773_v32 }
0x1636   :  { %1817 = vmatpush.msra.mxu3 %v1769_v34 }
0x1638   :  { %1818 = vmatpush.msra.mxu3 %v1765_v35 }
0x1639   :  { %2351 = vmatmul.msk.f32.vlgmr.msra.gmra.mxu3 %vm301_vm2, %v3286_v62 }
0x1641   :  { %2352 = vmatmul.msk.f32.gmra.mxu3 %vm301_vm2, %v3295_v2 }
0x1696   :  { %v1320_v38 = vpop.f32.mrf.mxu1 }
0x1697   :  { %v1190_v40 = vpop.xlane.xlu0 %1189  ;;  %v1323_v41 = vsel %vm1161_vm1, %v1320_v38, -inf }
0x1698   :  { %v1191_v42 = vsub.f32 %v1185_v23, %v1190_v40  ;;  %1324 = vmax.xlane.f32.xlu1 %v1323_v41 }
0x1699   :  { %v1248_v43 = vpop.f32.mrf.mxu3 }
0x169a   :  { %v1192_v44 = vmul.f32 1.442695, %v1191_v42  ;;  %v1251_v45 = vsel %vm1161_vm1, %v1248_v43, -inf }
0x169b   :  { %1252 = vmax.xlane.f32.xlu2 %v1251_v45 }
0x169c   :  { %2483 = vpow2.f32 %v1192_v44 }
0x169e   :  { %v1460_v46 = vpop.f32.mrf.mxu1 }
0x169f   :  { %v1463_v48 = vsel %vm1161_vm1, %v1460_v46, -inf }
0x16a2   :  { %v2484_v47 = vpop.eup %2483 }
0x16a3   :  { %1464 = vmax.xlane.f32.xlu2 %v1463_v48  ;;  %v1194_v49 = vsel %vm1161_vm1, %v2484_v47, 0.0 }
0x16a4   :  { %v1391_v50 = vpop.f32.mrf.mxu3  ;;  %1195 = vadd.xlane.f32.xlu1 %v1194_v49 }
0x16a5   :  { %v1394_v51 = vsel %vm1161_vm1, %v1391_v50, -inf }
0x16a6   :  { %1395 = vmax.xlane.f32.xlu0 %v1394_v51  ;;  %v1594_v52 = vpop.f32.mrf.mxu1 }
0x16a7   :  { %v1597_v55 = vsel %vm1161_vm1, %v1594_v52, -inf }
0x16ac   :  { %v1523_v53 = vpop.f32.mrf.mxu3 }
0x16ad   :  { %v1526_v54 = vsel %vm1161_vm1, %v1523_v53, -inf }
0x16ae   :  { %1527 = vmax.xlane.f32.xlu1 %v1526_v54  ;;  %1598 = vmax.xlane.f32.xlu0 %v1597_v55 }
0x16b4   :  { %v1664_v57 = vpop.f32.mrf.mxu3 }
0x16b5   :  { %v1667_v58 = vsel %vm1161_vm1, %v1664_v57, -inf }
0x16b6   :  { %1668 = vmax.xlane.f32.xlu2 %v1667_v58 }
0x170b   :  { %v1325_v59 = vpop.xlane.xlu1 %1324 }
0x170c   :  { %v1326_v37 = vsub.f32 %v1320_v38, %v1325_v59 }
0x170e   :  { %v1327_v60 = vmul.f32 1.442695, %v1326_v37  ;;  %v1253_v24 = vpop.xlane.xlu2 %1252 }
0x170f   :  { %v1254_v61 = vsub.f32 %v1248_v43, %v1253_v24  ;;  %v1772_v24 = vld [vmem:[#allocation18 + $0xc0] sm:$0xff] }
0x1710   :  { %2485 = vpow2.f32 %v1327_v60  ;;  %v1776_v60 = vld [vmem:[#allocation18 + $0xe0] sm:$0xff] }
0x1711   :  { %v1255_v26 = vmul.f32 1.442695, %v1254_v61  ;;  %v1768_v61 = vld [vmem:[#allocation18 + $0xa0] sm:$0xff] }
0x1713   :  { %2487 = vpow2.f32 %v1255_v26 }
0x1716   :  { %v3352_v63 = vpop.eup %2485  ;;  %v1465_v0 = vpop.xlane.xlu2 %1464 }
0x1717   :  { %v1466_v1 = vsub.f32 %v1460_v46, %v1465_v0  ;;  %v1196_v3 = vpop.xlane.xlu1 %1195  ;;  %v1329_v5 = vsel %vm1161_vm1, %v3352_v63, 0.0 }
0x1718   :  { %2489 = vrcp.f32 %v1196_v3  ;;  %1330 = vadd.xlane.f32.xlu2 %v1329_v5  ;;  %v1778_v3 = vld [vmem:[#allocation18 + $0xf0] sm:$0xff] }
0x1719   :  { %v2488_v6 = vpop.eup %2487  ;;  %v1467_v8 = vmul.f32 1.442695, %v1466_v1  ;;  %v1396_v39 = vpop.xlane.xlu0 %1395  ;;  %v1774_v5 = vld [vmem:[#allocation18 + $0xd0] sm:$0xff] }
0x171a   :  { %v1397_v56 = vsub.f32 %v1391_v50, %v1396_v39  ;;  %v1257_v9 = vsel %vm1161_vm1, %v2488_v6, 0.0 }
0x171b   :  { %2491 = vpow2.f32 %v1467_v8  ;;  %1258 = vadd.xlane.f32.xlu0 %v1257_v9  ;;  %v1766_v8 = vld [vmem:[#allocation18 + $0x90] sm:$0xff] }
0x171c   :  { %v1398_v10 = vmul.f32 1.442695, %v1397_v56 }
0x171e   :  { %v2490_v11 = vpop.eup %2489  ;;  %2493 = vpow2.f32 %v1398_v10 }
0x171f   :  { %v1198_v14 = vmul.f32 %v2490_v11, %v2484_v47 }
0x1721   :  { %v2492_v19 = vpop.eup %2491  ;;  %2325 = vmatmul.msk.f32.vlgmr.msrb.gmra.mxu2 %vm1161_vm1, %v1198_v14  ;;  %v1599_v17 = vpop.xlane.xlu0 %1598 }
0x1722   :  { %v1469_v15 = vsel %vm1161_vm1, %v2492_v19, 0.0  ;;  %v1600_v18 = vsub.f32 %v1594_v52, %v1599_v17  ;;  %v1528_v13 = vpop.xlane.xlu1 %1527  ;;  %v1711_v17 = vld [vmem:[#allocation10] sm:$0xff] }
0x1723   :  { %1470 = vadd.xlane.f32.xlu2 %v1469_v15  ;;  %v1529_v21 = vsub.f32 %v1523_v53, %v1528_v13  ;;  %v1714_v15 = vld [vmem:[#allocation10 + $0x18] sm:$0xff] }
0x1724   :  { %v2494_v16 = vpop.eup %2493  ;;  %v1601_v20 = vmul.f32 1.442695, %v1600_v18  ;;  %1737 = vmatpush.msrb.mxu1 %v1714_v15 }
0x1725   :  { %v1400_v12 = vsel %vm1161_vm1, %v2494_v16, 0.0  ;;  %v1530_v25 = vmul.f32 1.442695, %v1529_v21 }
0x1726   :  { %1401 = vadd.xlane.f32.xlu1 %v1400_v12  ;;  %2495 = vpow2.f32 %v1601_v20  ;;  %v1712_v12 = vld [vmem:[#allocation10 + $0x8] sm:$0xff] }
0x1727   :  { %2497 = vpow2.f32 %v1530_v25  ;;  %v1775_v25 = vld [vmem:[#allocation18 + $0xd8] sm:$0xff] }
0x1729   :  { %v1669_v22 = vpop.xlane.xlu2 %1668 }
0x172a   :  { %v1670_v27 = vsub.f32 %v1664_v57, %v1669_v22 }
0x172c   :  { %v2496_v23 = vpop.eup %2495  ;;  %v1671_v29 = vmul.f32 1.442695, %v1670_v27  ;;  %v1771_v27 = vld [vmem:[#allocation18 + $0xb8] sm:$0xff] }
0x172d   :  { %v1603_v28 = vsel %vm1161_vm1, %v2496_v23, 0.0  ;;  %v2498_v30 = vpop.eup %2497 }
0x172e   :  { %2499 = vpow2.f32 %v1671_v29  ;;  %v1532_v31 = vsel %vm1161_vm1, %v2498_v30, 0.0  ;;  %v1760_v29 = vld [vmem:[#allocation18 + $0x60] sm:$0xff] }
0x172f   :  { %1263 = vrot.lane.b32.xlu0 %v3306_v7, %s2870_s7 }
0x173b   :  { %1405 = vrot.lane.b32.xlu2 %v3306_v7, %s2872_s9 }
0x173f   :  { %1334 = vrot.lane.b32.xlu1 %v3306_v7, %s2871_s8  ;;  %v2500_v7 = vpop.eup %2499 }
0x1740   :  { %v1673_v32 = vsel %vm1161_vm1, %v2500_v7, 0.0 }
0x1759   :  { %1604 = vadd.xlane.f32.xlu0 %v1603_v28  ;;  %v1767_v28 = vld [vmem:[#allocation18 + $0x98] sm:$0xff] }
0x1764   :  { %1533 = vadd.xlane.f32.xlu2 %v1532_v31  ;;  %v1762_v31 = vld [vmem:[#allocation18 + $0x70] sm:$0xff] }
0x1769   :  { %1674 = vadd.xlane.f32.xlu1 %v1673_v32  ;;  %v1756_v32 = vld [vmem:[#allocation18 + $0x40] sm:$0xff] }
0x177c   :  { %1538 = vrot.lane.b32.xlu2 %v1159_v33, %s2870_s7 }
0x1784   :  { %1608 = vrot.lane.b32.xlu2 %v1159_v33, %s2871_s8 }
0x178b   :  { %v1331_v34 = vpop.xlane.xlu2 %1330 }
0x178c   :  { %1678 = vrot.lane.b32.xlu2 %v1159_v33, %s2872_s9 }
0x178e   :  { %v1259_v35 = vpop.xlane.xlu0 %1258 }
0x178f   :  { %2501 = vrcp.f32 %v1259_v35  ;;  %v1759_v35 = vld [vmem:[#allocation18 + $0x58] sm:$0xff] }
0x1795   :  { %v2502_v41 = vpop.eup %2501 }
0x1796   :  { %v1471_v38 = vpop.xlane.xlu2 %1470  ;;  %v1261_v42 = vmul.f32 %v2502_v41, %v2488_v6  ;;  %v1770_v6 = vld [vmem:[#allocation18 + $0xb0] sm:$0xff] }
0x1799   :  { %v1402_v40 = vpop.xlane.xlu1 %1401 }
0x179a   :  { %2503 = vrcp.f32 %v1402_v40 }
0x179b   :  { %2505 = vrcp.f32 %v1331_v34  ;;  %v1758_v34 = vld [vmem:[#allocation18 + $0x50] sm:$0xff] }
0x179c   :  { %2507 = vrcp.f32 %v1471_v38 }
0x179e   :  { %v1406_v44 = vpop.permute.xlu2 %1405 }
0x17a0   :  { %v2504_v36 = vpop.eup %2503 }
0x17a1   :  { %v1264_v43 = vpop.permute.xlu0 %1263  ;;  %v1404_v45 = vmul.f32 %v2504_v36, %v2494_v16  ;;  %v2506_v46 = vpop.eup %2505  ;;  %v1713_v16 = vld [vmem:[#allocation10 + $0x10] sm:$0xff]  ;;  %v1748_v36 = vld [vmem:[#allocation18] sm:$0xff] }
0x17a2   :  { %1284 = vmatpush.msra.mxu0 %v1264_v43  ;;  %v1333_v47 = vmul.f32 %v2506_v46, %v3352_v63  ;;  %v2508_v49 = vpop.eup %2507  ;;  %v1764_v63 = vld [vmem:[#allocation18 + $0x80] sm:$0xff]  ;;  %1738 = vmatpush.msrb.mxu1 %v1713_v16  ;;  %v1753_v43 = vld [vmem:[#allocation18 + $0x28] sm:$0xff]  ;;  %v1750_v46 = vld [vmem:[#allocation18 + $0x10] sm:$0xff] }
0x17a3   :  { %2328 = vmatmul.msk.f32.vlgmr.msra.gmra.mxu0 %vm1161_vm1, %v1261_v42  ;;  %v1473_v50 = vmul.f32 %v2508_v49, %v2492_v19  ;;  %v1752_v42 = vld [vmem:[#allocation18 + $0x20] sm:$0xff] }
0x17a4   :  { %1426 = vmatpush.msrb.mxu0 %v1406_v44  ;;  %v1219_v4 = vpop.f32.mrf.mxu2  ;;  %1739 = vmatpush.msrb.mxu1 %v1712_v12  ;;  %v1754_v44 = vld [vmem:[#allocation18 + $0x30] sm:$0xff] }
0x17a5   :  { %1222 = vst.msk [vmem:[#allocation3] sm:$0xff] %vm1161_vm1, %v1219_v4  ;;  %v1755_v4 = vld [vmem:[#allocation18 + $0x38] sm:$0xff] }
0x17a6   :  { %1740 = vmatpush.msrb.mxu1 %v1711_v17 }
0x17ab   :  { %2334 = vmatmul.msk.f32.vlgmr.msrb.gmra.mxu0 %vm1161_vm1, %v1404_v45  ;;  %v1749_v45 = vld [vmem:[#allocation18 + $0x8] sm:$0xff] }
0x17b1   :  { %v1335_v48 = vpop.permute.xlu1 %1334 }
0x17b2   :  { %1355 = vmatpush.msra.mxu2 %v1335_v48 }
0x17b3   :  { %2331 = vmatmul.msk.f32.vlgmr.msra.gmra.mxu2 %vm1161_vm1, %v1333_v47  ;;  %v1751_v47 = vld [vmem:[#allocation18 + $0x18] sm:$0xff] }
0x17b4   :  { %1492 = vmatpush.msrb.mxu2 %v1159_v33  ;;  %v1757_v33 = vld [vmem:[#allocation18 + $0x48] sm:$0xff] }
0x17bb   :  { %2337 = vmatmul.msk.f32.vlgmr.msrb.gmra.mxu2 %vm1161_vm1, %v1473_v50 }
0x17cc   :  { %v1605_v52 = vpop.xlane.xlu0 %1604 }
0x17d7   :  { %v1534_v51 = vpop.xlane.xlu2 %1533 }
0x17d8   :  { %2509 = vrcp.f32 %v1534_v51 }
0x17d9   :  { %2511 = vrcp.f32 %v1605_v52 }
0x17dc   :  { %v1675_v57 = vpop.xlane.xlu1 %1674 }
0x17dd   :  { %2513 = vrcp.f32 %v1675_v57 }
0x17de   :  { %v2510_v53 = vpop.eup %2509 }
0x17df   :  { %v1536_v54 = vmul.f32 %v2510_v53, %v2498_v30  ;;  %v1539_v55 = vpop.permute.xlu2 %1538  ;;  %v2512_v58 = vpop.eup %2511  ;;  %v1761_v30 = vld [vmem:[#allocation18 + $0x68] sm:$0xff] }
0x17e0   :  { %1559 = vmatpush.msra.mxu0 %v1539_v55  ;;  %v1607_v59 = vmul.f32 %v2512_v58, %v2496_v23  ;;  %v1779_v23 = vld [vmem:[#allocation18 + $0xf8] sm:$0xff]  ;;  %1913 = vmatpush.msrb.mxu3 %v1761_v30  ;;  %v1820_v53 = vpop.f32.mrf.mxu3 }
0x17e1   :  { %2340 = vmatmul.msk.f32.vlgmr.msra.gmra.mxu0 %vm1161_vm1, %v1536_v54  ;;  %1861 = vmatpush.msra.mxu1 %v1779_v23 }
0x17e2   :  { %1914 = vmatpush.msrb.mxu3 %v1757_v33 }
0x17e3   :  { %v2514_v26 = vpop.eup %2513  ;;  %1862 = vmatpush.msra.mxu1 %v1775_v25 }
0x17e4   :  { %v1677_v0 = vmul.f32 %v2514_v26, %v2500_v7  ;;  %v1763_v7 = vld [vmem:[#allocation18 + $0x78] sm:$0xff]  ;;  %1915 = vmatpush.msrb.mxu3 %v1753_v43 }
0x17e5   :  { %1863 = vmatpush.msra.mxu1 %v1771_v27 }
0x17e6   :  { %1916 = vmatpush.msrb.mxu3 %v1749_v45 }
0x17e7   :  { %v1609_v37 = vpop.permute.xlu2 %1608  ;;  %1864 = vmatpush.msra.mxu1 %v1767_v28 }
0x17e8   :  { %1629 = vmatpush.msra.mxu2 %v1609_v37  ;;  %v1823_v58 = vpop.f32.mrf.mxu3 }
0x17e9   :  { %2343 = vmatmul.msk.f32.vlgmr.msra.gmra.mxu2 %vm1161_vm1, %v1607_v59 }
0x17ea   :  { %1792 = vmatpush.msrb.mxu2 %v1776_v60  ;;  %v1970_v60 = vld [vmem:[%s3486_s16] sm:$0xf] }
0x17eb   :  { %v1974_v26 = vperm.slane %v1970_v60, 2 }
0x17ec   :  { %1793 = vmatpush.msrb.mxu2 %v1772_v24 }
0x17ee   :  { %1794 = vmatpush.msrb.mxu2 %v1768_v61 }
0x17ef   :  { %v1679_v1 = vpop.permute.xlu2 %1678 }
0x17f0   :  { %1699 = vmatpush.msrb.mxu0 %v1679_v1  ;;  %1795 = vmatpush.msrb.mxu2 %v1764_v63  ;;  %v1972_v63 = vperm.slane %v1970_v60, 0 }
0x17f1   :  { %2346 = vmatmul.msk.f32.vlgmr.msrb.gmra.mxu0 %vm1161_vm1, %v1677_v0  ;;  %2349 = vmatmul.msk.f32.vlgmr.msrb.gmra.mxu2 %vm301_vm2, %v3286_v62  ;;  %v1973_v0 = vperm.slane %v1970_v60, 1 }
0x17f2   :  { %1838 = vmatpush.msra.mxu0 %v1778_v3  ;;  %1890 = vmatpush.msra.mxu2 %v1760_v29 }
0x17f4   :  { %1839 = vmatpush.msra.mxu0 %v1774_v5  ;;  %1891 = vmatpush.msra.mxu2 %v1756_v32 }
0x17f6   :  { %1840 = vmatpush.msra.mxu0 %v1770_v6  ;;  %1892 = vmatpush.msra.mxu2 %v1752_v42  ;;  %v1975_v6 = vperm.slane %v1970_v60, 3  ;;  %v2875_v42 = vmov 512.0   ;;  %v2156_v60 = vld [vmem:[#allocation21 + $0x178] sm:$0xff] }
0x17f7   :  { %2515 = vrcp.f32 %v2875_v42  ;;  %v2165_v42 = vld [vmem:[#allocation21 + $0x1c0] sm:$0xff] }
0x17f8   :  { %1841 = vmatpush.msra.mxu0 %v1766_v8  ;;  %1893 = vmatpush.msra.mxu2 %v1748_v36 }
0x17f9   :  { %2350 = vmatmul.msk.f32.gmra.mxu2 %vm301_vm2, %v3295_v2  ;;  %2353 = vmatmul.msk.f32.vlgmr.msra.gmra.mxu0 %vm301_vm2, %v3286_v62 }
0x17fa   :  { %1936 = vmatpush.msrb.mxu0 %v1762_v31 }
0x17fc   :  { %1937 = vmatpush.msrb.mxu0 %v1758_v34 }
0x17fd   :  { %v2516_v43 = vpop.eup %2515 }
0x17fe   :  { %1938 = vmatpush.msrb.mxu0 %v1754_v44  ;;  %v2007_v44 = vmul.f32 512.0, %v2516_v43 }
0x1800   :  { %1939 = vmatpush.msrb.mxu0 %v1750_v46 }
0x1801   :  { %2354 = vmatmul.msk.f32.gmra.mxu0 %vm301_vm2, %v3295_v2 }
0x1802   :  { %2223 = vmatpush.msra.mxu0 %v2156_v60  ;;  %v2112_v60 = vld [vmem:[#allocation21 + $0x18] sm:$0xff] }
0x1820   :  { %v1286_v39 = vpop.f32.mrf.mxu0 }
0x1821   :  { %1290 = vrot.lane.b32.xlu0 %v1286_v39, %s2852_s23 }
0x1828   :  { %v1428_v56 = vpop.f32.mrf.mxu0 }
0x1829   :  { %1432 = vrot.lane.b32.xlu1 %v1428_v56, %s2873_s18 }
0x1836   :  { %v1357_v9 = vpop.f32.mrf.mxu2 }
0x1837   :  { %1361 = vrot.lane.b32.xlu2 %v1357_v9, %s2874_s3 }
0x183e   :  { %v1494_v10 = vpop.f32.mrf.mxu2 }
0x183f   :  { %1497 = vst.msk [vmem:[#allocation3 + $0x8] sm:$0xff] %vm1161_vm1, %v1494_v10 }
0x185e   :  { %v1561_v11 = vpop.f32.mrf.mxu0 }
0x185f   :  { %1565 = vrot.lane.b32.xlu2 %v1561_v11, %s2852_s23 }
0x186c   :  { %v1631_v14 = vpop.f32.mrf.mxu2 }
0x186d   :  { %1635 = vrot.lane.b32.xlu0 %v1631_v14, %s2874_s3 }
0x186e   :  { %v1701_v19 = vpop.f32.mrf.mxu0 }
0x186f   :  { %1705 = vrot.lane.b32.xlu2 %v1701_v19, %s2873_s18 }
0x1874   :  { %v1797_v54 = vpop.f32.mrf.mxu2 }
0x1876   :  { %v1843_v51 = vpop.f32.mrf.mxu0 }
0x187c   :  { %v1800_v59 = vpop.f32.mrf.mxu2 }
0x187e   :  { %v1846_v55 = vpop.f32.mrf.mxu0 }
0x1891   :  { %v1362_v20 = vpop.permute.xlu2 %1361 }
0x1893   :  { %v1291_v18 = vpop.permute.xlu0 %1290 }
0x1894   :  { %1294 = vst.msk [vmem:[#allocation3] sm:$0xff] %vm1293_vm3, %v1291_v18 }
0x1895   :  { %1365 = vst.msk [vmem:[#allocation3] sm:$0xff] %vm1364_vm4, %v1362_v20 }
0x189b   :  { %v1433_v13 = vpop.permute.xlu1 %1432 }
0x189c   :  { %1436 = vst.msk [vmem:[#allocation3] sm:$0xff] %vm1435_vm5, %v1433_v13 }
0x18a3   :  { %v1709_v21 = vld [vmem:[#allocation3] sm:$0xff] }
0x18a4   :  { %2347 = vmatmul.msk.f32.vlgmr.msrb.gmra.mxu1 %vm301_vm2, %v1709_v21 }
0x18a5   :  { %1959 = vmatpush.msrb.mxu1 %v1763_v7 }
0x18a7   :  { %1960 = vmatpush.msrb.mxu1 %v1759_v35 }
0x18a9   :  { %1961 = vmatpush.msrb.mxu1 %v1755_v4  ;;  %v2008_v4 = vsub.f32 1.0, %v2007_v44  ;;  %v2132_v44 = vld [vmem:[#allocation21 + $0xb8] sm:$0xff] }
0x18ab   :  { %1962 = vmatpush.msrb.mxu1 %v1751_v47  ;;  %v2009_v36 = vmul.f32 %v2516_v43, %v2008_v4  ;;  %v2148_v4 = vld [vmem:[#allocation21 + $0x138] sm:$0xff] }
0x18ad   :  { %v2010_v45 = vadd.f32 %v2516_v43, %v2009_v36  ;;  %v2164_v36 = vld [vmem:[#allocation21 + $0x1b8] sm:$0xff] }
0x18b9   :  { %v1566_v22 = vpop.permute.xlu2 %1565 }
0x18ba   :  { %1568 = vst.msk [vmem:[#allocation3 + $0x8] sm:$0xff] %vm1293_vm3, %v1566_v22 }
0x18c9   :  { %v1706_v40 = vpop.permute.xlu2 %1705 }
0x18df   :  { %v1636_v38 = vpop.permute.xlu0 %1635 }
0x18e0   :  { %1638 = vst.msk [vmem:[#allocation3 + $0x8] sm:$0xff] %vm1364_vm4, %v1636_v38 }
0x18e1   :  { %1708 = vst.msk [vmem:[#allocation3 + $0x8] sm:$0xff] %vm1435_vm5, %v1706_v40 }
0x18e8   :  { %v1710_v41 = vld [vmem:[#allocation3 + $0x8] sm:$0xff] }
0x18e9   :  { %2348 = vmatmul.msk.f32.gmra.mxu1 %vm301_vm2, %v1710_v41 }
0x18f1   :  { %2355 = vmatmul.msk.f32.vlgmr.msra.gmra.mxu1 %vm301_vm2, %v3286_v62  ;;  %v2403_v62 = vld [vmem:[#allocation16] ss:$0 sm:$0xff] }
0x18f9   :  { %2356 = vmatmul.msk.f32.gmra.mxu1 %vm301_vm2, %v3295_v2 }
0x1921   :  { %v1742_v48 = vpop.f32.mrf.mxu1 }
0x1922   :  { %v1743_v49 = vadd.f32 %v2403_v62, %v1742_v48 }
0x1924   :  { %2357 = vmatmul.msk.f32.vlgmr.msra.gmra.mxu2 %vm301_vm2, %v1743_v49  ;;  %2359 = vmatmul.msk.f32.vlgmr.msrb.gmra.mxu3 %vm301_vm2, %v1743_v49 }
0x1925   :  { %2361 = vmatmul.msk.f32.vlgmr.msrb.gmra.mxu0 %vm301_vm2, %v1743_v49  ;;  %2363 = vmatmul.msk.f32.vlgmr.msrb.gmra.mxu1 %vm301_vm2, %v1743_v49 }
0x1966   :  { %v1745_v2 = vpop.f32.mrf.mxu1 }
0x1967   :  { %v1746_v50 = vadd.f32 %v2403_v62, %v1745_v2 }
0x1969   :  { %2358 = vmatmul.msk.f32.gmra.mxu2 %vm301_vm2, %v1746_v50  ;;  %2360 = vmatmul.msk.f32.gmra.mxu3 %vm301_vm2, %v1746_v50 }
0x196a   :  { %2362 = vmatmul.msk.f32.gmra.mxu0 %vm301_vm2, %v1746_v50  ;;  %2364 = vmatmul.msk.f32.gmra.mxu1 %vm301_vm2, %v1746_v50  ;;  %vm2011_vm2 = vweird.f32 %v2516_v43 }
0x196b   :  { %v3415_v46 = vsel %vm2011_vm2, %v2516_v43, %v2010_v45  ;;  %v2116_v43 = vld [vmem:[#allocation21 + $0x38] sm:$0xff]  ;;  %v2115_v45 = vld [vmem:[#allocation21 + $0x30] sm:$0xff] }
0x196e   :  { %v1866_v52 = vpop.f32.mrf.mxu1 }
0x1976   :  { %v1869_v57 = vpop.f32.mrf.mxu1 }
0x19a2   :  { %v1941_v37 = vpop.f32.mrf.mxu0  ;;  %v1964_v24 = vpop.f32.mrf.mxu1 }
0x19a3   :  { %v1942_v61 = vadd.f32 %v1941_v37, %v1843_v51  ;;  %v1965_v5 = vadd.f32 %v1964_v24, %v1866_v52  ;;  %v2140_v37 = vld [vmem:[#allocation21 + $0xf8] sm:$0xff] }
0x19a4   :  { %2200 = vmatpush.msra.mxu3 %v2140_v37  ;;  %v2172_v24 = vld [vmem:[#allocation21 + $0x1f8] sm:$0xff]  ;;  %v2161_v37 = vld [vmem:[#allocation21 + $0x1a0] sm:$0xff] }
0x19a5   :  { %v1982_v56 = vadd.f32 %v1974_v26, %v1942_v61  ;;  %v1983_v11 = vadd.f32 %v1975_v6, %v1965_v5  ;;  %v2123_v61 = vld [vmem:[#allocation21 + $0x70] sm:$0xff]  ;;  %2246 = vmatpush.msra.mxu1 %v2172_v24  ;;  %v2128_v24 = vld [vmem:[#allocation21 + $0x98] sm:$0xff] }
0x19a7   :  { %v1895_v1 = vpop.f32.mrf.mxu2  ;;  %v1918_v3 = vpop.f32.mrf.mxu3  ;;  %v1990_v15 = vmax.f32 %v1982_v56, 0.0  ;;  %v1991_v12 = vmax.f32 %v1983_v11, 0.0 }
0x19a8   :  { %v1896_v8 = vadd.f32 %v1895_v1, %v1797_v54  ;;  %v1919_v39 = vadd.f32 %v1918_v3, %v1820_v53 }
0x19aa   :  { %v1980_v9 = vadd.f32 %v1972_v63, %v1896_v8  ;;  %v1981_v10 = vadd.f32 %v1973_v0, %v1919_v39 }
0x19ac   :  { %v1988_v14 = vmax.f32 %v1980_v9, 0.0  ;;  %v1989_v19 = vmax.f32 %v1981_v10, 0.0 }
0x19ae   :  { %v1996_v16 = vadd.f32 %v1989_v19, %v1988_v14 }
0x19b0   :  { %v1997_v17 = vadd.f32 %v1996_v16, %v1990_v15  ;;  %v2122_v16 = vld [vmem:[#allocation21 + $0x68] sm:$0xff] }
0x19b2   :  { %v1998_v18 = vadd.f32 %v1997_v17, %v1991_v12  ;;  %v2154_v17 = vld [vmem:[#allocation21 + $0x168] sm:$0xff] }
0x19b4   :  { %1999 = vadd.xlane.f32.xlu0 %v1998_v18  ;;  %v2170_v18 = vld [vmem:[#allocation21 + $0x1e8] sm:$0xff] }
0x19e7   :  { %v1944_v20 = vpop.f32.mrf.mxu0  ;;  %v1967_v13 = vpop.f32.mrf.mxu1 }
0x19e8   :  { %v1945_v21 = vadd.f32 %v1944_v20, %v1846_v55  ;;  %v1968_v25 = vadd.f32 %v1967_v13, %v1869_v57  ;;  %v2121_v20 = vld [vmem:[#allocation21 + $0x60] sm:$0xff] }
0x19e9   :  { %v2137_v13 = vld [vmem:[#allocation21 + $0xe0] sm:$0xff] }
0x19ea   :  { %v1986_v29 = vadd.f32 %v1974_v26, %v1945_v21  ;;  %v1987_v7 = vadd.f32 %v1975_v6, %v1968_v25  ;;  %v2139_v26 = vld [vmem:[#allocation21 + $0xf0] sm:$0xff]  ;;  %v2153_v21 = vld [vmem:[#allocation21 + $0x160] sm:$0xff]  ;;  %v2136_v25 = vld [vmem:[#allocation21 + $0xd8] sm:$0xff] }
0x19eb   :  { %2201 = vmatpush.msra.mxu3 %v2139_v26  ;;  %v2160_v26 = vld [vmem:[#allocation21 + $0x198] sm:$0xff] }
0x19ec   :  { %v1898_v22 = vpop.f32.mrf.mxu2  ;;  %v1921_v23 = vpop.f32.mrf.mxu3  ;;  %v1994_v34 = vmax.f32 %v1986_v29, 0.0  ;;  %v1995_v38 = vmax.f32 %v1987_v7, 0.0  ;;  %v2119_v29 = vld [vmem:[#allocation21 + $0x50] sm:$0xff] }
0x19ed   :  { %v1899_v27 = vadd.f32 %v1898_v22, %v1800_v59  ;;  %v1922_v28 = vadd.f32 %v1921_v23, %v1823_v58  ;;  %v2124_v59 = vld [vmem:[#allocation21 + $0x78] sm:$0xff]  ;;  %v2169_v22 = vld [vmem:[#allocation21 + $0x1e0] sm:$0xff]  ;;  %v2167_v7 = vld [vmem:[#allocation21 + $0x1d0] sm:$0xff] }
0x19ee   :  { %2177 = vmatpush.msrb.mxu2 %v2124_v59  ;;  %v2120_v23 = vld [vmem:[#allocation21 + $0x58] sm:$0xff]  ;;  %v2145_v59 = vld [vmem:[#allocation21 + $0x120] sm:$0xff] }
0x19ef   :  { %v1984_v30 = vadd.f32 %v1972_v63, %v1899_v27  ;;  %v1985_v31 = vadd.f32 %v1973_v0, %v1922_v28  ;;  %v2155_v63 = vld [vmem:[#allocation21 + $0x170] sm:$0xff]  ;;  %v2152_v27 = vld [vmem:[#allocation21 + $0x158] sm:$0xff] }
0x19f0   :  { %v2171_v0 = vld [vmem:[#allocation21 + $0x1f0] sm:$0xff]  ;;  %2178 = vmatpush.msrb.mxu2 %v2123_v61  ;;  %2224 = vmatpush.msra.mxu0 %v2155_v63  ;;  %v2168_v28 = vld [vmem:[#allocation21 + $0x1d8] sm:$0xff] }
0x19f1   :  { %v1992_v32 = vmax.f32 %v1984_v30, 0.0  ;;  %v1993_v33 = vmax.f32 %v1985_v31, 0.0  ;;  %2247 = vmatpush.msra.mxu1 %v2171_v0  ;;  %v2135_v30 = vld [vmem:[#allocation21 + $0xd0] sm:$0xff]  ;;  %v2144_v61 = vld [vmem:[#allocation21 + $0x118] sm:$0xff] }
0x19f2   :  { %2179 = vmatpush.msrb.mxu2 %v2122_v16  ;;  %2225 = vmatpush.msra.mxu0 %v2154_v17  ;;  %v2151_v31 = vld [vmem:[#allocation21 + $0x150] sm:$0xff]  ;;  %v2157_v16 = vld [vmem:[#allocation21 + $0x180] sm:$0xff] }
0x19f3   :  { %v2001_v35 = vadd.f32 %v1993_v33, %v1992_v32  ;;  %2248 = vmatpush.msra.mxu1 %v2170_v18  ;;  %v2111_v63 = vld [vmem:[#allocation21 + $0x10] sm:$0xff] }
0x19f4   :  { %2180 = vmatpush.msrb.mxu2 %v2121_v20  ;;  %2226 = vmatpush.msra.mxu0 %v2153_v21  ;;  %v2127_v0 = vld [vmem:[#allocation21 + $0x90] sm:$0xff] }
0x19f5   :  { %v2002_v40 = vadd.f32 %v2001_v35, %v1994_v34  ;;  %2249 = vmatpush.msra.mxu1 %v2169_v22  ;;  %v2166_v35 = vld [vmem:[#allocation21 + $0x1c8] sm:$0xff] }
0x19f6   :  { %2181 = vmatpush.msrb.mxu2 %v2120_v23  ;;  %2227 = vmatpush.msra.mxu0 %v2152_v27  ;;  %v2073_v23 = vld [vmem:[%s3487_s17] sm:$0xf]  ;;  %v2091_v27 = vld [vmem:[#allocation19] sm:$0xf]  ;;  %s2876_s17 = smov [#allocation24]  }
0x19f7   :  { %v2003_v41 = vadd.f32 %v2002_v40, %v1995_v38  ;;  %2250 = vmatpush.msra.mxu1 %v2168_v28  ;;  %v2133_v40 = vld [vmem:[#allocation21 + $0xc0] sm:$0xff]  ;;  %s2275_s0 = sshll.u32 %s2876_s17, 4  ;;  %s2276_s0 = int_to_ptr.vmem [resolvable:$true] %s2275_s0 }
0x19f8   :  { %2182 = vmatpush.msrb.mxu2 %v2119_v29  ;;  %2228 = vmatpush.msra.mxu0 %v2151_v31  ;;  %v2075_v29 = vperm.slane %v2073_v23, 0  ;;  %v2076_v31 = vperm.slane %v2073_v23, 1 }
0x19f9   :  { %2004 = vadd.xlane.f32.xlu2 %v2003_v41  ;;  %2251 = vmatpush.msra.mxu1 %v2167_v7  ;;  %v2149_v41 = vld [vmem:[#allocation21 + $0x140] sm:$0xff]  ;;  %v2077_v7 = vperm.slane %v2073_v23, 2 }
0x19fb   :  { %2252 = vmatpush.msra.mxu1 %v2166_v35  ;;  %v2095_v35 = vperm.slane %v2091_v27, 2 }
0x19fd   :  { %2253 = vmatpush.msra.mxu1 %v2165_v42 }
0x19ff   :  { %2254 = vmatpush.msra.mxu1 %v2164_v36 }
0x1a27   :  { %v2000_v47 = vpop.xlane.xlu0 %1999 }
0x1a28   :  { %v2013_v62 = vmul.f32 %v3415_v46, %v2000_v47  ;;  %v2131_v47 = vld [vmem:[#allocation21 + $0xb0] sm:$0xff] }
0x1a2a   :  { %v3418_v48 = vsub.f32 %v1988_v14, %v2013_v62  ;;  %v3420_v49 = vsub.f32 %v1989_v19, %v2013_v62  ;;  %v3422_v2 = vsub.f32 %v1990_v15, %v2013_v62  ;;  %v3424_v50 = vsub.f32 %v1991_v12, %v2013_v62  ;;  %v2138_v12 = vld [vmem:[#allocation21 + $0xe8] sm:$0xff]  ;;  %v2147_v62 = vld [vmem:[#allocation21 + $0x130] sm:$0xff] }
0x1a2b   :  { %2202 = vmatpush.msra.mxu3 %v2138_v12 }
0x1a2c   :  { %v2023_v51 = vmul.f32 %v3418_v48, %v3418_v48  ;;  %v2024_v52 = vmul.f32 %v3420_v49, %v3420_v49  ;;  %v2025_v53 = vmul.f32 %v3422_v2, %v3422_v2  ;;  %v2026_v55 = vmul.f32 %v3424_v50, %v3424_v50 }
0x1a2d   :  { %2203 = vmatpush.msra.mxu3 %v2137_v13 }
0x1a2e   :  { %v2031_v54 = vadd.f32 %v2024_v52, %v2023_v51  ;;  %v2163_v51 = vld [vmem:[#allocation21 + $0x1b0] sm:$0xff]  ;;  %v2114_v52 = vld [vmem:[#allocation21 + $0x28] sm:$0xff] }
0x1a2f   :  { %2204 = vmatpush.msra.mxu3 %v2136_v25  ;;  %2255 = vmatpush.msra.mxu1 %v2163_v51 }
0x1a30   :  { %v2032_v57 = vadd.f32 %v2031_v54, %v2025_v53  ;;  %v2130_v53 = vld [vmem:[#allocation21 + $0xa8] sm:$0xff] }
0x1a31   :  { %2205 = vmatpush.msra.mxu3 %v2135_v30  ;;  %v2146_v54 = vld [vmem:[#allocation21 + $0x128] sm:$0xff]  ;;  %v2093_v30 = vperm.slane %v2091_v27, 0 }
0x1a32   :  { %v2033_v58 = vadd.f32 %v2032_v57, %v2026_v55  ;;  %v2162_v55 = vld [vmem:[#allocation21 + $0x1a8] sm:$0xff]  ;;  %v2113_v57 = vld [vmem:[#allocation21 + $0x20] sm:$0xff] }
0x1a33   :  { %2256 = vmatpush.msra.mxu1 %v2162_v55 }
0x1a34   :  { %2034 = vadd.xlane.f32.xlu1 %v2033_v58  ;;  %v2129_v58 = vld [vmem:[#allocation21 + $0xa0] sm:$0xff] }
0x1a35   :  { %2257 = vmatpush.msra.mxu1 %v2161_v37 }
0x1a37   :  { %2258 = vmatpush.msra.mxu1 %v2160_v26 }
0x1a6c   :  { %v2005_v1 = vpop.xlane.xlu2 %2004 }
0x1a6d   :  { %v2014_v3 = vmul.f32 %v3415_v46, %v2005_v1  ;;  %v2143_v1 = vld [vmem:[#allocation21 + $0x110] sm:$0xff] }
0x1a6f   :  { %v3435_v5 = vsub.f32 %v1992_v32, %v2014_v3  ;;  %v3437_v6 = vsub.f32 %v1993_v33, %v2014_v3  ;;  %v3439_v8 = vsub.f32 %v1994_v34, %v2014_v3  ;;  %v3441_v39 = vsub.f32 %v1995_v38, %v2014_v3  ;;  %v2118_v32 = vld [vmem:[#allocation21 + $0x48] sm:$0xff]  ;;  %v2117_v38 = vld [vmem:[#allocation21 + $0x40] sm:$0xff]  ;;  %v2159_v3 = vld [vmem:[#allocation21 + $0x190] sm:$0xff] }
0x1a70   :  { %v2134_v33 = vld [vmem:[#allocation21 + $0xc8] sm:$0xff]  ;;  %2183 = vmatpush.msrb.mxu2 %v2118_v32  ;;  %2259 = vmatpush.msra.mxu1 %v2159_v3  ;;  %v2078_v32 = vperm.slane %v2073_v23, 3 }
0x1a71   :  { %v2027_v56 = vmul.f32 %v3435_v5, %v3435_v5  ;;  %v2028_v9 = vmul.f32 %v3437_v6, %v3437_v6  ;;  %v2029_v10 = vmul.f32 %v3439_v8, %v3439_v8  ;;  %v2030_v14 = vmul.f32 %v3441_v39, %v3441_v39  ;;  %v2150_v34 = vld [vmem:[#allocation21 + $0x148] sm:$0xff]  ;;  %2206 = vmatpush.msra.mxu3 %v2134_v33 }
0x1a72   :  { %2229 = vmatpush.msra.mxu0 %v2150_v34  ;;  %2184 = vmatpush.msrb.mxu2 %v2117_v38  ;;  %v2094_v34 = vperm.slane %v2091_v27, 1  ;;  %v2096_v38 = vperm.slane %v2091_v27, 3 }
0x1a73   :  { %v2036_v11 = vadd.f32 %v2028_v9, %v2027_v56  ;;  %2207 = vmatpush.msra.mxu3 %v2133_v40  ;;  %v2110_v56 = vld [vmem:[#allocation21 + $0x8] sm:$0xff] }
0x1a74   :  { %2230 = vmatpush.msra.mxu0 %v2149_v41  ;;  %2185 = vmatpush.msrb.mxu2 %v2116_v43  ;;  %v2126_v9 = vld [vmem:[#allocation21 + $0x88] sm:$0xff] }
0x1a75   :  { %v2037_v19 = vadd.f32 %v2036_v11, %v2029_v10  ;;  %2208 = vmatpush.msra.mxu3 %v2132_v44  ;;  %v2142_v10 = vld [vmem:[#allocation21 + $0x108] sm:$0xff] }
0x1a76   :  { %2231 = vmatpush.msra.mxu0 %v2148_v4  ;;  %2186 = vmatpush.msrb.mxu2 %v2115_v45  ;;  %v2158_v11 = vld [vmem:[#allocation21 + $0x188] sm:$0xff] }
0x1a77   :  { %v2038_v15 = vadd.f32 %v2037_v19, %v2030_v14  ;;  %2209 = vmatpush.msra.mxu3 %v2131_v47  ;;  %v2109_v14 = vld [vmem:[#allocation21] sm:$0xff]  ;;  %2260 = vmatpush.msra.mxu1 %v2158_v11 }
0x1a78   :  { %2232 = vmatpush.msra.mxu0 %v2147_v62  ;;  %2187 = vmatpush.msrb.mxu2 %v2114_v52  ;;  %v2125_v19 = vld [vmem:[#allocation21 + $0x80] sm:$0xff] }
0x1a79   :  { %2039 = vadd.xlane.f32.xlu2 %v2038_v15  ;;  %2210 = vmatpush.msra.mxu3 %v2130_v53  ;;  %v2141_v15 = vld [vmem:[#allocation21 + $0x100] sm:$0xff] }
0x1a7a   :  { %2233 = vmatpush.msra.mxu0 %v2146_v54  ;;  %2188 = vmatpush.msrb.mxu2 %v2113_v57 }
0x1a7b   :  { %2211 = vmatpush.msra.mxu3 %v2129_v58  ;;  %2261 = vmatpush.msra.mxu1 %v2157_v16 }
0x1a7c   :  { %2234 = vmatpush.msra.mxu0 %v2145_v59  ;;  %2189 = vmatpush.msrb.mxu2 %v2112_v60 }
0x1a7d   :  { %2212 = vmatpush.msra.mxu3 %v2128_v24 }
0x1a7e   :  { %2235 = vmatpush.msra.mxu0 %v2144_v61  ;;  %2190 = vmatpush.msrb.mxu2 %v2111_v63 }
0x1a7f   :  { %2213 = vmatpush.msra.mxu3 %v2127_v0 }
0x1a80   :  { %2236 = vmatpush.msra.mxu0 %v2143_v1  ;;  %2191 = vmatpush.msrb.mxu2 %v2110_v56 }
0x1a81   :  { %2214 = vmatpush.msra.mxu3 %v2126_v9 }
0x1a82   :  { %2237 = vmatpush.msra.mxu0 %v2142_v10  ;;  %2192 = vmatpush.msrb.mxu2 %v2109_v14  ;;  %v2404_v10 = vld [vmem:[#allocation22] ss:$0 sm:$0xff] }
0x1a83   :  { %2215 = vmatpush.msra.mxu3 %v2125_v19 }
0x1a84   :  { %2238 = vmatpush.msra.mxu0 %v2141_v15 }
0x1aa7   :  { %v2035_v12 = vpop.xlane.xlu1 %2034 }
0x1aa8   :  { %v2041_v17 = vmul.f32 %v2035_v12, %v3415_v46 }
0x1aaa   :  { %v2043_v18 = vadd.f32 1e-05, %v2041_v17 }
0x1aac   :  { %2517 = vrsqrt.f32 %v2043_v18  ;;  %vm2051_vm9 = vweird.f32 %v2043_v18 }
0x1ab2   :  { %v2518_v20 = vpop.eup %2517 }
0x1ab3   :  { %v2046_v13 = vmul.f32 %v2518_v20, %v2043_v18  ;;  %vm2052_vm6 = vweird.f32 %v2518_v20 }
0x1ab4   :  { %vm2053_vm10 = vmor %vm2051_vm9, %vm2052_vm6 }
0x1ab5   :  { %v2047_v21 = vmul.f32 %v2518_v20, %v2046_v13 }
0x1ab7   :  { %v2048_v22 = vmul.f32 0.5, %v2047_v21 }
0x1ab9   :  { %v2049_v25 = vsub.f32 1.5, %v2048_v22 }
0x1abb   :  { %v2050_v28 = vmul.f32 %v2518_v20, %v2049_v25 }
0x1abd   :  { %v2054_v33 = vsel %vm2053_vm10, %v2518_v20, %v2050_v28 }
0x1abe   :  { %v2065_v40 = vmul.f32 %v2054_v33, %v3418_v48  ;;  %v2066_v41 = vmul.f32 %v2054_v33, %v3420_v49  ;;  %v2067_v42 = vmul.f32 %v2054_v33, %v3422_v2  ;;  %v2068_v43 = vmul.f32 %v2054_v33, %v3424_v50 }
0x1ac0   :  { %v2083_v44 = vmul.f32 %v2075_v29, %v2065_v40  ;;  %v2084_v4 = vmul.f32 %v2076_v31, %v2066_v41  ;;  %v2085_v36 = vmul.f32 %v2077_v7, %v2067_v42  ;;  %v2086_v45 = vmul.f32 %v2078_v32, %v2068_v43 }
0x1ac2   :  { %v2101_v47 = vadd.f32 %v2093_v30, %v2083_v44  ;;  %v2102_v62 = vadd.f32 %v2094_v34, %v2084_v4  ;;  %v2103_v51 = vadd.f32 %v2095_v35, %v2085_v36  ;;  %v2104_v52 = vadd.f32 %v2096_v38, %v2086_v45 }
0x1ac4   :  { %2193 = vmatmul.f32.vlgmr.msrb.gmra.mxu2 %v2101_v47  ;;  %2216 = vmatmul.f32.vlgmr.msra.gmra.mxu3 %v2102_v62 }
0x1ac5   :  { %2239 = vmatmul.f32.vlgmr.msra.gmra.mxu0 %v2103_v51  ;;  %2262 = vmatmul.f32.vlgmr.msra.gmra.mxu1 %v2104_v52 }
0x1aec   :  { %v2040_v53 = vpop.xlane.xlu2 %2039 }
0x1aed   :  { %v2042_v48 = vmul.f32 %v2040_v53, %v3415_v46 }
0x1aef   :  { %v2044_v49 = vadd.f32 1e-05, %v2042_v48 }
0x1af1   :  { %2519 = vrsqrt.f32 %v2044_v49  ;;  %vm2061_vm7 = vweird.f32 %v2044_v49 }
0x1af7   :  { %v2520_v2 = vpop.eup %2519 }
0x1af8   :  { %v2056_v54 = vmul.f32 %v2520_v2, %v2044_v49  ;;  %vm2062_vm11 = vweird.f32 %v2520_v2 }
0x1af9   :  { %vm2063_vm8 = vmor %vm2061_vm7, %vm2062_vm11 }
0x1afa   :  { %v2057_v50 = vmul.f32 %v2520_v2, %v2056_v54 }
0x1afc   :  { %v2058_v55 = vmul.f32 0.5, %v2057_v50 }
0x1afe   :  { %v2059_v57 = vsub.f32 1.5, %v2058_v55 }
0x1b00   :  { %v2060_v58 = vmul.f32 %v2520_v2, %v2059_v57 }
0x1b02   :  { %v2064_v59 = vsel %vm2063_vm8, %v2520_v2, %v2060_v58 }
0x1b03   :  { %v2069_v37 = vmul.f32 %v2064_v59, %v3435_v5  ;;  %v2070_v60 = vmul.f32 %v2064_v59, %v3437_v6  ;;  %v2071_v24 = vmul.f32 %v2064_v59, %v3439_v8  ;;  %v2072_v46 = vmul.f32 %v2064_v59, %v3441_v39 }
0x1b05   :  { %v2087_v61 = vmul.f32 %v2075_v29, %v2069_v37  ;;  %v2088_v26 = vmul.f32 %v2076_v31, %v2070_v60  ;;  %v2089_v63 = vmul.f32 %v2077_v7, %v2071_v24  ;;  %v2090_v0 = vmul.f32 %v2078_v32, %v2072_v46 }
0x1b07   :  { %v2105_v1 = vadd.f32 %v2093_v30, %v2087_v61  ;;  %v2106_v3 = vadd.f32 %v2094_v34, %v2088_v26  ;;  %v2107_v56 = vadd.f32 %v2095_v35, %v2089_v63  ;;  %v2108_v9 = vadd.f32 %v2096_v38, %v2090_v0 }
0x1b09   :  { %2196 = vmatmul.f32.gmra.mxu2 %v2105_v1  ;;  %2219 = vmatmul.f32.gmra.mxu3 %v2106_v3 }
0x1b0a   :  { %2242 = vmatmul.f32.gmra.mxu0 %v2107_v56  ;;  %2265 = vmatmul.f32.gmra.mxu1 %v2108_v9 }
0x1b42   :  { %v2240_v8 = vpop.f32.mrf.mxu0  ;;  %v2263_v39 = vpop.f32.mrf.mxu1 }
0x1b47   :  { %v2194_v5 = vpop.f32.mrf.mxu2  ;;  %v2217_v6 = vpop.f32.mrf.mxu3 }
0x1b48   :  { %v2195_v11 = vadd.f32 %v2404_v10, %v2194_v5 }
0x1b4a   :  { %v2218_v14 = vadd.f32 %v2217_v6, %v2195_v11 }
0x1b4c   :  { %v2241_v19 = vadd.f32 %v2240_v8, %v2218_v14 }
0x1b4e   :  { %v2264_v15 = vadd.f32 %v2263_v39, %v2241_v19 }
0x1b50   :  { %2269 = vst [vmem:[#allocation24] sm:$0xff] %v2264_v15 }
0x1b87   :  { %v2243_v20 = vpop.f32.mrf.mxu0  ;;  %v2266_v21 = vpop.f32.mrf.mxu1 }
0x1b8c   :  { %v2197_v16 = vpop.f32.mrf.mxu2  ;;  %v2220_v17 = vpop.f32.mrf.mxu3 }
0x1b8d   :  { %v2198_v12 = vadd.f32 %v2404_v10, %v2197_v16 }
0x1b8f   :  { %v2221_v18 = vadd.f32 %v2220_v17, %v2198_v12 }
0x1b91   :  { %v2244_v13 = vadd.f32 %v2243_v20, %v2221_v18 }
0x1b93   :  { %v2267_v22 = vadd.f32 %v2266_v21, %v2244_v13 }
0x1b95   :  { %2270 = vst [vmem:[#allocation24 + $0x8] sm:$0xff] %v2267_v22 }
0x1b96   :  { %2283 = dma.vmem_to_hbm [thread:$0]  %s2276_s0, 256, %s2278_s19, [#allocation6], %s3506_s30, %s3506_s30, %s2852_s23  }
0x1b97   :  { %2847 = dma.done.wait [#allocation6], 256  }
0x1b98   :  { %2848 = vsyncadd [#allocation6], 4294967040 }
0x1b99   :  { %2288 = vsyncpa [#allocation5], 1 }
0x1b9a   :  { %2289 = vsyncpa [#allocation8], 1 }
0x1b9b   :  { %2290 = vsyncpa [#allocation11], 1 }
0x1b9c   :  { %2291 = vsyncpa [#allocation14], 1 }
0x1b9d   :  { %2292 = vsyncpa [#allocation17], 1 }
0x1b9e   :  { %2293 = vsyncpa [#allocation20], 1 }
0x1b9f   :  { %2294 = vsyncpa [#allocation23], 1 }
0x1ba0   :  { %2295 = vsyncpa [#allocation6], 1 }

</bundles_post_ra>
